<compile_context>
chip_gen: v5e
topology: v5e:2x2
jax: 0.10.0
libtpu: 0.0.40
codegen_flags: <defaults>
</compile_context>

<pallas_src>
import jax
import jax.numpy as jnp
from jax import lax
from jax.experimental import pallas as pl
from jax.experimental.pallas import tpu as pltpu

jax.config.update("jax_default_matmul_precision", "highest")

BN_EPS = 1e-5


# -----------------------------------------------------------------------------
# Kernel (one batch element per grid step)
# -----------------------------------------------------------------------------
def _separable_block_kernel(x_ref, r_up_ref, r_dn_ref,
                            m1_ref, sh1_ref, m2_ref, sh2_ref,
                            a_l_ref, a_r_ref, e_l_ref, e_r_ref,
                            e_u_ref, e_d_ref, ssel_ref, dsel_ref,
                            out_ref):
    def mm(a, b):
        return jnp.dot(a, b, preferred_element_type=jnp.float32,
                       precision=lax.Precision.HIGHEST)

    r_up = r_up_ref[...]          # (H, H): row h <- row h-1 (zero at h=0)
    r_dn = r_dn_ref[...]          # (H, H): row h <- row h+1 (zero at h=H-1)

    def sep_stage(z, m_ref, sh_ref):
        # ReLU -> depthwise 3x3 (zero pad) -> pointwise 1x1 -> BN, all folded
        # into three banded matrices m_ref[dh] + one per-lane shift.
        zr = jnp.maximum(z, 0.0)
        y = mm(zr, m_ref[1])                       # kernel row dh=1 (same row)
        y = y + mm(mm(r_up, zr), m_ref[0])         # dh=0 (input row h-1)
        y = y + mm(mm(r_dn, zr), m_ref[2])         # dh=2 (input row h+1)
        return y + sh_ref[...]                     # folded biases + BN shift

    x = x_ref[...]                                 # (H, W*C0)
    z1 = sep_stage(x, m1_ref, sh1_ref)             # (H, W*C1)
    z2 = sep_stage(z1, m2_ref, sh2_ref)            # (H, W*C1)

    # MaxPool2d(3, stride=2, padding=1); -inf halo via additive edge masks.
    # Column (W) window max: one-image-column shifts via 0/1 matmuls.
    z_l = mm(z2, a_l_ref[...]) + e_l_ref[...]      # col w-1 (-inf at w=0)
    z_r = mm(z2, a_r_ref[...]) + e_r_ref[...]      # col w+1 (-inf at w=W-1)
    cw = jnp.maximum(z2, jnp.maximum(z_l, z_r))    # (H, W*C1), finite
    # Row (H) window max.
    c_u = mm(r_up, cw) + e_u_ref[...]              # row h-1 (-inf at h=0)
    c_d = mm(r_dn, cw) + e_d_ref[...]              # row h+1 (-inf at h=H-1)
    rm = jnp.maximum(cw, jnp.maximum(c_u, c_d))    # (H, W*C1), finite
    # Stride-2 decimation via exact 0/1 selection matmuls; ONE block store.
    out_ref[...] = mm(dsel_ref[...], mm(rm, ssel_ref[...]))   # (Ho, Wo*C1)


# -----------------------------------------------------------------------------
# Wrapper-side parameter folding
# -----------------------------------------------------------------------------
def _fold_stage(dw_w, dw_b, pw_w, pw_b, g, b, m, v, W):
    """Fold dw3x3 + dw bias + pw1x1 + pw bias + eval BN into three banded
    (W*Cin, W*Cout) matrices (one per kernel row) and a (1, W*Cout) shift."""
    cin = dw_w.shape[0]
    cout = pw_w.shape[0]
    scale = g / jnp.sqrt(v + BN_EPS)                       # (Cout,)
    wpw = jnp.transpose(pw_w[:, :, 0, 0], (1, 0))          # (Cin, Cout)
    wpw_s = wpw * scale[None, :]
    shift = (dw_b @ wpw + pw_b) * scale + (b - m * scale)  # (Cout,)
    # E_kw[w', w] = 1 iff input column w' = w + kw - 1 (zero padding at edges).
    eoff = [jnp.eye(W, k=1, dtype=jnp.float32),
            jnp.eye(W, k=0, dtype=jnp.float32),
            jnp.eye(W, k=-1, dtype=jnp.float32)]
    mats = []
    for dh in range(3):                                    # trace-time only
        m_dh = jnp.zeros((W * cin, W * cout), jnp.float32)
        for kw in range(3):
            a = dw_w[:, 0, dh, kw][:, None] * wpw_s        # (Cin, Cout)
            m_dh = m_dh + jnp.kron(eoff[kw], a)
        mats.append(m_dh)
    return (jnp.stack(mats, 0),
            jnp.tile(shift, W)[None, :].astype(jnp.float32))


@jax.jit
def separable_forward(x_nchw, p):
    """Separable([C0, C1], middle_flow=False) forward. Input/output NCHW."""
    x_nchw = x_nchw.astype(jnp.float32)
    B, C0, H, W = x_nchw.shape
    C1 = p["pw1_w"].shape[0]
    Ho, Wo = (H + 1) // 2, (W + 1) // 2
    L0, L1, Lo = W * C0, W * C1, Wo * C1
    f32 = jnp.float32

    # NCHW -> lane-dense (B*H, W*C0).
    x2d = jnp.transpose(x_nchw, (0, 2, 3, 1)).reshape(B * H, L0)

    m1, sh1 = _fold_stage(p["dw1_w"], p["dw1_b"], p["pw1_w"], p["pw1_b"],
                          p["bn1_g"], p["bn1_b"], p["bn1_m"], p["bn1_v"], W)
    m2, sh2 = _fold_stage(p["dw2_w"], p["dw2_b"], p["pw2_w"], p["pw2_b"],
                          p["bn2_g"], p["bn2_b"], p["bn2_m"], p["bn2_v"], W)

    # Row-shift matrices (shared by conv stages and pool).
    r_up = jnp.eye(H, k=-1, dtype=f32)          # row h <- row h-1
    r_dn = jnp.eye(H, k=1, dtype=f32)           # row h <- row h+1
    # Lane-shift (one image column = C1 lanes) matrices for the pool.
    a_l = jnp.eye(L1, k=C1, dtype=f32)          # lane w*C1+c <- (w-1)*C1+c
    a_r = jnp.eye(L1, k=-C1, dtype=f32)         # lane w*C1+c <- (w+1)*C1+c
    # Additive -inf edge masks (maxpool halo).
    lane = jnp.arange(L1)
    e_l = jnp.where(lane < C1, -jnp.inf, 0.0).astype(f32)[None, :]
    e_r = jnp.where(lane >= (W - 1) * C1, -jnp.inf, 0.0).astype(f32)[None, :]
    rows = jnp.arange(H)
    e_u = jnp.where(rows == 0, -jnp.inf, 0.0).astype(f32)[:, None]
    e_d = jnp.where(rows == H - 1, -jnp.inf, 0.0).astype(f32)[:, None]
    # Stride-2 selection matrices (exact 0/1 picks, done on the MXU).
    wsel = jnp.zeros((W, Wo), f32).at[2 * jnp.arange(Wo),
                                      jnp.arange(Wo)].set(1.0)
    ssel = jnp.kron(wsel, jnp.eye(C1, dtype=f32))            # (W*C1, Wo*C1)
    dsel = jnp.zeros((Ho, H), f32).at[jnp.arange(Ho),
                                      2 * jnp.arange(Ho)].set(1.0)

    out2d = pl.pallas_call(
        _separable_block_kernel,
        out_shape=jax.ShapeDtypeStruct((B * Ho, Lo), jnp.float32),
        grid_spec=pltpu.PrefetchScalarGridSpec(
            num_scalar_prefetch=0,
            grid=(B,),                          # one batch element per step
            in_specs=[
                pl.BlockSpec((H, L0), lambda b: (b, 0)),          # x
                pl.BlockSpec((H, H), lambda b: (0, 0)),           # r_up
                pl.BlockSpec((H, H), lambda b: (0, 0)),           # r_dn
                pl.BlockSpec((3, L0, L1), lambda b: (0, 0, 0)),   # m1
                pl.BlockSpec((1, L1), lambda b: (0, 0)),          # sh1
                pl.BlockSpec((3, L1, L1), lambda b: (0, 0, 0)),   # m2
                pl.BlockSpec((1, L1), lambda b: (0, 0)),          # sh2
                pl.BlockSpec((L1, L1), lambda b: (0, 0)),         # a_l
                pl.BlockSpec((L1, L1), lambda b: (0, 0)),         # a_r
                pl.BlockSpec((1, L1), lambda b: (0, 0)),          # e_l
                pl.BlockSpec((1, L1), lambda b: (0, 0)),          # e_r
                pl.BlockSpec((H, 1), lambda b: (0, 0)),           # e_u
                pl.BlockSpec((H, 1), lambda b: (0, 0)),           # e_d
                pl.BlockSpec((L1, Lo), lambda b: (0, 0)),         # ssel
                pl.BlockSpec((Ho, H), lambda b: (0, 0)),          # dsel
            ],
            out_specs=pl.BlockSpec((Ho, Lo), lambda b: (b, 0)),
        ),
        compiler_params=pltpu.CompilerParams(
            dimension_semantics=("parallel",)),   # v7x: 2 TCs split the batch
    )(x2d, r_up, r_dn, m1, sh1, m2, sh2, a_l, a_r, e_l, e_r, e_u, e_d,
      ssel, dsel)

    out = out2d.reshape(B, Ho, Wo, C1)
    return jnp.transpose(out, (0, 3, 1, 2))       # lane-dense -> NCHW


# -----------------------------------------------------------------------------
# Pure-JAX reference (correctness check only)
# -----------------------------------------------------------------------------
def ref_forward(x, p):
    def dwconv(x, w, b):
        C = x.shape[1]
        y = lax.conv_general_dilated(x, w, (1, 1), [(1, 1), (1, 1)],
                                     dimension_numbers=("NCHW", "OIHW", "NCHW"),
                                     feature_group_count=C)
        return y + b[None, :, None, None]

    def pwconv(x, w, b):
        y = lax.conv_general_dilated(x, w, (1, 1), "VALID",
                                     dimension_numbers=("NCHW", "OIHW", "NCHW"))
        return y + b[None, :, None, None]

    def bn(x, g, be, m, v):
        sc = g / jnp.sqrt(v + BN_EPS)
        return (x - m[None, :, None, None]) * sc[None, :, None, None] \
            + be[None, :, None, None]

    x = jnp.maximum(x, 0.0)
    x = dwconv(x, p["dw1_w"], p["dw1_b"])
    x = pwconv(x, p["pw1_w"], p["pw1_b"])
    x = bn(x, p["bn1_g"], p["bn1_b"], p["bn1_m"], p["bn1_v"])
    x = jnp.maximum(x, 0.0)
    x = dwconv(x, p["dw2_w"], p["dw2_b"])
    x = pwconv(x, p["pw2_w"], p["pw2_b"])
    x = bn(x, p["bn2_g"], p["bn2_b"], p["bn2_m"], p["bn2_v"])
    x = lax.reduce_window(x, -jnp.inf, lax.max, (1, 1, 3, 3), (1, 1, 2, 2),
                          [(0, 0), (0, 0), (1, 1), (1, 1)])
    return x


# -----------------------------------------------------------------------------
# Main
# -----------------------------------------------------------------------------
if __name__ == "__main__":
    B, C0, C1, H, W = 2, 4, 8, 16, 16   # channels = [4, 8]
    key = jax.random.PRNGKey(0)
    ks = jax.random.split(key, 16)

    params = {
        # stage 1: depthwise(C0) + pointwise(C0->C1) + BN(C1)
        "dw1_w": 0.2 * jax.random.normal(ks[0], (C0, 1, 3, 3), jnp.float32),
        "dw1_b": 0.1 * jax.random.normal(ks[1], (C0,), jnp.float32),
        "pw1_w": 0.2 * jax.random.normal(ks[2], (C1, C0, 1, 1), jnp.float32),
        "pw1_b": 0.1 * jax.random.normal(ks[3], (C1,), jnp.float32),
        "bn1_g": 1.0 + 0.1 * jax.random.normal(ks[4], (C1,), jnp.float32),
        "bn1_b": 0.1 * jax.random.normal(ks[5], (C1,), jnp.float32),
        "bn1_m": 0.1 * jax.random.normal(ks[6], (C1,), jnp.float32),
        "bn1_v": jax.random.uniform(ks[7], (C1,), jnp.float32, 0.5, 1.5),
        # stage 2: depthwise(C1) + pointwise(C1->C1) + BN(C1)
        "dw2_w": 0.2 * jax.random.normal(ks[8], (C1, 1, 3, 3), jnp.float32),
        "dw2_b": 0.1 * jax.random.normal(ks[9], (C1,), jnp.float32),
        "pw2_w": 0.2 * jax.random.normal(ks[10], (C1, C1, 1, 1), jnp.float32),
        "pw2_b": 0.1 * jax.random.normal(ks[11], (C1,), jnp.float32),
        "bn2_g": 1.0 + 0.1 * jax.random.normal(ks[12], (C1,), jnp.float32),
        "bn2_b": 0.1 * jax.random.normal(ks[13], (C1,), jnp.float32),
        "bn2_m": 0.1 * jax.random.normal(ks[14], (C1,), jnp.float32),
        "bn2_v": jax.random.uniform(ks[15], (C1,), jnp.float32, 0.5, 1.5),
    }

    x = jax.random.normal(jax.random.PRNGKey(42), (B, C0, H, W), jnp.float32)

    out = jax.block_until_ready(separable_forward(x, params))
    ref = jax.block_until_ready(ref_forward(x, params))

    assert out.shape == (B, C1, H // 2, W // 2), out.shape
    assert jnp.allclose(out, ref, rtol=2e-3, atol=2e-3), \
        float(jnp.max(jnp.abs(out - ref)))

    print("KERNEL_OK")
</pallas_src>

<mosaic_0001>
module attributes {stable_mosaic.version = 11 : i64} {
  func.func @_separable_block_kernel(%arg0: i32, %arg1: memref<16x64xf32, #tpu.memory_space<vmem>>, %arg2: memref<16x16xf32, #tpu.memory_space<vmem>>, %arg3: memref<16x16xf32, #tpu.memory_space<vmem>>, %arg4: memref<3x64x128xf32, #tpu.memory_space<vmem>>, %arg5: memref<1x128xf32, #tpu.memory_space<vmem>>, %arg6: memref<3x128x128xf32, #tpu.memory_space<vmem>>, %arg7: memref<1x128xf32, #tpu.memory_space<vmem>>, %arg8: memref<128x128xf32, #tpu.memory_space<vmem>>, %arg9: memref<128x128xf32, #tpu.memory_space<vmem>>, %arg10: memref<1x128xf32, #tpu.memory_space<vmem>>, %arg11: memref<1x128xf32, #tpu.memory_space<vmem>>, %arg12: memref<16x1xf32, #tpu.memory_space<vmem>>, %arg13: memref<16x1xf32, #tpu.memory_space<vmem>>, %arg14: memref<128x64xf32, #tpu.memory_space<vmem>>, %arg15: memref<8x16xf32, #tpu.memory_space<vmem>>, %arg16: memref<8x64xf32, #tpu.memory_space<vmem>>) attributes {dimension_semantics = [#tpu.dimension_semantics<parallel>], iteration_bounds = array<i64: 2>, scalar_prefetch = 0 : i64, scratch_operands = 0 : i64, tpu.core_type = #tpu.core_type<tc>, window_params = [{transform_indices = @transform_0, window_bounds = array<i64: 16, 64>}, {pipeline_mode = #tpu.pipeline_mode<synchronous>, transform_indices = @transform_1, window_bounds = array<i64: 16, 16>}, {pipeline_mode = #tpu.pipeline_mode<synchronous>, transform_indices = @transform_2, window_bounds = array<i64: 16, 16>}, {pipeline_mode = #tpu.pipeline_mode<synchronous>, transform_indices = @transform_3, window_bounds = array<i64: 3, 64, 128>}, {pipeline_mode = #tpu.pipeline_mode<synchronous>, transform_indices = @transform_4, window_bounds = array<i64: 1, 128>}, {pipeline_mode = #tpu.pipeline_mode<synchronous>, transform_indices = @transform_5, window_bounds = array<i64: 3, 128, 128>}, {pipeline_mode = #tpu.pipeline_mode<synchronous>, transform_indices = @transform_6, window_bounds = array<i64: 1, 128>}, {pipeline_mode = #tpu.pipeline_mode<synchronous>, transform_indices = @transform_7, window_bounds = array<i64: 128, 128>}, {pipeline_mode = #tpu.pipeline_mode<synchronous>, transform_indices = @transform_8, window_bounds = array<i64: 128, 128>}, {pipeline_mode = #tpu.pipeline_mode<synchronous>, transform_indices = @transform_9, window_bounds = array<i64: 1, 128>}, {pipeline_mode = #tpu.pipeline_mode<synchronous>, transform_indices = @transform_10, window_bounds = array<i64: 1, 128>}, {pipeline_mode = #tpu.pipeline_mode<synchronous>, transform_indices = @transform_11, window_bounds = array<i64: 16, 1>}, {pipeline_mode = #tpu.pipeline_mode<synchronous>, transform_indices = @transform_12, window_bounds = array<i64: 16, 1>}, {pipeline_mode = #tpu.pipeline_mode<synchronous>, transform_indices = @transform_13, window_bounds = array<i64: 128, 64>}, {pipeline_mode = #tpu.pipeline_mode<synchronous>, transform_indices = @transform_14, window_bounds = array<i64: 8, 16>}, {transform_indices = @transform_15, window_bounds = array<i64: 8, 64>}]} {
    %c0 = arith.constant 0 : index
    %c0_0 = arith.constant 0 : index
    %0 = vector.load %arg2[%c0, %c0_0] : memref<16x16xf32, #tpu.memory_space<vmem>>, vector<16x16xf32>
    %c0_1 = arith.constant 0 : index
    %c0_2 = arith.constant 0 : index
    %1 = vector.load %arg3[%c0_1, %c0_2] : memref<16x16xf32, #tpu.memory_space<vmem>>, vector<16x16xf32>
    %c0_3 = arith.constant 0 : index
    %c0_4 = arith.constant 0 : index
    %2 = vector.load %arg1[%c0_3, %c0_4] : memref<16x64xf32, #tpu.memory_space<vmem>>, vector<16x64xf32>
    %cst = arith.constant 0.000000e+00 : f32
    %3 = vector.broadcast %cst : f32 to vector<16x64xf32>
    %4 = arith.maximumf %2, %3 : vector<16x64xf32>
    %c1 = arith.constant 1 : index
    %c0_5 = arith.constant 0 : index
    %c0_6 = arith.constant 0 : index
    %5 = vector.load %arg4[%c1, %c0_5, %c0_6] : memref<3x64x128xf32, #tpu.memory_space<vmem>>, vector<1x64x128xf32>
    %6 = vector.shape_cast %5 : vector<1x64x128xf32> to vector<64x128xf32>
    %cst_7 = arith.constant dense<0.000000e+00> : vector<16x128xf32>
    %7 = tpu.matmul %4, %6, %cst_7 {dimension_numbers = #tpu.dot_dimension_numbers<[1], [0], [0], [1], [0, 0, 1, 1], [], []>, precision = #tpu.contract_precision<fp32>} : vector<16x64xf32>, vector<64x128xf32>, vector<16x128xf32> -> vector<16x128xf32>
    %cst_8 = arith.constant dense<0.000000e+00> : vector<16x64xf32>
    %8 = tpu.matmul %0, %4, %cst_8 {dimension_numbers = #tpu.dot_dimension_numbers<[1], [0], [0], [1], [0, 0, 1, 1], [], []>, precision = #tpu.contract_precision<fp32>} : vector<16x16xf32>, vector<16x64xf32>, vector<16x64xf32> -> vector<16x64xf32>
    %c0_9 = arith.constant 0 : index
    %c0_10 = arith.constant 0 : index
    %c0_11 = arith.constant 0 : index
    %9 = vector.load %arg4[%c0_9, %c0_10, %c0_11] : memref<3x64x128xf32, #tpu.memory_space<vmem>>, vector<1x64x128xf32>
    %10 = vector.shape_cast %9 : vector<1x64x128xf32> to vector<64x128xf32>
    %cst_12 = arith.constant dense<0.000000e+00> : vector<16x128xf32>
    %11 = tpu.matmul %8, %10, %cst_12 {dimension_numbers = #tpu.dot_dimension_numbers<[1], [0], [0], [1], [0, 0, 1, 1], [], []>, precision = #tpu.contract_precision<fp32>} : vector<16x64xf32>, vector<64x128xf32>, vector<16x128xf32> -> vector<16x128xf32>
    %12 = arith.addf %7, %11 : vector<16x128xf32>
    %cst_13 = arith.constant dense<0.000000e+00> : vector<16x64xf32>
    %13 = tpu.matmul %1, %4, %cst_13 {dimension_numbers = #tpu.dot_dimension_numbers<[1], [0], [0], [1], [0, 0, 1, 1], [], []>, precision = #tpu.contract_precision<fp32>} : vector<16x16xf32>, vector<16x64xf32>, vector<16x64xf32> -> vector<16x64xf32>
    %c2 = arith.constant 2 : index
    %c0_14 = arith.constant 0 : index
    %c0_15 = arith.constant 0 : index
    %14 = vector.load %arg4[%c2, %c0_14, %c0_15] : memref<3x64x128xf32, #tpu.memory_space<vmem>>, vector<1x64x128xf32>
    %15 = vector.shape_cast %14 : vector<1x64x128xf32> to vector<64x128xf32>
    %cst_16 = arith.constant dense<0.000000e+00> : vector<16x128xf32>
    %16 = tpu.matmul %13, %15, %cst_16 {dimension_numbers = #tpu.dot_dimension_numbers<[1], [0], [0], [1], [0, 0, 1, 1], [], []>, precision = #tpu.contract_precision<fp32>} : vector<16x64xf32>, vector<64x128xf32>, vector<16x128xf32> -> vector<16x128xf32>
    %17 = arith.addf %12, %16 : vector<16x128xf32>
    %c0_17 = arith.constant 0 : index
    %c0_18 = arith.constant 0 : index
    %18 = vector.load %arg5[%c0_17, %c0_18] : memref<1x128xf32, #tpu.memory_space<vmem>>, vector<1x128xf32>
    %19 = vector.broadcast %18 : vector<1x128xf32> to vector<16x128xf32>
    %20 = arith.addf %17, %19 : vector<16x128xf32>
    %cst_19 = arith.constant 0.000000e+00 : f32
    %21 = vector.broadcast %cst_19 : f32 to vector<16x128xf32>
    %22 = arith.maximumf %20, %21 : vector<16x128xf32>
    %c1_20 = arith.constant 1 : index
    %c0_21 = arith.constant 0 : index
    %c0_22 = arith.constant 0 : index
    %23 = vector.load %arg6[%c1_20, %c0_21, %c0_22] : memref<3x128x128xf32, #tpu.memory_space<vmem>>, vector<1x128x128xf32>
    %24 = vector.shape_cast %23 : vector<1x128x128xf32> to vector<128x128xf32>
    %cst_23 = arith.constant dense<0.000000e+00> : vector<16x128xf32>
    %25 = tpu.matmul %22, %24, %cst_23 {dimension_numbers = #tpu.dot_dimension_numbers<[1], [0], [0], [1], [0, 0, 1, 1], [], []>, precision = #tpu.contract_precision<fp32>} : vector<16x128xf32>, vector<128x128xf32>, vector<16x128xf32> -> vector<16x128xf32>
    %cst_24 = arith.constant dense<0.000000e+00> : vector<16x128xf32>
    %26 = tpu.matmul %0, %22, %cst_24 {dimension_numbers = #tpu.dot_dimension_numbers<[1], [0], [0], [1], [0, 0, 1, 1], [], []>, precision = #tpu.contract_precision<fp32>} : vector<16x16xf32>, vector<16x128xf32>, vector<16x128xf32> -> vector<16x128xf32>
    %c0_25 = arith.constant 0 : index
    %c0_26 = arith.constant 0 : index
    %c0_27 = arith.constant 0 : index
    %27 = vector.load %arg6[%c0_25, %c0_26, %c0_27] : memref<3x128x128xf32, #tpu.memory_space<vmem>>, vector<1x128x128xf32>
    %28 = vector.shape_cast %27 : vector<1x128x128xf32> to vector<128x128xf32>
    %cst_28 = arith.constant dense<0.000000e+00> : vector<16x128xf32>
    %29 = tpu.matmul %26, %28, %cst_28 {dimension_numbers = #tpu.dot_dimension_numbers<[1], [0], [0], [1], [0, 0, 1, 1], [], []>, precision = #tpu.contract_precision<fp32>} : vector<16x128xf32>, vector<128x128xf32>, vector<16x128xf32> -> vector<16x128xf32>
    %30 = arith.addf %25, %29 : vector<16x128xf32>
    %cst_29 = arith.constant dense<0.000000e+00> : vector<16x128xf32>
    %31 = tpu.matmul %1, %22, %cst_29 {dimension_numbers = #tpu.dot_dimension_numbers<[1], [0], [0], [1], [0, 0, 1, 1], [], []>, precision = #tpu.contract_precision<fp32>} : vector<16x16xf32>, vector<16x128xf32>, vector<16x128xf32> -> vector<16x128xf32>
    %c2_30 = arith.constant 2 : index
    %c0_31 = arith.constant 0 : index
    %c0_32 = arith.constant 0 : index
    %32 = vector.load %arg6[%c2_30, %c0_31, %c0_32] : memref<3x128x128xf32, #tpu.memory_space<vmem>>, vector<1x128x128xf32>
    %33 = vector.shape_cast %32 : vector<1x128x128xf32> to vector<128x128xf32>
    %cst_33 = arith.constant dense<0.000000e+00> : vector<16x128xf32>
    %34 = tpu.matmul %31, %33, %cst_33 {dimension_numbers = #tpu.dot_dimension_numbers<[1], [0], [0], [1], [0, 0, 1, 1], [], []>, precision = #tpu.contract_precision<fp32>} : vector<16x128xf32>, vector<128x128xf32>, vector<16x128xf32> -> vector<16x128xf32>
    %35 = arith.addf %30, %34 : vector<16x128xf32>
    %c0_34 = arith.constant 0 : index
    %c0_35 = arith.constant 0 : index
    %36 = vector.load %arg7[%c0_34, %c0_35] : memref<1x128xf32, #tpu.memory_space<vmem>>, vector<1x128xf32>
    %37 = vector.broadcast %36 : vector<1x128xf32> to vector<16x128xf32>
    %38 = arith.addf %35, %37 : vector<16x128xf32>
    %c0_36 = arith.constant 0 : index
    %c0_37 = arith.constant 0 : index
    %39 = vector.load %arg8[%c0_36, %c0_37] : memref<128x128xf32, #tpu.memory_space<vmem>>, vector<128x128xf32>
    %cst_38 = arith.constant dense<0.000000e+00> : vector<16x128xf32>
    %40 = tpu.matmul %38, %39, %cst_38 {dimension_numbers = #tpu.dot_dimension_numbers<[1], [0], [0], [1], [0, 0, 1, 1], [], []>, precision = #tpu.contract_precision<fp32>} : vector<16x128xf32>, vector<128x128xf32>, vector<16x128xf32> -> vector<16x128xf32>
    %c0_39 = arith.constant 0 : index
    %c0_40 = arith.constant 0 : index
    %41 = vector.load %arg10[%c0_39, %c0_40] : memref<1x128xf32, #tpu.memory_space<vmem>>, vector<1x128xf32>
    %42 = vector.broadcast %41 : vector<1x128xf32> to vector<16x128xf32>
    %43 = arith.addf %40, %42 : vector<16x128xf32>
    %c0_41 = arith.constant 0 : index
    %c0_42 = arith.constant 0 : index
    %44 = vector.load %arg9[%c0_41, %c0_42] : memref<128x128xf32, #tpu.memory_space<vmem>>, vector<128x128xf32>
    %cst_43 = arith.constant dense<0.000000e+00> : vector<16x128xf32>
    %45 = tpu.matmul %38, %44, %cst_43 {dimension_numbers = #tpu.dot_dimension_numbers<[1], [0], [0], [1], [0, 0, 1, 1], [], []>, precision = #tpu.contract_precision<fp32>} : vector<16x128xf32>, vector<128x128xf32>, vector<16x128xf32> -> vector<16x128xf32>
    %c0_44 = arith.constant 0 : index
    %c0_45 = arith.constant 0 : index
    %46 = vector.load %arg11[%c0_44, %c0_45] : memref<1x128xf32, #tpu.memory_space<vmem>>, vector<1x128xf32>
    %47 = vector.broadcast %46 : vector<1x128xf32> to vector<16x128xf32>
    %48 = arith.addf %45, %47 : vector<16x128xf32>
    %49 = arith.maximumf %43, %48 : vector<16x128xf32>
    %50 = arith.maximumf %38, %49 : vector<16x128xf32>
    %cst_46 = arith.constant dense<0.000000e+00> : vector<16x128xf32>
    %51 = tpu.matmul %0, %50, %cst_46 {dimension_numbers = #tpu.dot_dimension_numbers<[1], [0], [0], [1], [0, 0, 1, 1], [], []>, precision = #tpu.contract_precision<fp32>} : vector<16x16xf32>, vector<16x128xf32>, vector<16x128xf32> -> vector<16x128xf32>
    %c0_47 = arith.constant 0 : index
    %c0_48 = arith.constant 0 : index
    %52 = vector.load %arg12[%c0_47, %c0_48] : memref<16x1xf32, #tpu.memory_space<vmem>>, vector<16x1xf32>
    %53 = vector.broadcast %52 : vector<16x1xf32> to vector<16x128xf32>
    %54 = arith.addf %51, %53 : vector<16x128xf32>
    %cst_49 = arith.constant dense<0.000000e+00> : vector<16x128xf32>
    %55 = tpu.matmul %1, %50, %cst_49 {dimension_numbers = #tpu.dot_dimension_numbers<[1], [0], [0], [1], [0, 0, 1, 1], [], []>, precision = #tpu.contract_precision<fp32>} : vector<16x16xf32>, vector<16x128xf32>, vector<16x128xf32> -> vector<16x128xf32>
    %c0_50 = arith.constant 0 : index
    %c0_51 = arith.constant 0 : index
    %56 = vector.load %arg13[%c0_50, %c0_51] : memref<16x1xf32, #tpu.memory_space<vmem>>, vector<16x1xf32>
    %57 = vector.broadcast %56 : vector<16x1xf32> to vector<16x128xf32>
    %58 = arith.addf %55, %57 : vector<16x128xf32>
    %59 = arith.maximumf %54, %58 : vector<16x128xf32>
    %60 = arith.maximumf %50, %59 : vector<16x128xf32>
    %c0_52 = arith.constant 0 : index
    %c0_53 = arith.constant 0 : index
    %61 = vector.load %arg15[%c0_52, %c0_53] : memref<8x16xf32, #tpu.memory_space<vmem>>, vector<8x16xf32>
    %c0_54 = arith.constant 0 : index
    %c0_55 = arith.constant 0 : index
    %62 = vector.load %arg14[%c0_54, %c0_55] : memref<128x64xf32, #tpu.memory_space<vmem>>, vector<128x64xf32>
    %cst_56 = arith.constant dense<0.000000e+00> : vector<16x64xf32>
    %63 = tpu.matmul %60, %62, %cst_56 {dimension_numbers = #tpu.dot_dimension_numbers<[1], [0], [0], [1], [0, 0, 1, 1], [], []>, precision = #tpu.contract_precision<fp32>} : vector<16x128xf32>, vector<128x64xf32>, vector<16x64xf32> -> vector<16x64xf32>
    %cst_57 = arith.constant dense<0.000000e+00> : vector<8x64xf32>
    %64 = tpu.matmul %61, %63, %cst_57 {dimension_numbers = #tpu.dot_dimension_numbers<[1], [0], [0], [1], [0, 0, 1, 1], [], []>, precision = #tpu.contract_precision<fp32>} : vector<8x16xf32>, vector<16x64xf32>, vector<8x64xf32> -> vector<8x64xf32>
    %c0_58 = arith.constant 0 : index
    %c0_59 = arith.constant 0 : index
    %65 = vector.load %arg16[%c0_58, %c0_59] : memref<8x64xf32, #tpu.memory_space<vmem>>, vector<8x64xf32>
    tpu.vector_store %arg16[%c0_58, %c0_59], %64 {strides = array<i32>} : memref<8x64xf32, #tpu.memory_space<vmem>>, vector<8x64xf32>,
    return
  }
  func.func @transform_0(%arg0: i32) -> (i32, i32) {
    %c0_i32 = arith.constant 0 : i32
    %c0_i32_0 = arith.constant 0 : i32
    return %arg0, %c0_i32 : i32, i32
  }
  func.func @transform_1(%arg0: i32) -> (i32, i32) {
    %c0_i32 = arith.constant 0 : i32
    %c0_i32_0 = arith.constant 0 : i32
    %c0_i32_1 = arith.constant 0 : i32
    return %c0_i32, %c0_i32_0 : i32, i32
  }
  func.func @transform_2(%arg0: i32) -> (i32, i32) {
    %c0_i32 = arith.constant 0 : i32
    %c0_i32_0 = arith.constant 0 : i32
    %c0_i32_1 = arith.constant 0 : i32
    return %c0_i32, %c0_i32_0 : i32, i32
  }
  func.func @transform_3(%arg0: i32) -> (i32, i32, i32) {
    %c0_i32 = arith.constant 0 : i32
    %c0_i32_0 = arith.constant 0 : i32
    %c0_i32_1 = arith.constant 0 : i32
    %c0_i32_2 = arith.constant 0 : i32
    return %c0_i32, %c0_i32_0, %c0_i32_1 : i32, i32, i32
  }
  func.func @transform_4(%arg0: i32) -> (i32, i32) {
    %c0_i32 = arith.constant 0 : i32
    %c0_i32_0 = arith.constant 0 : i32
    %c0_i32_1 = arith.constant 0 : i32
    return %c0_i32, %c0_i32_0 : i32, i32
  }
  func.func @transform_5(%arg0: i32) -> (i32, i32, i32) {
    %c0_i32 = arith.constant 0 : i32
    %c0_i32_0 = arith.constant 0 : i32
    %c0_i32_1 = arith.constant 0 : i32
    %c0_i32_2 = arith.constant 0 : i32
    return %c0_i32, %c0_i32_0, %c0_i32_1 : i32, i32, i32
  }
  func.func @transform_6(%arg0: i32) -> (i32, i32) {
    %c0_i32 = arith.constant 0 : i32
    %c0_i32_0 = arith.constant 0 : i32
    %c0_i32_1 = arith.constant 0 : i32
    return %c0_i32, %c0_i32_0 : i32, i32
  }
  func.func @transform_7(%arg0: i32) -> (i32, i32) {
    %c0_i32 = arith.constant 0 : i32
    %c0_i32_0 = arith.constant 0 : i32
    %c0_i32_1 = arith.constant 0 : i32
    return %c0_i32, %c0_i32_0 : i32, i32
  }
  func.func @transform_8(%arg0: i32) -> (i32, i32) {
    %c0_i32 = arith.constant 0 : i32
    %c0_i32_0 = arith.constant 0 : i32
    %c0_i32_1 = arith.constant 0 : i32
    return %c0_i32, %c0_i32_0 : i32, i32
  }
  func.func @transform_9(%arg0: i32) -> (i32, i32) {
    %c0_i32 = arith.constant 0 : i32
    %c0_i32_0 = arith.constant 0 : i32
    %c0_i32_1 = arith.constant 0 : i32
    return %c0_i32, %c0_i32_0 : i32, i32
  }
  func.func @transform_10(%arg0: i32) -> (i32, i32) {
    %c0_i32 = arith.constant 0 : i32
    %c0_i32_0 = arith.constant 0 : i32
    %c0_i32_1 = arith.constant 0 : i32
    return %c0_i32, %c0_i32_0 : i32, i32
  }
  func.func @transform_11(%arg0: i32) -> (i32, i32) {
    %c0_i32 = arith.constant 0 : i32
    %c0_i32_0 = arith.constant 0 : i32
    %c0_i32_1 = arith.constant 0 : i32
    return %c0_i32, %c0_i32_0 : i32, i32
  }
  func.func @transform_12(%arg0: i32) -> (i32, i32) {
    %c0_i32 = arith.constant 0 : i32
    %c0_i32_0 = arith.constant 0 : i32
    %c0_i32_1 = arith.constant 0 : i32
    return %c0_i32, %c0_i32_0 : i32, i32
  }
  func.func @transform_13(%arg0: i32) -> (i32, i32) {
    %c0_i32 = arith.constant 0 : i32
    %c0_i32_0 = arith.constant 0 : i32
    %c0_i32_1 = arith.constant 0 : i32
    return %c0_i32, %c0_i32_0 : i32, i32
  }
  func.func @transform_14(%arg0: i32) -> (i32, i32) {
    %c0_i32 = arith.constant 0 : i32
    %c0_i32_0 = arith.constant 0 : i32
    %c0_i32_1 = arith.constant 0 : i32
    return %c0_i32, %c0_i32_0 : i32, i32
  }
  func.func @transform_15(%arg0: i32) -> (i32, i32) {
    %c0_i32 = arith.constant 0 : i32
    %c0_i32_0 = arith.constant 0 : i32
    return %arg0, %c0_i32 : i32, i32
  }
}

</mosaic_0001>

<bundles_post_ra>
// kernel: tile.13
= control target key start
LH: loop header
LB: loop body
LE: loop exit
PB: predicated region body
PF: predicated region fallthrough
CT: control target
= control target key end

     0   :  { %s28_s0 = inlined_call_operand.vmem [shape: f32[8], index: 0, kind: input, shape index: {}]   ;;  %s29_s1 = inlined_call_operand.vmem [shape: f32[16,8], index: 1, kind: output, shape index: {}]  }
   0x1   :  { %v4_v0 = vld [vmem:[%s28_s0] ss:$0 sm:$0xff] }
   0x2   :  { %5 = vst [vmem:[%s29_s1] sm:$0xff] %v4_v0 }
   0x3   :  { %8 = vst [vmem:[%s29_s1 + $0x8] sm:$0xff] %v4_v0 }

// kernel: tile.14
= control target key start
LH: loop header
LB: loop body
LE: loop exit
PB: predicated region body
PF: predicated region fallthrough
CT: control target
= control target key end

     0   :  { %s131_s10 = smov 120   ;;  %s132_s11 = smov 104   ;;  %vm3_vm0 = vcmask 64512   ;;  %vm9_vm1 = vcmask 1048512   ;;  %vm15_vm2 = vcmask 982912   ;;  %vm21_vm3 = vcmask 917312   ;;  %s207_s0 = inlined_call_operand.vmem [shape: f32[16,8], index: 0, kind: input, shape index: {}]   ;;  %s208_s1 = inlined_call_operand.vmem [shape: f32[1,128], index: 1, kind: output, shape index: {}]  }
   0x1   :  { %v101_v0 = vld [vmem:[%s207_s0 + $0xf] sm:$0x1]   ;;  %v103_v1 = vld [vmem:[%s207_s0 + $0xd] sm:$0x1]   ;;  %v105_v2 = vld [vmem:[%s207_s0 + $0xb] sm:$0x1]  }
   0x2   :  { %7 = vrot.lane.b32.xlu0 %v101_v0, %s131_s10  ;;  %19 = vrot.lane.b32.xlu1 %v103_v1, %s132_s11  ;;  %s133_s14 = smov 88   ;;  %v102_v3 = vld [vmem:[%s207_s0 + $0xe] sm:$0x1]   ;;  %v104_v4 = vld [vmem:[%s207_s0 + $0xc] sm:$0x1]   ;;  %s134_s19 = smov 112  }
   0x3   :  { %31 = vrot.lane.b32.xlu2 %v105_v2, %s133_s14  ;;  %s135_s20 = smov 96   ;;  %v106_v5 = vld [vmem:[%s207_s0 + $0xa] sm:$0x1]   ;;  %s136_s23 = smov 80   ;;  %v107_v6 = vld [vmem:[%s207_s0 + $0x9] sm:$0x1]  }
   0x4   :  { %v108_v7 = vld [vmem:[%s207_s0 + $0x8] sm:$0x1]   ;;  %s137_s28 = smov 72   ;;  %s138_s29 = smov 64   ;;  %v109_v8 = vld [vmem:[%s207_s0 + $0x7] sm:$0x1]  }
   0x5   :  { %s139_s3 = smov 56   ;;  %v110_v9 = vld [vmem:[%s207_s0 + $0x6] sm:$0x1]   ;;  %v111_v10 = vld [vmem:[%s207_s0 + $0x5] sm:$0x1]   ;;  %s140_s8 = smov 48  }
   0x6   :  { %s141_s9 = smov 40   ;;  %v112_v11 = vld [vmem:[%s207_s0 + $0x4] sm:$0x1]   ;;  %s142_s12 = smov 32   ;;  %v113_v12 = vld [vmem:[%s207_s0 + $0x3] sm:$0x1]  }
   0x7   :  { %v114_v13 = vld [vmem:[%s207_s0 + $0x2] sm:$0x1]   ;;  %s143_s17 = smov 24   ;;  %s144_s18 = smov 16   ;;  %v115_v14 = vld [vmem:[%s207_s0 + $0x1] sm:$0x1]  }
   0x8   :  { %s145_s21 = smov 8   ;;  %v2_v15 = vld [vmem:[%s207_s0] sm:$0x1]   ;;  %vm27_vm4 = vcmask 851712   ;;  %vm33_vm5 = vcmask 786112   ;;  %vm39_vm6 = vcmask 720512  }
   0x9   :  { %4 = vst.msk [vmem:[#allocation0] sm:$0x1] %vm3_vm0, %v2_v15   ;;  %vm45_vm7 = vcmask 654912   ;;  %vm51_vm8 = vcmask 589312   ;;  %vm57_vm9 = vcmask 523712   ;;  %vm63_vm10 = vcmask 458112  }
   0xa   :  { %13 = vrot.lane.b32.xlu0 %v102_v3, %s134_s19  ;;  %25 = vrot.lane.b32.xlu1 %v104_v4, %s135_s20  ;;  %vm69_vm11 = vcmask 392512   ;;  %vm75_vm12 = vcmask 326912   ;;  %vm81_vm13 = vcmask 261312   ;;  %vm87_vm14 = vcmask 195712  }
   0xb   :  { %37 = vrot.lane.b32.xlu2 %v106_v5, %s136_s23  ;;  %vm93_vm15 = vcmask 130112  }
  0x12   :  { %43 = vrot.lane.b32.xlu0 %v107_v6, %s137_s28  ;;  %49 = vrot.lane.b32.xlu1 %v108_v7, %s138_s29 }
  0x13   :  { %55 = vrot.lane.b32.xlu2 %v109_v8, %s139_s3 }
  0x1a   :  { %61 = vrot.lane.b32.xlu0 %v110_v9, %s140_s8  ;;  %67 = vrot.lane.b32.xlu1 %v111_v10, %s141_s9 }
  0x1b   :  { %73 = vrot.lane.b32.xlu2 %v112_v11, %s142_s12 }
  0x22   :  { %79 = vrot.lane.b32.xlu0 %v113_v12, %s143_s17  ;;  %85 = vrot.lane.b32.xlu1 %v114_v13, %s144_s18 }
  0x23   :  { %91 = vrot.lane.b32.xlu2 %v115_v14, %s145_s21 }
  0x5d   :  { %v32_v16 = vpop.permute.xlu2 %31  }
  0x65   :  { %v38_v17 = vpop.permute.xlu2 %37  }
  0x6d   :  { %v56_v18 = vpop.permute.xlu2 %55  }
  0x74   :  { %v8_v19 = vpop.permute.xlu0 %7   ;;  %v20_v20 = vpop.permute.xlu1 %19  }
  0x75   :  { %10 = vst.msk [vmem:[#allocation0] sm:$0x1] %vm9_vm1, %v8_v19   ;;  %v74_v21 = vpop.permute.xlu2 %73  }
  0x7c   :  { %v14_v22 = vpop.permute.xlu0 %13   ;;  %v26_v23 = vpop.permute.xlu1 %25  }
  0x7d   :  { %16 = vst.msk [vmem:[#allocation0] sm:$0x1] %vm15_vm2, %v14_v22   ;;  %v92_v24 = vpop.permute.xlu2 %91  }
  0x7e   :  { %22 = vst.msk [vmem:[#allocation0] sm:$0x1] %vm21_vm3, %v20_v20  }
  0x7f   :  { %28 = vst.msk [vmem:[#allocation0] sm:$0x1] %vm27_vm4, %v26_v23  }
  0x80   :  { %34 = vst.msk [vmem:[#allocation0] sm:$0x1] %vm33_vm5, %v32_v16  }
  0x81   :  { %40 = vst.msk [vmem:[#allocation0] sm:$0x1] %vm39_vm6, %v38_v17  }
  0x84   :  { %v44_v25 = vpop.permute.xlu0 %43   ;;  %v50_v26 = vpop.permute.xlu1 %49  }
  0x85   :  { %46 = vst.msk [vmem:[#allocation0] sm:$0x1] %vm45_vm7, %v44_v25  }
  0x86   :  { %52 = vst.msk [vmem:[#allocation0] sm:$0x1] %vm51_vm8, %v50_v26  }
  0x87   :  { %58 = vst.msk [vmem:[#allocation0] sm:$0x1] %vm57_vm9, %v56_v18  }
  0x8c   :  { %v62_v27 = vpop.permute.xlu0 %61   ;;  %v68_v28 = vpop.permute.xlu1 %67  }
  0x8d   :  { %64 = vst.msk [vmem:[#allocation0] sm:$0x1] %vm63_vm10, %v62_v27  }
  0x8e   :  { %70 = vst.msk [vmem:[#allocation0] sm:$0x1] %vm69_vm11, %v68_v28  }
  0x8f   :  { %76 = vst.msk [vmem:[#allocation0] sm:$0x1] %vm75_vm12, %v74_v21  }
  0x94   :  { %v80_v29 = vpop.permute.xlu0 %79   ;;  %v86_v30 = vpop.permute.xlu1 %85  }
  0x95   :  { %82 = vst.msk [vmem:[#allocation0] sm:$0x1] %vm81_vm13, %v80_v29  }
  0x96   :  { %88 = vst.msk [vmem:[#allocation0] sm:$0x1] %vm87_vm14, %v86_v30  }
  0x97   :  { %94 = vst.msk [vmem:[#allocation0] sm:$0x1] %vm93_vm15, %v92_v24  }
  0x9e   :  { %v97_v31 = vld [vmem:[#allocation0] sm:$0x1] }
  0x9f   :  { %100 = vst [vmem:[%s208_s1] sm:$0x1] %v97_v31 }

// kernel: separable_forward.1
= control target key start
LH: loop header
LB: loop body
LE: loop exit
PB: predicated region body
PF: predicated region fallthrough
CT: control target
= control target key end

     0   :  { %s5272_s18 = smov 0   ;;  %s7825_s0 = inlined_call_operand.vmem [shape: f32[32,64], index: 0, kind: input, shape index: {}]   ;;  %s7826_s1 = inlined_call_operand.vmem [shape: f32[16,16], index: 1, kind: input, shape index: {}]   ;;  %s7827_s2 = inlined_call_operand.vmem [shape: f32[16,16], index: 2, kind: input, shape index: {}]   ;;  %s7828_s3 = inlined_call_operand.vmem [shape: f32[3,64,128], index: 3, kind: input, shape index: {}]   ;;  %s7829_s4 = inlined_call_operand.vmem [shape: f32[1,128], index: 4, kind: input, shape index: {}]   ;;  %s7830_s5 = inlined_call_operand.vmem [shape: f32[3,128,128], index: 5, kind: input, shape index: {}]   ;;  %s7831_s6 = inlined_call_operand.vmem [shape: f32[1,128], index: 6, kind: input, shape index: {}]   ;;  %s7832_s7 = inlined_call_operand.vmem [shape: f32[128,128], index: 7, kind: input, shape index: {}]   ;;  %s7833_s8 = inlined_call_operand.vmem [shape: f32[128,128], index: 8, kind: input, shape index: {}]   ;;  %s7834_s9 = inlined_call_operand.vmem [shape: f32[1,128], index: 9, kind: input, shape index: {}]   ;;  %s7835_s10 = inlined_call_operand.vmem [shape: f32[1,128], index: 10, kind: input, shape index: {}]   ;;  %s7836_s11 = inlined_call_operand.vmem [shape: f32[16,1], index: 11, kind: input, shape index: {}]   ;;  %s7837_s12 = inlined_call_operand.vmem [shape: f32[16,1], index: 12, kind: input, shape index: {}]   ;;  %s7838_s13 = inlined_call_operand.vmem [shape: f32[128,64], index: 13, kind: input, shape index: {}]   ;;  %s7839_s14 = inlined_call_operand.vmem [shape: f32[8,16], index: 14, kind: input, shape index: {}]   ;;  %s7840_s15 = inlined_call_operand.vmem [shape: f32[16,64], index: 15, kind: output, shape index: {}]  }
   0x1 LB: > { %s5278_s19 = sadd.s32 4294967295, %s5189_s18   ;;  %p5114_p0 = scmp.ge.s32.totalorder %s5189_s18, 1  ;;  %s5189_s18 = sphi %s5272_s18, %s25_s18  }
   0x2   : > { %p438_p1 = scmp.lt.s32.totalorder %s5189_s18, 3 }
   0x4   : > { %p439_p2 = pnand %p5114_p0, %p438_p1 }
   0x6   : > { %442 = sbr.rel (%p439_p2) target bundleno = 1816 (0x718), region = 80 }
   0xb   : > { %s5115_s20 = sshll.u32 %s5278_s19, 1  ;;  %v495_v0 = vld [vmem:[%s7826_s1] sm:$0xff]  ;;  %vm512_vm0 = vcmask 130048   ;;  %v496_v1 = vld [vmem:[%s7826_s1 + $0x8] sm:$0xff]  ;;  %v716_v28 = vld [vmem:[%s7828_s3 + $0x38] sm:$0xff]  ;;  %vm717_vm1 = vcmask 523264  }
   0xc   : > { %p486_p3 = scmp.lt.s32.totalorder %s5115_s20, 3  ;;  %v514_v2 = vsel %vm512_vm0, %v495_v0, 0  ;;  %v517_v3 = vsel %vm512_vm0, %v496_v1, 0  ;;  %v5377_v29 = vand.u32 4294901760, %v716_v28  ;;  %v715_v30 = vld [vmem:[%s7828_s3 + $0x30] sm:$0xff]  ;;  %v714_v33 = vld [vmem:[%s7828_s3 + $0x28] sm:$0xff] }
   0xd   : > { %v5291_v4 = vand.u32 4294901760, %v514_v2  ;;  %v5293_v5 = vand.u32 4294901760, %v517_v3  ;;  %v5385_v32 = vand.u32 4294901760, %v715_v30  ;;  %v5397_v36 = vand.u32 4294901760, %v714_v33  ;;  %v713_v37 = vld [vmem:[%s7828_s3 + $0x20] sm:$0xff]  ;;  %v712_v42 = vld [vmem:[%s7828_s3 + $0x18] sm:$0xff] }
   0xe   : > { %s7990_s20 = smov (!%p486_p3, %s5115_s20), 3  ;;  %v5383_v31 = vsub.f32 %v716_v28, %v5377_v29  ;;  %v5412_v41 = vand.u32 4294901760, %v713_v37  ;;  %v5424_v47 = vand.u32 4294901760, %v712_v42  ;;  %v711_v48 = vld [vmem:[%s7828_s3 + $0x10] sm:$0xff]  ;;  %v710_v54 = vld [vmem:[%s7828_s3 + $0x8] sm:$0xff]  ;;  %v709_v60 = vld [vmem:[%s7828_s3] sm:$0xff] }
   0xf   : > { %7910 = vst [vmem:[#allocation2_spill] sm:$0xff] %v5291_v4  ;;  %v5296_v6 = vsub.f32 %v514_v2, %v5291_v4  ;;  %s5116_s25 = sshll.u32 %s7990_s20, 3  ;;  %v5305_v10 = vsub.f32 %v517_v3, %v5293_v5  ;;  %v5394_v35 = vsub.f32 %v715_v30, %v5385_v32  ;;  %v5409_v40 = vsub.f32 %v714_v33, %v5397_v36  ;;  %p491_p4 = scmp.lt.s32.totalorder %s5278_s19, 1 }
  0x10   : > { %7911 = vst [vmem:[#allocation3_spill] sm:$0xff] %v5293_v5  ;;  %s489_s28 = scalar_lea.vmem %s7825_s0, %s5116_s25  ;;  %v775_v34 = vand.u32 4294901760, %v5383_v31  ;;  %v792_v46 = vsub.f32 %v713_v37, %v5412_v41  ;;  %v742_v52 = vand.u32 4294901760, %v711_v48  ;;  %v798_v53 = vsub.f32 %v712_v42, %v5424_v47 }
  0x11   : > { %7912 = vst [vmem:[#allocation4_spill] sm:$0xff] %v5296_v6  ;;  %v5302_v7 = vand.u32 4294901760, %v5296_v6  ;;  %v500_v8 = vld [vmem:[%s489_s28 + $0x8] sm:$0xff]  ;;  %v499_v9 = vld [vmem:[%s489_s28] sm:$0xff]  ;;  %v5322_v17 = vand.u32 4294901760, %v5305_v10  ;;  %v781_v39 = vand.u32 4294901760, %v5394_v35 }
  0x12   : > { %7914 = vst [vmem:[#allocation6_spill] sm:$0xff] %v5305_v10  ;;  %v5307_v11 = vmax.f32 %v500_v8, 0.0  ;;  %v5309_v12 = vmax.f32 %v499_v9, 0.0  ;;  %v776_v38 = vsub.f32 %v5383_v31, %v775_v34  ;;  %v787_v45 = vand.u32 4294901760, %v5409_v40  ;;  %s7992_s19 = smov (!%p491_p4, %s5278_s19), 1 }
  0x13   : > { %7913 = vst [vmem:[#allocation5_spill] sm:$0xff] %v5302_v7  ;;  %v540_v13 = vsub.f32 %v5296_v6, %v5302_v7  ;;  %v548_v22 = vsub.f32 %v5305_v10, %v5322_v17  ;;  %v782_v44 = vsub.f32 %v5394_v35, %v781_v39  ;;  %v793_v51 = vand.u32 4294901760, %v792_v46  ;;  %s5117_s16 = sshll.u32 %s7992_s19, 3 }
  0x14   : > { %v5314_v14 = vand.u32 4294901760, %v5307_v11  ;;  %v5317_v15 = vand.u32 4294901760, %v5309_v12  ;;  %7916 = vst [vmem:[#allocation8_spill] sm:$0xff] %v5322_v17  ;;  %v777_v43 = vand.u32 4294901760, %v776_v38  ;;  %v788_v50 = vsub.f32 %v5409_v40, %v787_v45  ;;  %v5123_v38 = vld [vmem:[%s7828_s3 + $0x68] sm:$0xff]  ;;  %s494_s21 = scalar_lea.vmem %s7840_s15, %s5117_s16 }
  0x15   : > { %v5319_v16 = vand.u32 4294901760, %v540_v13  ;;  %v5358_v27 = vand.u32 4294901760, %v548_v22  ;;  %v783_v49 = vand.u32 4294901760, %v782_v44  ;;  %v794_v56 = vsub.f32 %v792_v46, %v793_v51 }
  0x16   : > { %534 = vmatpush.msra.mxu0 %v5314_v14  ;;  %v5327_v18 = vsub.f32 %v5307_v11, %v5314_v14  ;;  %v5331_v19 = vsub.f32 %v5309_v12, %v5317_v15  ;;  %635 = vmatpush.msra.mxu3 %v5314_v14  ;;  %v789_v55 = vand.u32 4294901760, %v788_v50  ;;  %v804_v57 = vsub.f32 %v711_v48, %v742_v52 }
  0x17   : > { %7915 = vst [vmem:[#allocation7_spill] sm:$0xff] %v5319_v16  ;;  %v744_v58 = vand.u32 4294901760, %v710_v54  ;;  %v799_v59 = vand.u32 4294901760, %v798_v53  ;;  %v795_v61 = vand.u32 4294901760, %v794_v56  ;;  %v746_v0 = vand.u32 4294901760, %v709_v60 }
  0x18   : > { %536 = vmatpush.msra.mxu0 %v5317_v15  ;;  %605 = vmatpush.msra.mxu2 %v5327_v18  ;;  %v5337_v20 = vand.u32 4294901760, %v5327_v18  ;;  %v5340_v21 = vand.u32 4294901760, %v5331_v19  ;;  %7917 = vst [vmem:[#allocation9_spill] sm:$0xff] %v5358_v27  ;;  %v805_v62 = vand.u32 4294901760, %v804_v57 }
  0x19   : > { %542 = vmatmul.f32.vlgmr.msra.gmra.mxu0 %v5319_v16  ;;  %637 = vmatpush.msra.mxu3 %v5317_v15  ;;  %v810_v63 = vsub.f32 %v710_v54, %v744_v58  ;;  %v800_v1 = vsub.f32 %v798_v53, %v799_v59  ;;  %v816_v8 = vsub.f32 %v709_v60, %v746_v0 }
  0x1a   : > { %608 = vmatpush.msra.mxu2 %v5331_v19  ;;  %v571_v23 = vsub.f32 %v5327_v18, %v5337_v20  ;;  %641 = vmatmul.f32.vlgmr.msra.gmra.mxu3 %v5302_v7  ;;  %v577_v24 = vsub.f32 %v5331_v19, %v5340_v21  ;;  %v806_v2 = vsub.f32 %v804_v57, %v805_v62 }
  0x1b   : > { %611 = vmatmul.f32.vlgmr.msra.gmra.mxu2 %v5296_v6  ;;  %668 = vmatpush.msrb.mxu0 %v5337_v20  ;;  %v811_v3 = vand.u32 4294901760, %v810_v63  ;;  %v801_v9 = vand.u32 4294901760, %v800_v1  ;;  %v5119_v1 = vld [vmem:[%s7828_s3 + $0x48] sm:$0xff] }
  0x1c   : > { %v5354_v25 = vand.u32 4294901760, %v571_v23  ;;  %v5356_v26 = vand.u32 4294901760, %v577_v24  ;;  %733 = vmatpush.msrb.mxu2 %v5377_v29  ;;  %778 = vmatpush.msrb.mxu3 %v777_v43  ;;  %v807_v13 = vand.u32 4294901760, %v806_v2  ;;  %v817_v23 = vand.u32 4294901760, %v816_v8  ;;  %v5122_v43 = vld [vmem:[%s7828_s3 + $0x60] sm:$0xff] }
  0x1d   : > { %672 = vmatpush.msrb.mxu0 %v5340_v21  ;;  %v812_v22 = vsub.f32 %v810_v63, %v811_v3 }
  0x1e   : > { %573 = vmatpush.msra.mxu1 %v5354_v25  ;;  %735 = vmatpush.msrb.mxu2 %v5385_v32  ;;  %v818_v28 = vsub.f32 %v816_v8, %v817_v23 }
  0x1f   : > { %840 = vmatpush.msra.mxu0 %v5383_v31  ;;  %784 = vmatpush.msrb.mxu3 %v783_v49  ;;  %v813_v24 = vand.u32 4294901760, %v812_v22  ;;  %v5125_v31 = vld [vmem:[%s7828_s3 + $0x78] sm:$0xff] }
  0x20   : > { %579 = vmatpush.msra.mxu1 %v5356_v26  ;;  %737 = vmatpush.msrb.mxu2 %v5397_v36  ;;  %v819_v30 = vand.u32 4294901760, %v818_v28  ;;  %v5121_v49 = vld [vmem:[%s7828_s3 + $0x58] sm:$0xff] }
  0x21   : > { %550 = vmatmul.f32.gmra.mxu0 %v5358_v27  ;;  %581 = vmatmul.f32.vlgmr.msra.gmra.mxu1 %v5291_v4 }
  0x22   : > { %647 = vmatmul.f32.gmra.mxu3 %v5322_v17  ;;  %697 = vmatpush.msrb.mxu1 %v5314_v14 }
  0x23   : > { %616 = vmatmul.f32.gmra.mxu2 %v5305_v10  ;;  %843 = vmatpush.msra.mxu0 %v5394_v35 }
  0x24   : > { %699 = vmatpush.msrb.mxu1 %v5317_v15  ;;  %739 = vmatpush.msrb.mxu2 %v5412_v41 }
  0x25   : > { %846 = vmatpush.msra.mxu0 %v5409_v40  ;;  %790 = vmatpush.msrb.mxu3 %v789_v55 }
  0x26   : > { %882 = vmatpush.msra.mxu1 %v5377_v29  ;;  %741 = vmatpush.msrb.mxu2 %v5424_v47 }
  0x27   : > { %849 = vmatpush.msra.mxu0 %v792_v46  ;;  %796 = vmatpush.msrb.mxu3 %v795_v61 }
  0x28   : > { %884 = vmatpush.msra.mxu1 %v5385_v32  ;;  %743 = vmatpush.msrb.mxu2 %v742_v52 }
  0x29   : > { %585 = vmatmul.f32.gmra.mxu1 %v5293_v5  ;;  %674 = vmatmul.f32.vlgmr.msrb.gmra.mxu0 %v5291_v4 }
  0x2a   : > { %886 = vmatpush.msra.mxu1 %v5397_v36  ;;  %852 = vmatpush.msra.mxu0 %v798_v53 }
  0x2b   : > { %745 = vmatpush.msrb.mxu2 %v744_v58  ;;  %802 = vmatpush.msrb.mxu3 %v801_v9 }
  0x2c   : > { %888 = vmatpush.msra.mxu1 %v5412_v41  ;;  %855 = vmatpush.msra.mxu0 %v804_v57  ;;  %v5120_v57 = vld [vmem:[%s7828_s3 + $0x50] sm:$0xff] }
  0x2d   : > { %747 = vmatpush.msrb.mxu2 %v746_v0  ;;  %808 = vmatpush.msrb.mxu3 %v807_v13 }
  0x2e   : > { %890 = vmatpush.msra.mxu1 %v5424_v47  ;;  %858 = vmatpush.msra.mxu0 %v810_v63  ;;  %v5505_v63 = vand.u32 4294901760, %v5120_v57 }
  0x2f   : > { %921 = vmatpush.msra.mxu2 %v775_v34  ;;  %814 = vmatpush.msrb.mxu3 %v813_v24  ;;  %v5450_v34 = vand.u32 4294901760, %v5125_v31 }
  0x30   : > { %892 = vmatpush.msra.mxu1 %v742_v52  ;;  %861 = vmatpush.msra.mxu0 %v816_v8  ;;  %v5521_v22 = vsub.f32 %v5120_v57, %v5505_v63 }
  0x31   : > { %678 = vmatmul.f32.gmra.mxu0 %v5293_v5  ;;  %701 = vmatmul.f32.vlgmr.msrb.gmra.mxu1 %v5291_v4 }
  0x32   : > { %894 = vmatpush.msra.mxu1 %v744_v58  ;;  %925 = vmatpush.msra.mxu2 %v781_v39 }
  0x33   : > { %820 = vmatpush.msrb.mxu3 %v819_v30  ;;  %1007 = vmatpush.msrb.mxu0 %v5450_v34 }
  0x34   : > { %896 = vmatpush.msra.mxu1 %v746_v0  ;;  %929 = vmatpush.msra.mxu2 %v787_v45 }
  0x35   : > { %968 = vmatpush.msra.mxu3 %v5377_v29 }
  0x36   : > { %933 = vmatpush.msra.mxu2 %v793_v51 }
  0x37   : > { %970 = vmatpush.msra.mxu3 %v5385_v32  ;;  %v5124_v32 = vld [vmem:[%s7828_s3 + $0x70] sm:$0xff] }
  0x38   : > { %937 = vmatpush.msra.mxu2 %v799_v59  ;;  %v5459_v37 = vand.u32 4294901760, %v5124_v32 }
  0x39   : > { %705 = vmatmul.f32.gmra.mxu1 %v5293_v5  ;;  %972 = vmatpush.msra.mxu3 %v5397_v36  ;;  %v5457_v36 = vsub.f32 %v5125_v31, %v5450_v34 }
  0x3a   : > { %941 = vmatpush.msra.mxu2 %v805_v62  ;;  %1009 = vmatpush.msrb.mxu0 %v5459_v37  ;;  %v5469_v42 = vsub.f32 %v5124_v32, %v5459_v37 }
  0x3b   : > { %974 = vmatpush.msra.mxu3 %v5412_v41  ;;  %v1049_v40 = vand.u32 4294901760, %v5457_v36  ;;  %v5466_v41 = vand.u32 4294901760, %v5123_v38 }
  0x3c   : > { %945 = vmatpush.msra.mxu2 %v811_v3  ;;  %v1055_v46 = vand.u32 4294901760, %v5469_v42  ;;  %v5516_v3 = vand.u32 4294901760, %v5119_v1 }
  0x3d   : > { %976 = vmatpush.msra.mxu3 %v5424_v47  ;;  %v1050_v45 = vsub.f32 %v5457_v36, %v1049_v40  ;;  %1011 = vmatpush.msrb.mxu0 %v5466_v41  ;;  %v5479_v47 = vand.u32 4294901760, %v5122_v43  ;;  %v5482_v48 = vsub.f32 %v5123_v38, %v5466_v41 }
  0x3e   : > { %949 = vmatpush.msra.mxu2 %v817_v23  ;;  %v1056_v51 = vsub.f32 %v5469_v42, %v1055_v46  ;;  %v5118_v23 = vld [vmem:[%s7828_s3 + $0x40] sm:$0xff]  ;;  %v5529_v31 = vsub.f32 %v5119_v1, %v5516_v3 }
  0x3f   : > { %978 = vmatpush.msra.mxu3 %v742_v52  ;;  %v1051_v50 = vand.u32 4294901760, %v1050_v45  ;;  %1013 = vmatpush.msrb.mxu0 %v5479_v47  ;;  %v5491_v52 = vand.u32 4294901760, %v5121_v49  ;;  %v5494_v53 = vsub.f32 %v5122_v43, %v5479_v47  ;;  %v1061_v56 = vand.u32 4294901760, %v5482_v48 }
  0x40   : > { %v1057_v59 = vand.u32 4294901760, %v1056_v51  ;;  %v1085_v38 = vand.u32 4294901760, %v5529_v31 }
  0x41   : > { %980 = vmatpush.msra.mxu3 %v744_v58  ;;  %1052 = vmatpush.msrb.mxu1 %v1051_v50  ;;  %v1067_v60 = vand.u32 4294901760, %v5494_v53  ;;  %v1062_v62 = vsub.f32 %v5482_v48, %v1061_v56 }
  0x42   : > { %1015 = vmatpush.msrb.mxu0 %v5491_v52  ;;  %v1086_v51 = vsub.f32 %v5529_v31, %v1085_v38 }
  0x43   : > { %982 = vmatpush.msra.mxu3 %v746_v0  ;;  %v5508_v0 = vsub.f32 %v5121_v49, %v5491_v52  ;;  %1058 = vmatpush.msrb.mxu1 %v1057_v59  ;;  %v1068_v2 = vsub.f32 %v5494_v53, %v1067_v60  ;;  %v1063_v9 = vand.u32 4294901760, %v1062_v62 }
  0x44   : > { %1017 = vmatpush.msrb.mxu0 %v5505_v63 }
  0x45   : > { %v1073_v13 = vand.u32 4294901760, %v5508_v0  ;;  %v1069_v30 = vand.u32 4294901760, %v1068_v2  ;;  %1064 = vmatpush.msrb.mxu1 %v1063_v9 }
  0x46   : > { %1019 = vmatpush.msrb.mxu0 %v5516_v3 }
  0x47   : > { %1070 = vmatpush.msrb.mxu1 %v1069_v30 }
  0x96   : > { %v543_v33 = vpop.f32.mrf.mxu0 }
  0x9d   : > { %v642_v54 = vpop.f32.mrf.mxu3 }
  0x9e   : > { %v551_v29 = vpop.f32.mrf.mxu0  ;;  %v582_v35 = vpop.f32.mrf.mxu1 }
  0x9f   : > { %v612_v39 = vpop.f32.mrf.mxu2  ;;  %v583_v44 = vadd.f32 %v582_v35, %v543_v33  ;;  %v5526_v33 = vand.u32 4294901760, %v5118_v23  ;;  %v1079_v35 = vand.u32 4294901760, %v5521_v22 }
  0xa1   : > { %v613_v58 = vadd.f32 %v612_v39, %v583_v44  ;;  %v5538_v39 = vsub.f32 %v5118_v23, %v5526_v33  ;;  %v1080_v49 = vsub.f32 %v5521_v22, %v1079_v35  ;;  %1021 = vmatpush.msrb.mxu0 %v5526_v33 }
  0xa3   : > { %v643_v24 = vadd.f32 %v642_v54, %v613_v58  ;;  %v993_v54 = vsel %vm717_vm1, %v5309_v12, 0  ;;  %v1081_v58 = vand.u32 4294901760, %v1080_v49 }
  0xa5   : > { %v648_v57 = vpop.f32.mrf.mxu3 }
  0xa6   : > { %v586_v55 = vpop.f32.mrf.mxu1  ;;  %v675_v61 = vpop.f32.mrf.mxu0 }
  0xa7   : > { %v587_v8 = vadd.f32 %v586_v55, %v551_v29  ;;  %v617_v28 = vpop.f32.mrf.mxu2  ;;  %v1074_v29 = vsub.f32 %v5508_v0, %v1073_v13  ;;  %v676_v32 = vadd.f32 %v675_v61, %v643_v24  ;;  %v1091_v55 = vand.u32 4294901760, %v5538_v39 }
  0xa8   : > { %v1087_v61 = vand.u32 4294901760, %v1086_v51 }
  0xa9   : > { %v618_v43 = vadd.f32 %v617_v28, %v587_v8  ;;  %v1075_v45 = vand.u32 4294901760, %v1074_v29  ;;  %v1092_v62 = vsub.f32 %v5538_v39, %v1091_v55  ;;  %v5556_v8 = vand.u32 4294901760, %v993_v54 }
  0xab   : > { %1076 = vmatpush.msrb.mxu1 %v1075_v45  ;;  %v649_v9 = vadd.f32 %v648_v57, %v618_v43  ;;  %v1093_v12 = vand.u32 4294901760, %v1092_v62  ;;  %v5562_v29 = vsub.f32 %v993_v54, %v5556_v8  ;;  %v996_v43 = vsel %vm717_vm1, %v5307_v11, 0 }
  0xac   : > { %v5575_v54 = vand.u32 4294901760, %v996_v43 }
  0xad   : > { %1082 = vmatpush.msrb.mxu1 %v1081_v58  ;;  %v1024_v51 = vand.u32 4294901760, %v5562_v29  ;;  %v5133_v58 = vld [vmem:[%s7828_s3 + $0xb8] sm:$0xff] }
  0xae   : > { %v702_v44 = vpop.f32.mrf.mxu1  ;;  %v679_v1 = vpop.f32.mrf.mxu0 }
  0xaf   : > { %v703_v50 = vadd.f32 %v702_v44, %v676_v32  ;;  %1088 = vmatpush.msrb.mxu1 %v1087_v61  ;;  %v680_v24 = vadd.f32 %v679_v1, %v649_v9  ;;  %v5132_v1 = vld [vmem:[%s7828_s3 + $0xb0] sm:$0xff] }
  0xb1   : > { %v719_v59 = vsel %vm717_vm1, %v703_v50, 0  ;;  %1094 = vmatpush.msrb.mxu1 %v1093_v12  ;;  %v5131_v12 = vld [vmem:[%s7828_s3 + $0xa8] sm:$0xff] }
  0xb2   : > { %v5554_v2 = vand.u32 4294901760, %v719_v59 }
  0xb4   : > { %v749_v23 = vsub.f32 %v719_v59, %v5554_v2  ;;  %822 = vmatmul.f32.vlgmr.msrb.gmra.mxu3 %v5554_v2  ;;  %v5704_v59 = vand.u32 4294901760, %v5133_v58 }
  0xb5   : > { %1156 = vmatpush.msrb.mxu3 %v5450_v34 }
  0xb6   : > { %v706_v28 = vpop.f32.mrf.mxu1  ;;  %864 = vmatmul.f32.vlgmr.msra.gmra.mxu0 %v749_v23  ;;  %v750_v30 = vand.u32 4294901760, %v749_v23 }
  0xb7   : > { %v707_v32 = vadd.f32 %v706_v28, %v680_v24  ;;  %1158 = vmatpush.msrb.mxu3 %v5459_v37  ;;  %1195 = vmatpush.msra.mxu0 %v1049_v40  ;;  %v5730_v28 = vand.u32 4294901760, %v5131_v12 }
  0xb8   : > { %900 = vmatmul.f32.vlgmr.msra.gmra.mxu1 %v750_v30  ;;  %v751_v44 = vsub.f32 %v749_v23, %v750_v30  ;;  %v5130_v30 = vld [vmem:[%s7828_s3 + $0xa0] sm:$0xff] }
  0xb9   : > { %v722_v45 = vsel %vm717_vm1, %v707_v32, 0  ;;  %1160 = vmatpush.msrb.mxu3 %v5466_v41  ;;  %1199 = vmatpush.msra.mxu0 %v1055_v46  ;;  %v1025_v46 = vsub.f32 %v5562_v29, %v1024_v51 }
  0xba   : > { %v756_v49 = vand.u32 4294901760, %v722_v45  ;;  %v752_v50 = vand.u32 4294901760, %v751_v44  ;;  %1242 = vmatpush.msra.mxu1 %v5450_v34  ;;  %v5585_v34 = vsub.f32 %v996_v43, %v5575_v54  ;;  %v5742_v43 = vsub.f32 %v5131_v12, %v5730_v28 }
  0xbb   : > { %1162 = vmatpush.msrb.mxu3 %v5479_v47  ;;  %1203 = vmatpush.msra.mxu0 %v1061_v56  ;;  %v1026_v57 = vand.u32 4294901760, %v1025_v46  ;;  %v5746_v44 = vand.u32 4294901760, %v5130_v30 }
  0xbc   : > { %753 = vmatmul.f32.vlgmr.msrb.gmra.mxu2 %v752_v50  ;;  %826 = vmatmul.f32.gmra.mxu3 %v756_v49  ;;  %v757_v11 = vsub.f32 %v722_v45, %v756_v49  ;;  %v5129_v45 = vld [vmem:[%s7828_s3 + $0x98] sm:$0xff] }
  0xbd   : > { %1114 = vmatpush.msrb.mxu2 %v5457_v36  ;;  %1164 = vmatpush.msrb.mxu3 %v5491_v52  ;;  %v5764_v46 = vsub.f32 %v5130_v30, %v5746_v44 }
  0xbe   : > { %869 = vmatmul.f32.gmra.mxu0 %v757_v11  ;;  %v758_v40 = vand.u32 4294901760, %v757_v11  ;;  %1244 = vmatpush.msra.mxu1 %v5459_v37  ;;  %v1032_v37 = vand.u32 4294901760, %v5585_v34 }
  0xbf   : > { %1117 = vmatpush.msrb.mxu2 %v5469_v42  ;;  %1166 = vmatpush.msrb.mxu3 %v5505_v63 }
  0xc0   : > { %906 = vmatmul.f32.gmra.mxu1 %v758_v40  ;;  %v759_v56 = vsub.f32 %v757_v11, %v758_v40  ;;  %1207 = vmatpush.msra.mxu0 %v1067_v60  ;;  %v1033_v42 = vsub.f32 %v5585_v34, %v1032_v37 }
  0xc1   : > { %1120 = vmatpush.msrb.mxu2 %v5482_v48  ;;  %1168 = vmatpush.msrb.mxu3 %v5516_v3 }
  0xc2   : > { %v760_v36 = vand.u32 4294901760, %v759_v56  ;;  %1246 = vmatpush.msra.mxu1 %v5466_v41  ;;  %1211 = vmatpush.msra.mxu0 %v1073_v13  ;;  %v1034_v41 = vand.u32 4294901760, %v1033_v42  ;;  %v5128_v56 = vld [vmem:[%s7828_s3 + $0x90] sm:$0xff]  ;;  %v1546_v42 = vand.u32 4294901760, %v5764_v46 }
  0xc3   : > { %1123 = vmatpush.msrb.mxu2 %v5494_v53  ;;  %1170 = vmatpush.msrb.mxu3 %v5526_v33 }
  0xc4   : > { %761 = vmatmul.f32.gmra.mxu2 %v760_v36  ;;  %984 = vmatmul.f32.vlgmr.msra.gmra.mxu3 %v5554_v2 }
  0xc5   : > { %1126 = vmatpush.msrb.mxu2 %v5508_v0  ;;  %1248 = vmatpush.msra.mxu1 %v5479_v47 }
  0xc6   : > { %1027 = vmatmul.f32.vlgmr.msrb.gmra.mxu0 %v1026_v57  ;;  %1326 = vmatpush.msra.mxu3 %v5354_v25  ;;  %v497_v25 = vld [vmem:[%s7827_s2] sm:$0xff] }
  0xc7   : > { %1129 = vmatpush.msrb.mxu2 %v5521_v22  ;;  %1215 = vmatpush.msra.mxu0 %v1079_v35 }
  0xc8   : > { %1096 = vmatmul.f32.vlgmr.msrb.gmra.mxu1 %v5556_v8  ;;  %1332 = vmatpush.msra.mxu3 %v5356_v26  ;;  %v1267_v26 = vsel %vm512_vm0, %v497_v25, 0  ;;  %v5127_v25 = vld [vmem:[%s7828_s3 + $0x88] sm:$0xff] }
  0xc9   : > { %1132 = vmatpush.msrb.mxu2 %v5529_v31  ;;  %1250 = vmatpush.msra.mxu1 %v5491_v52 }
  0xca   : > { %1219 = vmatpush.msra.mxu0 %v1085_v38 }
  0xcb   : > { %1135 = vmatpush.msrb.mxu2 %v5538_v39  ;;  %1252 = vmatpush.msra.mxu1 %v5505_v63 }
  0xcc   : > { %951 = vmatmul.f32.vlgmr.msra.gmra.mxu2 %v5554_v2  ;;  %988 = vmatmul.f32.gmra.mxu3 %v756_v49  ;;  %v5714_v2 = vsub.f32 %v5133_v58, %v5704_v59 }
  0xcd   : > { %1223 = vmatpush.msra.mxu0 %v1091_v55  ;;  %1254 = vmatpush.msra.mxu1 %v5516_v3 }
  0xce   : > { %1035 = vmatmul.f32.gmra.mxu0 %v1034_v41  ;;  %1287 = vmatpush.msra.mxu2 %v5314_v14  ;;  %v1528_v23 = vand.u32 4294901760, %v5714_v2 }
  0xcf   : > { %1256 = vmatpush.msra.mxu1 %v5526_v33  ;;  %1358 = vmatpush.msrb.mxu0 %v5327_v18  ;;  %v5635_v18 = vand.u32 4294901760, %v1267_v26 }
  0xd0   : > { %1100 = vmatmul.f32.gmra.mxu1 %v5575_v54  ;;  %1289 = vmatpush.msra.mxu2 %v5317_v15 }
  0xd1   : > { %1361 = vmatpush.msrb.mxu0 %v5331_v19  ;;  %1388 = vmatpush.msrb.mxu1 %v5314_v14  ;;  %v498_v19 = vld [vmem:[%s7827_s2 + $0x8] sm:$0xff]  ;;  %v5642_v47 = vsub.f32 %v1267_v26, %v5635_v18 }
  0xd3   : > { %1390 = vmatpush.msrb.mxu1 %v5317_v15 }
  0xd4   : > { %955 = vmatmul.f32.gmra.mxu2 %v756_v49  ;;  %1174 = vmatmul.f32.vlgmr.msrb.gmra.mxu3 %v1024_v51 }
  0xd5   : > { %1450 = vmatpush.msrb.mxu3 %v5314_v14  ;;  %v1270_v14 = vsel %vm512_vm0, %v498_v19, 0 }
  0xd6   : > { %1225 = vmatmul.f32.vlgmr.msra.gmra.mxu0 %v5556_v8  ;;  %v5652_v48 = vand.u32 4294901760, %v1270_v14 }
  0xd7   : > { %1452 = vmatpush.msrb.mxu3 %v5317_v15  ;;  %v5649_v15 = vand.u32 4294901760, %v5642_v47  ;;  %1486 = vmatpush.msra.mxu0 %v5704_v59 }
  0xd8   : > { %1258 = vmatmul.f32.vlgmr.msra.gmra.mxu1 %v5556_v8  ;;  %7918 = vst [vmem:[#allocation10_spill] sm:$0xff] %v5652_v48  ;;  %v5716_v8 = vand.u32 4294901760, %v5132_v1 }
  0xd9   : > { %v1293_v52 = vsub.f32 %v5642_v47, %v5649_v15 }
  0xda   : > { %v5727_v24 = vsub.f32 %v5132_v1, %v5716_v8  ;;  %1488 = vmatpush.msra.mxu0 %v5716_v8  ;;  %v5126_v1 = vld [vmem:[%s7828_s3 + $0x80] sm:$0xff] }
  0xdc   : > { %1138 = vmatmul.f32.vlgmr.msrb.gmra.mxu2 %v5562_v29  ;;  %1180 = vmatmul.f32.gmra.mxu3 %v1032_v37  ;;  %v1529_v29 = vsub.f32 %v5714_v2, %v1528_v23  ;;  %v7841_v32 = vand.u32 4294901760, %v5727_v24  ;;  %v5774_v37 = vand.u32 4294901760, %v5128_v56 }
  0xdd   : > { %1421 = vmatpush.msrb.mxu2 %v5337_v20  ;;  %v5659_v20 = vsub.f32 %v1270_v14, %v5652_v48  ;;  %1490 = vmatpush.msra.mxu0 %v5730_v28  ;;  %v1497_v14 = vand.u32 4294901760, %v5127_v25 }
  0xde   : > { %1229 = vmatmul.f32.gmra.mxu0 %v5575_v54  ;;  %v1530_v50 = vand.u32 4294901760, %v1529_v29  ;;  %v1535_v51 = vsub.f32 %v5727_v24, %v7841_v32  ;;  %v1557_v19 = vsub.f32 %v5128_v56, %v5774_v37  ;;  %v1499_v29 = vand.u32 4294901760, %v5126_v1 }
  0xdf   : > { %1425 = vmatpush.msrb.mxu2 %v5340_v21  ;;  %7919 = vst [vmem:[#allocation11_spill] sm:$0xff] %v5659_v20  ;;  %v5662_v21 = vand.u32 4294901760, %v1293_v52  ;;  %v5665_v53 = vand.u32 4294901760, %v5659_v20  ;;  %1492 = vmatpush.msra.mxu0 %v5746_v44  ;;  %v1563_v30 = vsub.f32 %v5127_v25, %v1497_v14 }
  0xe0   : > { %1262 = vmatmul.f32.gmra.mxu1 %v5575_v54  ;;  %v1540_v54 = vand.u32 4294901760, %v5742_v43  ;;  %v1536_v36 = vand.u32 4294901760, %v1535_v51  ;;  %v1558_v12 = vand.u32 4294901760, %v1557_v19 }
  0xe1   : > { %7920 = vst [vmem:[#allocation12_spill] sm:$0xff] %v5662_v21  ;;  %v1301_v60 = vsub.f32 %v5659_v20, %v5665_v53  ;;  %1531 = vmatpush.msra.mxu1 %v1530_v50  ;;  %v1564_v51 = vand.u32 4294901760, %v1563_v30 }
  0xe2   : > { %7921 = vst [vmem:[#allocation13_spill] sm:$0xff] %v5665_v53  ;;  %v1541_v57 = vsub.f32 %v5742_v43, %v1540_v54  ;;  %v1559_v50 = vsub.f32 %v1557_v19, %v1558_v12 }
  0xe3   : > { %v5673_v63 = vand.u32 4294901760, %v1301_v60  ;;  %1537 = vmatpush.msra.mxu1 %v1536_v36  ;;  %v1547_v60 = vsub.f32 %v5764_v46, %v1546_v42 }
  0xe4   : > { %1143 = vmatmul.f32.gmra.mxu2 %v5585_v34  ;;  %1334 = vmatmul.f32.vlgmr.msra.gmra.mxu3 %v5635_v18  ;;  %v5766_v34 = vand.u32 4294901760, %v5129_v45  ;;  %v1542_v26 = vand.u32 4294901760, %v1541_v57  ;;  %v1560_v57 = vand.u32 4294901760, %v1559_v50 }
  0xe5   : > { %7922 = vst [vmem:[#allocation14_spill] sm:$0xff] %v5673_v63  ;;  %1635 = vmatpush.msra.mxu3 %v5704_v59 }
  0xe6   : > { %1364 = vmatmul.f32.vlgmr.msrb.gmra.mxu0 %v5642_v47  ;;  %v1551_v41 = vsub.f32 %v5129_v45, %v5766_v34  ;;  %1543 = vmatpush.msra.mxu1 %v1542_v26  ;;  %v1565_v26 = vsub.f32 %v1563_v30, %v1564_v51 }
  0xe7   : > { %1637 = vmatpush.msra.mxu3 %v5716_v8  ;;  %1494 = vmatpush.msra.mxu0 %v5766_v34 }
  0xe8   : > { %1394 = vmatmul.f32.vlgmr.msrb.gmra.mxu1 %v5649_v15  ;;  %v1552_v58 = vand.u32 4294901760, %v1551_v41 }
  0xe9   : > { %1639 = vmatpush.msra.mxu3 %v5730_v28  ;;  %1496 = vmatpush.msra.mxu0 %v5774_v37 }
  0xea   : > { %v1553_v45 = vsub.f32 %v1551_v41, %v1552_v58 }
  0xeb   : > { %1641 = vmatpush.msra.mxu3 %v5746_v44  ;;  %1498 = vmatpush.msra.mxu0 %v1497_v14 }
  0xec   : > { %1295 = vmatmul.f32.vlgmr.msra.gmra.mxu2 %v5662_v21  ;;  %1338 = vmatmul.f32.gmra.mxu3 %v5652_v48  ;;  %v1554_v36 = vand.u32 4294901760, %v1553_v45 }
  0xed   : > { %1593 = vmatpush.msra.mxu2 %v5714_v2  ;;  %1643 = vmatpush.msra.mxu3 %v5766_v34 }
  0xee   : > { %1369 = vmatmul.f32.gmra.mxu0 %v5659_v20 }
  0xef   : > { %1596 = vmatpush.msra.mxu2 %v5727_v24  ;;  %1645 = vmatpush.msra.mxu3 %v5774_v37 }
  0xf0   : > { %1400 = vmatmul.f32.gmra.mxu1 %v5665_v53  ;;  %1500 = vmatpush.msra.mxu0 %v1499_v29 }
  0xf1   : > { %1599 = vmatpush.msra.mxu2 %v5742_v43  ;;  %v1548_v43 = vand.u32 4294901760, %v1547_v60  ;;  %1647 = vmatpush.msra.mxu3 %v1497_v14 }
  0xf2   : > { %1674 = vmatpush.msrb.mxu0 %v1528_v23 }
  0xf3   : > { %1602 = vmatpush.msra.mxu2 %v5764_v46  ;;  %v1569_v46 = vsub.f32 %v5126_v1, %v1499_v29  ;;  %1549 = vmatpush.msra.mxu1 %v1548_v43  ;;  %v7923_v43 = vand.u32 4294901760, %v5727_v24 }
  0xf4   : > { %1303 = vmatmul.f32.gmra.mxu2 %v5673_v63  ;;  %1454 = vmatmul.f32.vlgmr.msrb.gmra.mxu3 %v5635_v18 }
  0xf5   : > { %1605 = vmatpush.msra.mxu2 %v1551_v41  ;;  %v1570_v32 = vand.u32 4294901760, %v1569_v46  ;;  %1649 = vmatpush.msra.mxu3 %v1499_v29  ;;  %v1566_v41 = vand.u32 4294901760, %v1565_v26 }
  0xf6   : > { %1555 = vmatpush.msra.mxu1 %v1554_v36  ;;  %1678 = vmatpush.msrb.mxu0 %v7923_v43 }
  0xf7   : > { %1608 = vmatpush.msra.mxu2 %v1557_v19  ;;  %v1571_v19 = vsub.f32 %v1569_v46, %v1570_v32 }
  0xf8   : > { %1561 = vmatpush.msra.mxu1 %v1560_v57  ;;  %1682 = vmatpush.msrb.mxu0 %v1540_v54 }
  0xf9   : > { %1611 = vmatpush.msra.mxu2 %v1563_v30  ;;  %v1572_v1 = vand.u32 4294901760, %v1571_v19 }
  0xfa   : > { %1567 = vmatpush.msra.mxu1 %v1566_v41  ;;  %1686 = vmatpush.msrb.mxu0 %v1546_v42 }
  0xfb   : > { %1614 = vmatpush.msra.mxu2 %v1569_v46 }
  0xfc   : > { %1427 = vmatmul.f32.vlgmr.msrb.gmra.mxu2 %v5635_v18  ;;  %1458 = vmatmul.f32.gmra.mxu3 %v5652_v48 }
  0xfd   : > { %1573 = vmatpush.msra.mxu1 %v1572_v1  ;;  %1690 = vmatpush.msrb.mxu0 %v1552_v58 }
  0xff   : > { %1721 = vmatpush.msrb.mxu1 %v5704_v59  ;;  %1694 = vmatpush.msrb.mxu0 %v1558_v12 }
 0x101   : > { %1723 = vmatpush.msrb.mxu1 %v5716_v8  ;;  %1698 = vmatpush.msrb.mxu0 %v1564_v51 }
 0x103   : > { %1725 = vmatpush.msrb.mxu1 %v5730_v28  ;;  %1702 = vmatpush.msrb.mxu0 %v1570_v32 }
 0x104   : > { %1431 = vmatmul.f32.gmra.mxu2 %v5652_v48 }
 0x105   : > { %1727 = vmatpush.msrb.mxu1 %v5746_v44 }
 0x107   : > { %1729 = vmatpush.msrb.mxu1 %v5766_v34 }
 0x109   : > { %1731 = vmatpush.msrb.mxu1 %v5774_v37 }
 0x10b   : > { %1733 = vmatpush.msrb.mxu1 %v1497_v14 }
 0x10d   : > { %1735 = vmatpush.msrb.mxu1 %v1499_v29 }
 0x133   : > { %v5683_v3 = vpop.f32.mrf.mxu0 }
 0x135   : > { %v5685_v13 = vpop.f32.mrf.mxu1 }
 0x137   : > { %v5681_v0 = vpop.f32.mrf.mxu3 }
 0x13b   : > { %v5691_v31 = vpop.f32.mrf.mxu0 }
 0x13d   : > { %v5697_v39 = vpop.f32.mrf.mxu1 }
 0x13f   : > { %v5687_v22 = vpop.f32.mrf.mxu2  ;;  %v5689_v33 = vpop.f32.mrf.mxu3 }
 0x143   : > { %v5699_v55 = vpop.f32.mrf.mxu0 }
 0x145   : > { %v5720_v9 = vpop.f32.mrf.mxu1 }
 0x147   : > { %v5693_v35 = vpop.f32.mrf.mxu2  ;;  %v5695_v38 = vpop.f32.mrf.mxu3 }
 0x14b   : > { %v5752_v49 = vpop.f32.mrf.mxu0 }
 0x14d   : > { %v5785_v52 = vpop.f32.mrf.mxu1 }
 0x14f   : > { %v5706_v61 = vpop.f32.mrf.mxu2  ;;  %v5708_v62 = vpop.f32.mrf.mxu3 }
 0x153   : > { %v5795_v25 = vpop.f32.mrf.mxu0 }
 0x155   : > { %v5803_v30 = vpop.f32.mrf.mxu1 }
 0x157   : > { %v5759_v11 = vpop.f32.mrf.mxu2  ;;  %v5761_v40 = vpop.f32.mrf.mxu3 }
 0x15b   : > { %v5809_v2 = vpop.f32.mrf.mxu0 }
 0x15d   : > { %v5813_v24 = vpop.f32.mrf.mxu1 }
 0x15f   : > { %v5793_v56 = vpop.f32.mrf.mxu2  ;;  %v5797_v60 = vpop.f32.mrf.mxu3 }
 0x163   : > { %v1365_v59 = vpop.f32.mrf.mxu0 }
 0x165   : > { %v1395_v50 = vpop.f32.mrf.mxu1 }
 0x167   : > { %v5805_v45 = vpop.f32.mrf.mxu2  ;;  %v1335_v23 = vpop.f32.mrf.mxu3 }
 0x16b   : > { %v1370_v51 = vpop.f32.mrf.mxu0 }
 0x16d   : > { %v1401_v34 = vpop.f32.mrf.mxu1 }
 0x16f   : > { %v1296_v54 = vpop.f32.mrf.mxu2  ;;  %v1339_v8 = vpop.f32.mrf.mxu3 }
 0x170   : > { %v1336_v42 = vadd.f32 %v1335_v23, %v1296_v54 }
 0x172   : > { %v1366_v28 = vadd.f32 %v1365_v59, %v1336_v42 }
 0x174   : > { %v1396_v46 = vadd.f32 %v1395_v50, %v1366_v28 }
 0x177   : > { %v1304_v58 = vpop.f32.mrf.mxu2  ;;  %v1455_v12 = vpop.f32.mrf.mxu3 }
 0x178   : > { %v1340_v44 = vadd.f32 %v1339_v8, %v1304_v58 }
 0x17a   : > { %v1371_v26 = vadd.f32 %v1370_v51, %v1340_v44  ;;  %v824_v44 = vadd.f32 %v5681_v0, %v5687_v22 }
 0x17c   : > { %v1402_v14 = vadd.f32 %v1401_v34, %v1371_v26  ;;  %v866_v51 = vadd.f32 %v5683_v3, %v824_v44 }
 0x17f   : > { %v1428_v36 = vpop.f32.mrf.mxu2  ;;  %v1459_v29 = vpop.f32.mrf.mxu3 }
 0x180   : > { %v1429_v57 = vadd.f32 %v1428_v36, %v1396_v46  ;;  %v828_v36 = vadd.f32 %v5689_v33, %v5693_v35 }
 0x182   : > { %v1456_v41 = vadd.f32 %v1455_v12, %v1429_v57  ;;  %v902_v57 = vadd.f32 %v5685_v13, %v866_v51 }
 0x184   : > { %v1472_v32 = vsel %vm717_vm1, %v1456_v41, 0  ;;  %v953_v26 = vadd.f32 %v5706_v61, %v902_v57  ;;  %v871_v41 = vadd.f32 %v5691_v31, %v828_v36 }
 0x185   : > { %v1501_v37 = vand.u32 4294901760, %v1472_v32 }
 0x187   : > { %v1502_v19 = vsub.f32 %v1472_v32, %v1501_v37  ;;  %v1432_v1 = vpop.f32.mrf.mxu2  ;;  %1575 = vmatmul.f32.vlgmr.msra.gmra.mxu1 %v1501_v37  ;;  %v986_v32 = vadd.f32 %v5695_v38, %v953_v26 }
 0x188   : > { %v1433_v43 = vadd.f32 %v1432_v1, %v1402_v14 }
 0x189   : > { %1617 = vmatmul.f32.vlgmr.msra.gmra.mxu2 %v1502_v19  ;;  %v1503_v23 = vand.u32 4294901760, %v1502_v19 }
 0x18a   : > { %v1460_v54 = vadd.f32 %v1459_v29, %v1433_v43 }
 0x18b   : > { %1653 = vmatmul.f32.vlgmr.msra.gmra.mxu3 %v1503_v23  ;;  %v1504_v59 = vsub.f32 %v1502_v19, %v1503_v23  ;;  %v1029_v19 = vadd.f32 %v5699_v55, %v986_v32 }
 0x18c   : > { %v1475_v8 = vsel %vm717_vm1, %v1460_v54, 0 }
 0x18d   : > { %v1509_v42 = vand.u32 4294901760, %v1475_v8  ;;  %v1505_v58 = vand.u32 4294901760, %v1504_v59  ;;  %v1098_v3 = vadd.f32 %v5720_v9, %v1029_v19  ;;  %v1977_v19 = vld [vmem:[%s7830_s5 + $0x78] sm:$0xff] }
 0x18f   : > { %1506 = vmatmul.f32.vlgmr.msra.gmra.mxu0 %v1505_v58  ;;  %1579 = vmatmul.f32.gmra.mxu1 %v1509_v42  ;;  %v1510_v50 = vsub.f32 %v1475_v8, %v1509_v42  ;;  %v1140_v13 = vadd.f32 %v5793_v56, %v1098_v3  ;;  %v1975_v3 = vld [vmem:[%s7830_s5 + $0x68] sm:$0xff] }
 0x191   : > { %1622 = vmatmul.f32.gmra.mxu2 %v1510_v50  ;;  %v1511_v28 = vand.u32 4294901760, %v1510_v50  ;;  %v1176_v38 = vadd.f32 %v5761_v40, %v1140_v13 }
 0x193   : > { %1659 = vmatmul.f32.gmra.mxu3 %v1511_v28  ;;  %v1512_v12 = vsub.f32 %v1510_v50, %v1511_v28 }
 0x195   : > { %v1513_v46 = vand.u32 4294901760, %v1512_v12 }
 0x197   : > { %1514 = vmatmul.f32.gmra.mxu0 %v1513_v46  ;;  %1737 = vmatmul.f32.vlgmr.msrb.gmra.mxu1 %v1501_v37 }
 0x19f   : > { %1704 = vmatmul.f32.vlgmr.msrb.gmra.mxu0 %v1501_v37  ;;  %1741 = vmatmul.f32.gmra.mxu1 %v1509_v42  ;;  %v908_v37 = vadd.f32 %v5697_v39, %v871_v41 }
 0x1a1   : > { %v957_v0 = vadd.f32 %v5759_v11, %v908_v37  ;;  %v1227_v11 = vadd.f32 %v5795_v25, %v1176_v38 }
 0x1a3   : > { %v990_v22 = vadd.f32 %v5708_v62, %v957_v0  ;;  %v1260_v8 = vadd.f32 %v5803_v30, %v1227_v11  ;;  %v1976_v0 = vld [vmem:[%s7830_s5 + $0x70] sm:$0xff]  ;;  %v1971_v11 = vld [vmem:[%s7830_s5 + $0x48] sm:$0xff] }
 0x1a4   : > { %v5885_v13 = vand.u32 4294901760, %v1976_v0 }
 0x1a5   : > { %v1037_v1 = vadd.f32 %v5752_v49, %v990_v22 }
 0x1a7   : > { %1708 = vmatmul.f32.gmra.mxu0 %v1509_v42  ;;  %v1102_v55 = vadd.f32 %v5785_v52, %v1037_v1  ;;  %v5179_v52 = vld [vmem:[%s7829_s4] ss:$0 sm:$0xff]  ;;  %v1972_v1 = vld [vmem:[%s7830_s5 + $0x50] sm:$0xff] }
 0x1a9   : > { %v1145_v9 = vadd.f32 %v5805_v45, %v1102_v55  ;;  %v5906_v55 = vand.u32 4294901760, %v1972_v1 }
 0x1ab   : > { %v1182_v49 = vadd.f32 %v5797_v60, %v1145_v9  ;;  %v1970_v9 = vld [vmem:[%s7830_s5 + $0x40] sm:$0xff] }
 0x1ad   : > { %v1231_v45 = vadd.f32 %v5809_v2, %v1182_v49  ;;  %v5936_v49 = vand.u32 4294901760, %v1971_v11 }
 0x1af   : > { %v1264_v30 = vadd.f32 %v5813_v24, %v1231_v45 }
 0x204   : > { %v1576_v34 = vpop.f32.mrf.mxu1 }
 0x20c   : > { %v1507_v14 = vpop.f32.mrf.mxu0  ;;  %v1580_v33 = vpop.f32.mrf.mxu1 }
 0x20d   : > { %v1577_v35 = vadd.f32 %v1576_v34, %v1507_v14  ;;  %v1618_v61 = vpop.f32.mrf.mxu2 }
 0x20e   : > { %v1654_v29 = vpop.f32.mrf.mxu3 }
 0x20f   : > { %v1619_v39 = vadd.f32 %v1618_v61, %v1577_v35  ;;  %v5887_v35 = vand.u32 4294901760, %v1975_v3  ;;  %v1974_v61 = vld [vmem:[%s7830_s5 + $0x60] sm:$0xff] }
 0x211   : > { %v1655_v43 = vadd.f32 %v1654_v29, %v1619_v39  ;;  %v5902_v39 = vand.u32 4294901760, %v1974_v61 }
 0x214   : > { %v1515_v31 = vpop.f32.mrf.mxu0  ;;  %v1738_v23 = vpop.f32.mrf.mxu1 }
 0x215   : > { %v1581_v62 = vadd.f32 %v1580_v33, %v1515_v31  ;;  %v1623_v59 = vpop.f32.mrf.mxu2  ;;  %v5883_v33 = vand.u32 4294901760, %v1977_v19  ;;  %v1973_v31 = vld [vmem:[%s7830_s5 + $0x58] sm:$0xff] }
 0x216   : > { %v1660_v25 = vpop.f32.mrf.mxu3  ;;  %v5904_v29 = vand.u32 4294901760, %v1973_v31 }
 0x217   : > { %v1624_v42 = vadd.f32 %v1623_v59, %v1581_v62  ;;  %v5918_v62 = vsub.f32 %v1977_v19, %v5883_v33 }
 0x218   : > { %v5931_v59 = vsub.f32 %v1973_v31, %v5904_v29 }
 0x219   : > { %v1661_v50 = vadd.f32 %v1660_v25, %v1624_v42  ;;  %v1969_v42 = vld [vmem:[%s7830_s5 + $0x38] sm:$0xff]  ;;  %v5946_v25 = vand.u32 4294901760, %v1970_v9 }
 0x21b   : > { %v5982_v19 = vsub.f32 %v1970_v9, %v5946_v25 }
 0x21c   : > { %v1705_v54 = vpop.f32.mrf.mxu0  ;;  %v1742_v51 = vpop.f32.mrf.mxu1 }
 0x21d   : > { %v1706_v56 = vadd.f32 %v1705_v54, %v1655_v43  ;;  %v5924_v54 = vsub.f32 %v1975_v3, %v5887_v35 }
 0x21f   : > { %v1739_v40 = vadd.f32 %v1738_v23, %v1706_v56  ;;  %v5921_v23 = vsub.f32 %v1976_v0, %v5885_v13  ;;  %v5928_v56 = vsub.f32 %v1974_v61, %v5902_v39 }
 0x221   : > { %v1745_v58 = vadd.f32 %v1739_v40, %v1260_v8  ;;  %v5934_v8 = vsub.f32 %v1972_v1, %v5906_v55  ;;  %v7848_v40 = vand.u32 4294901760, %v5918_v62  ;;  %v7844_v45 = vand.u32 4294901760, %v5928_v56 }
 0x223   : > { %v1751_v28 = vadd.f32 %v5179_v52, %v1745_v58  ;;  %v7845_v58 = vand.u32 4294901760, %v5924_v54 }
 0x224   : > { %v1709_v12 = vpop.f32.mrf.mxu0 }
 0x225   : > { %v1753_v46 = vmax.f32 %v1751_v28, 0.0  ;;  %v1710_v44 = vadd.f32 %v1709_v12, %v1661_v50  ;;  %v7842_v50 = vand.u32 4294901760, %v5931_v59  ;;  %v5952_v28 = vsub.f32 %v1971_v11, %v5936_v49 }
 0x226   : > { %v2030_v12 = vsub.f32 %v5918_v62, %v7848_v40 }
 0x227   : > { %v5846_v36 = vand.u32 4294901760, %v1753_v46  ;;  %v1743_v60 = vadd.f32 %v1742_v51, %v1710_v44  ;;  %v2042_v44 = vsub.f32 %v5924_v54, %v7845_v58  ;;  %v5965_v51 = vand.u32 4294901760, %v1969_v42 }
 0x228   : > { %v2054_v0 = vsub.f32 %v5931_v59, %v7842_v50  ;;  %v7846_v3 = vand.u32 4294901760, %v5952_v28  ;;  %v1964_v50 = vld [vmem:[%s7830_s5 + $0x10] sm:$0xff] }
 0x229   : > { %v1746_v57 = vadd.f32 %v1743_v60, %v1264_v30  ;;  %v5849_v26 = vsub.f32 %v1753_v46, %v5846_v36  ;;  %v7843_v30 = vand.u32 4294901760, %v5934_v8  ;;  %v1968_v60 = vld [vmem:[%s7830_s5 + $0x30] sm:$0xff]  ;;  %v2043_v61 = vand.u32 4294901760, %v2042_v44 }
 0x22a   : > { %v5995_v31 = vsub.f32 %v1969_v42, %v5965_v51  ;;  %v5997_v1 = vand.u32 4294901760, %v1968_v60  ;;  %v7849_v42 = vand.u32 4294901760, %v5982_v19  ;;  %v6033_v58 = vand.u32 4294901760, %v1964_v50 }
 0x22b   : > { %v1752_v41 = vadd.f32 %v5179_v52, %v1746_v57  ;;  %v5852_v32 = vand.u32 4294901760, %v5849_v26  ;;  %v7847_v52 = vand.u32 4294901760, %v5921_v23  ;;  %v1967_v57 = vld [vmem:[%s7830_s5 + $0x28] sm:$0xff]  ;;  %v2060_v9 = vsub.f32 %v5934_v8, %v7843_v30 }
 0x22c   : > { %v5999_v11 = vand.u32 4294901760, %v1967_v57  ;;  %v6012_v44 = vsub.f32 %v1968_v60, %v5997_v1  ;;  %v7850_v60 = vand.u32 4294901760, %v5995_v31 }
 0x22d   : > { %v1754_v34 = vmax.f32 %v1752_v41, 0.0  ;;  %v1830_v24 = vsub.f32 %v5849_v26, %v5852_v32  ;;  %v2036_v46 = vsub.f32 %v5921_v23, %v7847_v52  ;;  %v2031_v41 = vand.u32 4294901760, %v2030_v12  ;;  %v1965_v12 = vld [vmem:[%s7830_s5 + $0x18] sm:$0xff] }
 0x22e   : > { %v6027_v30 = vsub.f32 %v1967_v57, %v5999_v11  ;;  %v2072_v57 = vsub.f32 %v5982_v19, %v7849_v42 }
 0x22f   : > { %v5854_v2 = vand.u32 4294901760, %v1754_v34  ;;  %v5898_v38 = vand.u32 4294901760, %v1830_v24  ;;  %v2048_v24 = vsub.f32 %v5928_v56, %v7844_v45  ;;  %v6029_v45 = vand.u32 4294901760, %v1965_v12 }
 0x231   : > { %v5857_v37 = vsub.f32 %v1754_v34, %v5854_v2  ;;  %1787 = vmatpush.msrb.mxu2 %v5854_v2  ;;  %1888 = vmatpush.msra.mxu1 %v5854_v2  ;;  %v2037_v34 = vand.u32 4294901760, %v2036_v46  ;;  %v2049_v46 = vand.u32 4294901760, %v2048_v24  ;;  %v2055_v24 = vand.u32 4294901760, %v2054_v0 }
 0x232   : > { %v2061_v0 = vand.u32 4294901760, %v2060_v9  ;;  %v2078_v9 = vsub.f32 %v5995_v31, %v7850_v60  ;;  %v7924_v60 = vand.u32 4294901760, %v6012_v44 }
 0x233   : > { %1789 = vmatpush.msrb.mxu2 %v5846_v36  ;;  %1858 = vmatpush.msra.mxu0 %v5857_v37  ;;  %v5866_v14 = vand.u32 4294901760, %v5857_v37 }
 0x234   : > { %1890 = vmatpush.msra.mxu1 %v5846_v36  ;;  %1795 = vmatmul.f32.vlgmr.msrb.gmra.mxu2 %v5319_v16  ;;  %v2084_v42 = vsub.f32 %v6012_v44, %v7924_v60 }
 0x235   : > { %1861 = vmatpush.msra.mxu0 %v5849_v26  ;;  %1921 = vmatpush.msra.mxu2 %v5866_v14  ;;  %v1824_v22 = vsub.f32 %v5857_v37, %v5866_v14 }
 0x236   : > { %1864 = vmatmul.f32.vlgmr.msra.gmra.mxu0 %v5296_v6  ;;  %1894 = vmatmul.f32.vlgmr.msra.gmra.mxu1 %v5302_v7 }
 0x237   : > { %1925 = vmatpush.msra.mxu2 %v5852_v32  ;;  %v5915_v43 = vand.u32 4294901760, %v1824_v22  ;;  %1979 = vmatpush.msrb.mxu0 %v5883_v33  ;;  %v1966_v22 = vld [vmem:[%s7830_s5 + $0x20] sm:$0xff] }
 0x238   : > { %2032 = vmatpush.msrb.mxu1 %v2031_v41  ;;  %v6014_v41 = vand.u32 4294901760, %v1966_v22 }
 0x239   : > { %1826 = vmatpush.msrb.mxu3 %v5915_v43  ;;  %2134 = vmatpush.msrb.mxu2 %v5918_v62 }
 0x23a   : > { %1981 = vmatpush.msrb.mxu0 %v5885_v13  ;;  %2038 = vmatpush.msrb.mxu1 %v2037_v34  ;;  %v2066_v34 = vsub.f32 %v5952_v28, %v7846_v3  ;;  %v6044_v52 = vsub.f32 %v1966_v22, %v6014_v41  ;;  %v6057_v22 = vsub.f32 %v1965_v12, %v6029_v45 }
 0x23b   : > { %1832 = vmatpush.msrb.mxu3 %v5898_v38  ;;  %2137 = vmatpush.msrb.mxu2 %v5921_v23  ;;  %v6064_v3 = vsub.f32 %v1964_v50, %v6033_v58  ;;  %v2079_v50 = vand.u32 4294901760, %v2078_v9 }
 0x23c   : > { %1803 = vmatmul.f32.gmra.mxu2 %v5358_v27  ;;  %1834 = vmatmul.f32.vlgmr.msrb.gmra.mxu3 %v5291_v4  ;;  %v2067_v40 = vand.u32 4294901760, %v2066_v34  ;;  %v2095_v12 = vand.u32 4294901760, %v6044_v52  ;;  %v7854_v7 = vand.u32 4294901760, %v6057_v22 }
 0x23d   : > { %1950 = vmatpush.msra.mxu3 %v5854_v2  ;;  %2140 = vmatpush.msrb.mxu2 %v5924_v54 }
 0x23e   : > { %1869 = vmatmul.f32.gmra.mxu0 %v5305_v10  ;;  %1900 = vmatmul.f32.gmra.mxu1 %v5322_v17  ;;  %v2096_v9 = vsub.f32 %v6044_v52, %v2095_v12  ;;  %v7855_v10 = vand.u32 4294901760, %v6064_v3 }
 0x23f   : > { %1952 = vmatpush.msra.mxu3 %v5846_v36  ;;  %2143 = vmatpush.msrb.mxu2 %v5928_v56 }
 0x240   : > { %1983 = vmatpush.msrb.mxu0 %v5887_v35  ;;  %2044 = vmatpush.msrb.mxu1 %v2043_v61  ;;  %v1963_v61 = vld [vmem:[%s7830_s5 + $0x8] sm:$0xff] }
 0x241   : > { %2192 = vmatpush.msrb.mxu3 %v5883_v33  ;;  %2146 = vmatpush.msrb.mxu2 %v5931_v59  ;;  %v6059_v34 = vand.u32 4294901760, %v1963_v61 }
 0x242   : > { %1985 = vmatpush.msrb.mxu0 %v5902_v39  ;;  %2050 = vmatpush.msrb.mxu1 %v2049_v46  ;;  %v1962_v46 = vld [vmem:[%s7830_s5] sm:$0xff] }
 0x243   : > { %2194 = vmatpush.msrb.mxu3 %v5885_v13  ;;  %2149 = vmatpush.msrb.mxu2 %v5934_v8  ;;  %v6071_v17 = vand.u32 4294901760, %v1962_v46  ;;  %v6081_v60 = vsub.f32 %v1963_v61, %v6059_v34 }
 0x244   : > { %1838 = vmatmul.f32.gmra.mxu3 %v5293_v5  ;;  %1927 = vmatmul.f32.vlgmr.msra.gmra.mxu2 %v5291_v4 }
 0x245   : > { %2196 = vmatpush.msrb.mxu3 %v5887_v35  ;;  %1987 = vmatpush.msrb.mxu0 %v5904_v29 }
 0x246   : > { %2056 = vmatpush.msrb.mxu1 %v2055_v24  ;;  %2152 = vmatpush.msrb.mxu2 %v5952_v28  ;;  %v2073_v24 = vand.u32 4294901760, %v2072_v57 }
 0x247   : > { %2198 = vmatpush.msrb.mxu3 %v5902_v39  ;;  %1989 = vmatpush.msrb.mxu0 %v5906_v55 }
 0x248   : > { %2062 = vmatpush.msrb.mxu1 %v2061_v0  ;;  %2155 = vmatpush.msrb.mxu2 %v5982_v19  ;;  %v7925_v0 = vand.u32 4294901760, %v6027_v30 }
 0x249   : > { %2200 = vmatpush.msrb.mxu3 %v5904_v29  ;;  %1991 = vmatpush.msrb.mxu0 %v5936_v49 }
 0x24a   : > { %2068 = vmatpush.msrb.mxu1 %v2067_v40  ;;  %v2090_v57 = vsub.f32 %v6027_v30, %v7925_v0  ;;  %v2085_v40 = vand.u32 4294901760, %v2084_v42  ;;  %v6091_v0 = vsub.f32 %v1962_v46, %v6071_v17  ;;  %2158 = vmatpush.msrb.mxu2 %v5995_v31  ;;  %v2102_v42 = vsub.f32 %v6057_v22, %v7854_v7 }
 0x24b   : > { %2202 = vmatpush.msrb.mxu3 %v5906_v55  ;;  %1993 = vmatpush.msrb.mxu0 %v5946_v25  ;;  %v2097_v46 = vand.u32 4294901760, %v2096_v9 }
 0x24c   : > { %1931 = vmatmul.f32.gmra.mxu2 %v5293_v5  ;;  %1954 = vmatmul.f32.vlgmr.msra.gmra.mxu3 %v5291_v4  ;;  %v2091_v61 = vand.u32 4294901760, %v2090_v57  ;;  %v2119_v57 = vand.u32 4294901760, %v6091_v0  ;;  %v2103_v7 = vand.u32 4294901760, %v2102_v42 }
 0x24d   : > { %2074 = vmatpush.msrb.mxu1 %v2073_v24  ;;  %2204 = vmatpush.msrb.mxu3 %v5936_v49  ;;  %v2113_v24 = vand.u32 4294901760, %v6081_v60 }
 0x24e   : > { %2161 = vmatpush.msrb.mxu2 %v6012_v44  ;;  %1995 = vmatpush.msrb.mxu0 %v5965_v51 }
 0x24f   : > { %2080 = vmatpush.msrb.mxu1 %v2079_v50  ;;  %2206 = vmatpush.msrb.mxu3 %v5946_v25  ;;  %v2108_v50 = vsub.f32 %v6064_v3, %v7855_v10  ;;  %v2120_v10 = vsub.f32 %v6091_v0, %v2119_v57 }
 0x250   : > { %2164 = vmatpush.msrb.mxu2 %v6027_v30  ;;  %1997 = vmatpush.msrb.mxu0 %v5997_v1 }
 0x251   : > { %2086 = vmatpush.msrb.mxu1 %v2085_v40  ;;  %2208 = vmatpush.msrb.mxu3 %v5965_v51  ;;  %v2114_v40 = vsub.f32 %v6081_v60, %v2113_v24  ;;  %v2109_v9 = vand.u32 4294901760, %v2108_v50  ;;  %v2121_v42 = vand.u32 4294901760, %v2120_v10  ;;  %v7927_v10 = vand.u32 4294901760, %v5921_v23 }
 0x252   : > { %2167 = vmatpush.msrb.mxu2 %v6044_v52  ;;  %1999 = vmatpush.msrb.mxu0 %v5999_v11  ;;  %v7936_v23 = vand.u32 4294901760, %v6027_v30 }
 0x253   : > { %2092 = vmatpush.msrb.mxu1 %v2091_v61  ;;  %2210 = vmatpush.msrb.mxu3 %v5997_v1  ;;  %v2115_v61 = vand.u32 4294901760, %v2114_v40  ;;  %v5143_v40 = vld [vmem:[%s7830_s5 + $0xc8] sm:$0xff] }
 0x254   : > { %1958 = vmatmul.f32.gmra.mxu3 %v5293_v5  ;;  %2170 = vmatpush.msrb.mxu2 %v6057_v22 }
 0x255   : > { %2098 = vmatpush.msrb.mxu1 %v2097_v46  ;;  %2212 = vmatpush.msrb.mxu3 %v5999_v11  ;;  %v7929_v46 = vand.u32 4294901760, %v5928_v56  ;;  %v7938_v56 = vand.u32 4294901760, %v6064_v3 }
 0x256   : > { %2173 = vmatpush.msrb.mxu2 %v6064_v3  ;;  %2001 = vmatpush.msrb.mxu0 %v6014_v41 }
 0x257   : > { %2104 = vmatpush.msrb.mxu1 %v2103_v7  ;;  %2214 = vmatpush.msrb.mxu3 %v6014_v41  ;;  %v7926_v7 = vand.u32 4294901760, %v5918_v62  ;;  %v7935_v62 = vand.u32 4294901760, %v6012_v44 }
 0x258   : > { %2176 = vmatpush.msrb.mxu2 %v6081_v60  ;;  %2003 = vmatpush.msrb.mxu0 %v6029_v45 }
 0x259   : > { %2110 = vmatpush.msrb.mxu1 %v2109_v9  ;;  %2216 = vmatpush.msrb.mxu3 %v6029_v45 }
 0x25a   : > { %2179 = vmatpush.msrb.mxu2 %v6091_v0  ;;  %2005 = vmatpush.msrb.mxu0 %v6033_v58 }
 0x25b   : > { %2116 = vmatpush.msrb.mxu1 %v2115_v61  ;;  %2218 = vmatpush.msrb.mxu3 %v6033_v58 }
 0x25c   : > { %2007 = vmatpush.msrb.mxu0 %v6059_v34 }
 0x25d   : > { %2122 = vmatpush.msrb.mxu1 %v2121_v42  ;;  %2220 = vmatpush.msrb.mxu3 %v6059_v34  ;;  %v6250_v42 = vand.u32 4294901760, %v5143_v40 }
 0x25e   : > { %2009 = vmatpush.msrb.mxu0 %v6071_v17 }
 0x25f   : > { %2310 = vmatpush.msra.mxu1 %v5883_v33  ;;  %2222 = vmatpush.msrb.mxu3 %v6071_v17  ;;  %v7928_v33 = vand.u32 4294901760, %v5924_v54  ;;  %v7937_v54 = vand.u32 4294901760, %v6057_v22 }
 0x260   : > { %2239 = vmatpush.msra.mxu0 %v7926_v7 }
 0x261   : > { %2312 = vmatpush.msra.mxu1 %v5885_v13  ;;  %v7930_v13 = vand.u32 4294901760, %v5931_v59  ;;  %v5149_v59 = vld [vmem:[%s7830_s5 + $0xf8] sm:$0xff] }
 0x262   : > { %2243 = vmatpush.msra.mxu0 %v7927_v10 }
 0x263   : > { %2314 = vmatpush.msra.mxu1 %v5887_v35  ;;  %v7931_v35 = vand.u32 4294901760, %v5934_v8  ;;  %v6185_v8 = vand.u32 4294901760, %v5149_v59 }
 0x264   : > { %2247 = vmatpush.msra.mxu0 %v7928_v33  ;;  %v5142_v33 = vld [vmem:[%s7830_s5 + $0xc0] sm:$0xff] }
 0x265   : > { %2316 = vmatpush.msra.mxu1 %v5902_v39  ;;  %v7932_v39 = vand.u32 4294901760, %v5952_v28  ;;  %2351 = vmatpush.msra.mxu2 %v6185_v8 }
 0x266   : > { %2251 = vmatpush.msra.mxu0 %v7929_v46 }
 0x267   : > { %2318 = vmatpush.msra.mxu1 %v5904_v29  ;;  %v7933_v29 = vand.u32 4294901760, %v5982_v19 }
 0x268   : > { %2255 = vmatpush.msra.mxu0 %v7930_v13 }
 0x269   : > { %2320 = vmatpush.msra.mxu1 %v5906_v55  ;;  %v7934_v55 = vand.u32 4294901760, %v5995_v31 }
 0x26a   : > { %2259 = vmatpush.msra.mxu0 %v7931_v35  ;;  %v6266_v35 = vand.u32 4294901760, %v5142_v33 }
 0x26b   : > { %2322 = vmatpush.msra.mxu1 %v5936_v49  ;;  %v5148_v49 = vld [vmem:[%s7830_s5 + $0xf0] sm:$0xff] }
 0x26c   : > { %2263 = vmatpush.msra.mxu0 %v7932_v39  ;;  %v6194_v52 = vand.u32 4294901760, %v5148_v49  ;;  %v6269_v39 = vsub.f32 %v5143_v40, %v6250_v42 }
 0x26d   : > { %2324 = vmatpush.msra.mxu1 %v5946_v25 }
 0x26e   : > { %2267 = vmatpush.msra.mxu0 %v7933_v29  ;;  %2353 = vmatpush.msra.mxu2 %v6194_v52  ;;  %v6204_v28 = vsub.f32 %v5148_v49, %v6194_v52  ;;  %v5140_v49 = vld [vmem:[%s7830_s5 + $0xb0] sm:$0xff] }
 0x26f   : > { %2326 = vmatpush.msra.mxu1 %v5965_v51  ;;  %v5146_v51 = vld [vmem:[%s7830_s5 + $0xe0] sm:$0xff] }
 0x270   : > { %2271 = vmatpush.msra.mxu0 %v7934_v55  ;;  %v7867_v19 = vand.u32 4294901760, %v6204_v28  ;;  %v6214_v3 = vand.u32 4294901760, %v5146_v51  ;;  %v5141_v55 = vld [vmem:[%s7830_s5 + $0xb8] sm:$0xff] }
 0x271   : > { %2328 = vmatpush.msra.mxu1 %v5997_v1  ;;  %v5145_v1 = vld [vmem:[%s7830_s5 + $0xd8] sm:$0xff] }
 0x272   : > { %2275 = vmatpush.msra.mxu0 %v7935_v62  ;;  %v2408_v44 = vsub.f32 %v6204_v28, %v7867_v19  ;;  %v6227_v22 = vand.u32 4294901760, %v5145_v1 }
 0x273   : > { %2330 = vmatpush.msra.mxu1 %v5999_v11 }
 0x274   : > { %2279 = vmatpush.msra.mxu0 %v7936_v23  ;;  %v2409_v60 = vand.u32 4294901760, %v2408_v44  ;;  %v6242_v50 = vsub.f32 %v5145_v1, %v6227_v22  ;;  %v5139_v44 = vld [vmem:[%s7830_s5 + $0xa8] sm:$0xff] }
 0x275   : > { %2332 = vmatpush.msra.mxu1 %v6014_v41 }
 0x276   : > { %2283 = vmatpush.msra.mxu0 %v2095_v12  ;;  %v5144_v12 = vld [vmem:[%s7830_s5 + $0xd0] sm:$0xff]  ;;  %v7862_v61 = vand.u32 4294901760, %v6242_v50 }
 0x277   : > { %2334 = vmatpush.msra.mxu1 %v6029_v45 }
 0x278   : > { %2287 = vmatpush.msra.mxu0 %v7937_v54  ;;  %v2426_v46 = vsub.f32 %v6242_v50, %v7862_v61  ;;  %v7859_v54 = vand.u32 4294901760, %v6269_v39 }
 0x279   : > { %2336 = vmatpush.msra.mxu1 %v6033_v58  ;;  %v5147_v58 = vld [vmem:[%s7830_s5 + $0xe8] sm:$0xff] }
 0x27a   : > { %2291 = vmatpush.msra.mxu0 %v7938_v56  ;;  %v6201_v45 = vand.u32 4294901760, %v5147_v58  ;;  %v2427_v62 = vand.u32 4294901760, %v2426_v46  ;;  %v6279_v56 = vand.u32 4294901760, %v5141_v55 }
 0x27b   : > { %2338 = vmatpush.msra.mxu1 %v6059_v34  ;;  %v6230_v34 = vsub.f32 %v5146_v51, %v6214_v3  ;;  %v2438_v51 = vsub.f32 %v6269_v39, %v7859_v54 }
 0x27c   : > { %2295 = vmatpush.msra.mxu0 %v2113_v24  ;;  %2355 = vmatpush.msra.mxu2 %v6201_v45  ;;  %v6217_v31 = vsub.f32 %v5147_v58, %v6201_v45  ;;  %v6239_v24 = vand.u32 4294901760, %v5144_v12  ;;  %v6294_v1 = vsub.f32 %v5141_v55, %v6279_v56 }
 0x27d   : > { %2340 = vmatpush.msra.mxu1 %v6071_v17  ;;  %v6192_v17 = vsub.f32 %v5149_v59, %v6185_v8  ;;  %v6282_v59 = vsub.f32 %v5142_v33, %v6266_v35 }
 0x27e   : > { %2299 = vmatpush.msra.mxu0 %v2119_v57  ;;  %2357 = vmatpush.msra.mxu2 %v6214_v3  ;;  %v7865_v41 = vand.u32 4294901760, %v6217_v31  ;;  %v7863_v57 = vand.u32 4294901760, %v6230_v34  ;;  %v6253_v7 = vsub.f32 %v5144_v12, %v6239_v24  ;;  %v2439_v12 = vand.u32 4294901760, %v2438_v51 }
 0x27f   : > { %v7868_v25 = vand.u32 4294901760, %v6192_v17 }
 0x280   : > { %v2414_v0 = vsub.f32 %v6217_v31, %v7865_v41  ;;  %2359 = vmatpush.msra.mxu2 %v6227_v22  ;;  %v2420_v10 = vsub.f32 %v6230_v34, %v7863_v57  ;;  %v7861_v13 = vand.u32 4294901760, %v6253_v7 }
 0x281   : > { %v2402_v30 = vsub.f32 %v6192_v17, %v7868_v25 }
 0x282   : > { %v2415_v9 = vand.u32 4294901760, %v2414_v0  ;;  %2361 = vmatpush.msra.mxu2 %v6239_v24  ;;  %v2421_v29 = vand.u32 4294901760, %v2420_v10  ;;  %v2432_v23 = vsub.f32 %v6253_v7, %v7861_v13  ;;  %v6302_v0 = vand.u32 4294901760, %v5139_v44  ;;  %v5138_v10 = vld [vmem:[%s7830_s5 + $0xa0] sm:$0xff] }
 0x283   : > { %v2403_v11 = vand.u32 4294901760, %v2402_v30  ;;  %v6291_v30 = vand.u32 4294901760, %v5140_v49 }
 0x284   : > { %2363 = vmatpush.msra.mxu2 %v6250_v42  ;;  %v2433_v58 = vand.u32 4294901760, %v2432_v23  ;;  %v6321_v55 = vsub.f32 %v5139_v44, %v6302_v0  ;;  %v5137_v23 = vld [vmem:[%s7830_s5 + $0x98] sm:$0xff] }
 0x285   : > { %2404 = vmatpush.msra.mxu3 %v2403_v11  ;;  %v7858_v11 = vand.u32 4294901760, %v6282_v59  ;;  %v6305_v40 = vsub.f32 %v5140_v49, %v6291_v30 }
 0x286   : > { %2365 = vmatpush.msra.mxu2 %v6266_v35  ;;  %v7860_v51 = vand.u32 4294901760, %v6321_v55 }
 0x287   : > { %2410 = vmatpush.msra.mxu3 %v2409_v60  ;;  %v7856_v60 = vand.u32 4294901760, %v6294_v1  ;;  %v7857_v46 = vand.u32 4294901760, %v6305_v40 }
 0x288   : > { %2367 = vmatpush.msra.mxu2 %v6279_v56 }
 0x289   : > { %2416 = vmatpush.msra.mxu3 %v2415_v9  ;;  %v2444_v9 = vsub.f32 %v6282_v59, %v7858_v11  ;;  %v2450_v33 = vsub.f32 %v6294_v1, %v7856_v60  ;;  %v6331_v60 = vand.u32 4294901760, %v5137_v23 }
 0x28a   : > { %2369 = vmatpush.msra.mxu2 %v6291_v30 }
 0x28b   : > { %2422 = vmatpush.msra.mxu3 %v2421_v29  ;;  %v6318_v29 = vand.u32 4294901760, %v5138_v10  ;;  %v2451_v49 = vand.u32 4294901760, %v2450_v33  ;;  %v2462_v33 = vsub.f32 %v6321_v55, %v7860_v51  ;;  %v6346_v11 = vsub.f32 %v5137_v23, %v6331_v60 }
 0x28c   : > { %2371 = vmatpush.msra.mxu2 %v6302_v0 }
 0x28d   : > { %2428 = vmatpush.msra.mxu3 %v2427_v62  ;;  %v2445_v62 = vand.u32 4294901760, %v2444_v9  ;;  %v6334_v44 = vsub.f32 %v5138_v10, %v6318_v29  ;;  %v2463_v54 = vand.u32 4294901760, %v2462_v33 }
 0x28e   : > { %2373 = vmatpush.msra.mxu2 %v6318_v29 }
 0x28f   : > { %2434 = vmatpush.msra.mxu3 %v2433_v58  ;;  %v2456_v58 = vsub.f32 %v6305_v40, %v7857_v46  ;;  %v7864_v10 = vand.u32 4294901760, %v6334_v44 }
 0x290   : > { %2375 = vmatpush.msra.mxu2 %v6331_v60 }
 0x291   : > { %2440 = vmatpush.msra.mxu3 %v2439_v12  ;;  %v5136_v12 = vld [vmem:[%s7830_s5 + $0x90] sm:$0xff]  ;;  %v2457_v9 = vand.u32 4294901760, %v2456_v58  ;;  %v7866_v58 = vand.u32 4294901760, %v6346_v11  ;;  %v2468_v23 = vsub.f32 %v6334_v44, %v7864_v10 }
 0x292   : > { %v6343_v46 = vand.u32 4294901760, %v5136_v12 }
 0x293   : > { %2446 = vmatpush.msra.mxu3 %v2445_v62  ;;  %v5135_v62 = vld [vmem:[%s7830_s5 + $0x88] sm:$0xff]  ;;  %v2474_v33 = vsub.f32 %v6346_v11, %v7866_v58 }
 0x294   : > { %2377 = vmatpush.msra.mxu2 %v6343_v46  ;;  %v6354_v51 = vand.u32 4294901760, %v5135_v62  ;;  %v6357_v13 = vsub.f32 %v5136_v12, %v6343_v46 }
 0x295   : > { %2452 = vmatpush.msra.mxu3 %v2451_v49  ;;  %v5134_v49 = vld [vmem:[%s7830_s5 + $0x80] sm:$0xff]  ;;  %v2475_v10 = vand.u32 4294901760, %v2474_v33 }
 0x296   : > { %2379 = vmatpush.msra.mxu2 %v6354_v51  ;;  %v7869_v61 = vand.u32 4294901760, %v6357_v13  ;;  %v6370_v57 = vand.u32 4294901760, %v5134_v49  ;;  %v6373_v12 = vsub.f32 %v5135_v62, %v6354_v51 }
 0x297   : > { %2458 = vmatpush.msra.mxu3 %v2457_v9  ;;  %v2469_v9 = vand.u32 4294901760, %v2468_v23 }
 0x298   : > { %v2480_v41 = vsub.f32 %v6357_v13, %v7869_v61  ;;  %2381 = vmatpush.msra.mxu2 %v6370_v57  ;;  %v7876_v58 = vand.u32 4294901760, %v6373_v12  ;;  %v6381_v19 = vsub.f32 %v5134_v49, %v6370_v57 }
 0x299   : > { %2464 = vmatpush.msra.mxu3 %v2463_v54 }
 0x29a   : > { %v2481_v25 = vand.u32 4294901760, %v2480_v41  ;;  %v2486_v62 = vsub.f32 %v6373_v12, %v7876_v58  ;;  %v7886_v54 = vand.u32 4294901760, %v6381_v19 }
 0x29b   : > { %2470 = vmatpush.msra.mxu3 %v2469_v9 }
 0x29c   : > { %v2487_v23 = vand.u32 4294901760, %v2486_v62  ;;  %v2492_v33 = vsub.f32 %v6381_v19, %v7886_v54 }
 0x29d   : > { %2476 = vmatpush.msra.mxu3 %v2475_v10 }
 0x29e   : > { %v2493_v61 = vand.u32 4294901760, %v2492_v33 }
 0x29f   : > { %2482 = vmatpush.msra.mxu3 %v2481_v25 }
 0x2a1   : > { %2488 = vmatpush.msra.mxu3 %v2487_v23 }
 0x2a3   : > { %2494 = vmatpush.msra.mxu3 %v2493_v61 }
 0x2b3   : > { %v1865_v41 = vpop.f32.mrf.mxu0  ;;  %v1895_v27 = vpop.f32.mrf.mxu1 }
 0x2b7   : > { %v1796_v6 = vpop.f32.mrf.mxu2 }
 0x2bb   : > { %v1870_v62 = vpop.f32.mrf.mxu0  ;;  %v1901_v25 = vpop.f32.mrf.mxu1 }
 0x2bf   : > { %v1804_v49 = vpop.f32.mrf.mxu2  ;;  %v1835_v9 = vpop.f32.mrf.mxu3 }
 0x2c0   : > { %v1836_v5 = vadd.f32 %v1835_v9, %v1796_v6  ;;  %v7944_v9 = vand.u32 4294901760, %v6253_v7 }
 0x2c2   : > { %v1866_v58 = vadd.f32 %v1865_v41, %v1836_v5  ;;  %v5160_v41 = vld [vmem:[%s7830_s5 + $0x150] sm:$0xff] }
 0x2c4   : > { %v1896_v63 = vadd.f32 %v1895_v27, %v1866_v58  ;;  %v7941_v58 = vand.u32 4294901760, %v6217_v31 }
 0x2c7   : > { %v1839_v4 = vpop.f32.mrf.mxu3  ;;  %v1928_v16 = vpop.f32.mrf.mxu2 }
 0x2c8   : > { %v1840_v10 = vadd.f32 %v1839_v4, %v1804_v49  ;;  %v1929_v53 = vadd.f32 %v1928_v16, %v1896_v63  ;;  %v7939_v4 = vand.u32 4294901760, %v6192_v17 }
 0x2ca   : > { %v1871_v21 = vadd.f32 %v1870_v62, %v1840_v10 }
 0x2cc   : > { %v1902_v61 = vadd.f32 %v1901_v25, %v1871_v21  ;;  %v7940_v21 = vand.u32 4294901760, %v6204_v28 }
 0x2cf   : > { %v1955_v20 = vpop.f32.mrf.mxu3  ;;  %v1932_v23 = vpop.f32.mrf.mxu2 }
 0x2d0   : > { %v1956_v54 = vadd.f32 %v1955_v20, %v1929_v53  ;;  %v1933_v5 = vadd.f32 %v1932_v23, %v1902_v61 }
 0x2d2   : > { %v6390_v33 = vand.u32 4294901760, %v1956_v54 }
 0x2d4   : > { %v2011_v48 = vsub.f32 %v1956_v54, %v6390_v33  ;;  %2124 = vmatmul.f32.vlgmr.msrb.gmra.mxu1 %v6390_v33 }
 0x2d5   : > { %2564 = vmatpush.msrb.mxu1 %v6185_v8 }
 0x2d6   : > { %2182 = vmatmul.f32.vlgmr.msrb.gmra.mxu2 %v2011_v48  ;;  %v2012_v6 = vand.u32 4294901760, %v2011_v48 }
 0x2d7   : > { %2566 = vmatpush.msrb.mxu1 %v6194_v52  ;;  %2611 = vmatpush.msrb.mxu2 %v7939_v4  ;;  %v1959_v16 = vpop.f32.mrf.mxu3 }
 0x2d8   : > { %v1960_v27 = vadd.f32 %v1959_v16, %v1933_v5  ;;  %2226 = vmatmul.f32.vlgmr.msrb.gmra.mxu3 %v2012_v6  ;;  %v2013_v20 = vsub.f32 %v2011_v48, %v2012_v6  ;;  %v7942_v48 = vand.u32 4294901760, %v6230_v34  ;;  %v5159_v5 = vld [vmem:[%s7830_s5 + $0x148] sm:$0xff] }
 0x2d9   : > { %2568 = vmatpush.msrb.mxu1 %v6201_v45  ;;  %2615 = vmatpush.msrb.mxu2 %v7940_v21 }
 0x2da   : > { %v6401_v53 = vand.u32 4294901760, %v1960_v27  ;;  %2682 = vmatpush.msrb.mxu3 %v6185_v8  ;;  %v2014_v63 = vand.u32 4294901760, %v2013_v20  ;;  %v6601_v20 = vand.u32 4294901760, %v5159_v5 }
 0x2db   : > { %2570 = vmatpush.msrb.mxu1 %v6214_v3  ;;  %2619 = vmatpush.msrb.mxu2 %v7941_v58 }
 0x2dc   : > { %v2019_v54 = vsub.f32 %v1960_v27, %v6401_v53  ;;  %2684 = vmatpush.msrb.mxu3 %v6194_v52  ;;  %2015 = vmatmul.f32.vlgmr.msrb.gmra.mxu0 %v2014_v63  ;;  %v7943_v52 = vand.u32 4294901760, %v6242_v50  ;;  %v5158_v63 = vld [vmem:[%s7830_s5 + $0x140] sm:$0xff] }
 0x2dd   : > { %2128 = vmatmul.f32.gmra.mxu1 %v6401_v53  ;;  %2506 = vmatpush.msrb.mxu0 %v6192_v17 }
 0x2de   : > { %2572 = vmatpush.msrb.mxu1 %v6227_v22  ;;  %2623 = vmatpush.msrb.mxu2 %v7942_v48  ;;  %v2020_v8 = vand.u32 4294901760, %v2019_v54  ;;  %v6617_v48 = vand.u32 4294901760, %v5158_v63 }
 0x2df   : > { %2686 = vmatpush.msrb.mxu3 %v6201_v45  ;;  %2187 = vmatmul.f32.gmra.mxu2 %v2019_v54  ;;  %v7945_v45 = vand.u32 4294901760, %v6269_v39 }
 0x2e0   : > { %2509 = vmatpush.msrb.mxu0 %v6204_v28  ;;  %2574 = vmatpush.msrb.mxu1 %v6239_v24  ;;  %v2021_v49 = vsub.f32 %v2019_v54, %v2020_v8  ;;  %v7946_v28 = vand.u32 4294901760, %v6282_v59  ;;  %v6615_v54 = vsub.f32 %v5159_v5, %v6601_v20 }
 0x2e1   : > { %2627 = vmatpush.msrb.mxu2 %v7943_v52  ;;  %2688 = vmatpush.msrb.mxu3 %v6214_v3  ;;  %v7947_v3 = vand.u32 4294901760, %v6294_v1  ;;  %v5157_v52 = vld [vmem:[%s7830_s5 + $0x138] sm:$0xff] }
 0x2e2   : > { %2232 = vmatmul.f32.gmra.mxu3 %v2020_v8  ;;  %2512 = vmatpush.msrb.mxu0 %v6217_v31  ;;  %v2022_v17 = vand.u32 4294901760, %v2021_v49  ;;  %v7948_v31 = vand.u32 4294901760, %v6305_v40 }
 0x2e3   : > { %2576 = vmatpush.msrb.mxu1 %v6250_v42  ;;  %2631 = vmatpush.msrb.mxu2 %v7944_v9  ;;  %v3016_v9 = vand.u32 4294901760, %v6615_v54 }
 0x2e4   : > { %2690 = vmatpush.msrb.mxu3 %v6227_v22  ;;  %2515 = vmatpush.msrb.mxu0 %v6230_v34  ;;  %v7949_v22 = vand.u32 4294901760, %v6321_v55  ;;  %v7950_v34 = vand.u32 4294901760, %v6334_v44 }
 0x2e5   : > { %2578 = vmatpush.msrb.mxu1 %v6266_v35  ;;  %2635 = vmatpush.msrb.mxu2 %v7945_v45  ;;  %v6633_v45 = vsub.f32 %v5158_v63, %v6617_v48  ;;  %v5153_v63 = vld [vmem:[%s7830_s5 + $0x118] sm:$0xff] }
 0x2e6   : > { %2692 = vmatpush.msrb.mxu3 %v6239_v24  ;;  %2023 = vmatmul.f32.gmra.mxu0 %v2022_v17  ;;  %v7951_v24 = vand.u32 4294901760, %v6346_v11 }
 0x2e7   : > { %2342 = vmatmul.f32.vlgmr.msra.gmra.mxu1 %v6390_v33  ;;  %2518 = vmatpush.msrb.mxu0 %v6242_v50  ;;  %v7952_v50 = vand.u32 4294901760, %v6357_v13 }
 0x2e8   : > { %2580 = vmatpush.msrb.mxu1 %v6279_v56  ;;  %2639 = vmatpush.msrb.mxu2 %v7946_v28  ;;  %v6635_v28 = vand.u32 4294901760, %v5157_v52 }
 0x2e9   : > { %2694 = vmatpush.msrb.mxu3 %v6250_v42  ;;  %2387 = vmatmul.f32.vlgmr.msra.gmra.mxu2 %v5898_v38  ;;  %v7953_v42 = vand.u32 4294901760, %v6373_v12 }
 0x2ea   : > { %2521 = vmatpush.msrb.mxu0 %v6253_v7  ;;  %2582 = vmatpush.msrb.mxu1 %v6291_v30  ;;  %v7954_v7 = vand.u32 4294901760, %v6381_v19 }
 0x2eb   : > { %2643 = vmatpush.msrb.mxu2 %v7947_v3  ;;  %2696 = vmatpush.msrb.mxu3 %v6266_v35  ;;  %v5163_v35 = vld [vmem:[%s7830_s5 + $0x168] sm:$0xff] }
 0x2ec   : > { %2496 = vmatmul.f32.vlgmr.msra.gmra.mxu3 %v5846_v36  ;;  %2524 = vmatpush.msrb.mxu0 %v6269_v39 }
 0x2ed   : > { %2584 = vmatpush.msrb.mxu1 %v6302_v0  ;;  %2647 = vmatpush.msrb.mxu2 %v7948_v31 }
 0x2ee   : > { %2698 = vmatpush.msrb.mxu3 %v6279_v56  ;;  %2527 = vmatpush.msrb.mxu0 %v6282_v59  ;;  %v6542_v59 = vand.u32 4294901760, %v5163_v35 }
 0x2ef   : > { %2586 = vmatpush.msrb.mxu1 %v6318_v29  ;;  %2651 = vmatpush.msrb.mxu2 %v7949_v22 }
 0x2f0   : > { %2700 = vmatpush.msrb.mxu3 %v6291_v30  ;;  %2301 = vmatmul.f32.vlgmr.msra.gmra.mxu0 %v6390_v33  ;;  %v5162_v30 = vld [vmem:[%s7830_s5 + $0x160] sm:$0xff]  ;;  %v6583_v33 = vand.u32 4294901760, %v5160_v41 }
 0x2f1   : > { %2346 = vmatmul.f32.gmra.mxu1 %v6401_v53  ;;  %2530 = vmatpush.msrb.mxu0 %v6294_v1 }
 0x2f2   : > { %2588 = vmatpush.msrb.mxu1 %v6331_v60  ;;  %2655 = vmatpush.msrb.mxu2 %v7950_v34  ;;  %v6599_v27 = vsub.f32 %v5160_v41, %v6583_v33  ;;  %v5156_v34 = vld [vmem:[%s7830_s5 + $0x130] sm:$0xff] }
 0x2f3   : > { %2702 = vmatpush.msrb.mxu3 %v6302_v0  ;;  %2395 = vmatmul.f32.gmra.mxu2 %v5915_v43  ;;  %v6557_v0 = vand.u32 4294901760, %v5162_v30 }
 0x2f4   : > { %2533 = vmatpush.msrb.mxu0 %v6305_v40  ;;  %2590 = vmatpush.msrb.mxu1 %v6343_v46  ;;  %v3010_v58 = vand.u32 4294901760, %v6599_v27 }
 0x2f5   : > { %2659 = vmatpush.msrb.mxu2 %v7951_v24  ;;  %2704 = vmatpush.msrb.mxu3 %v6318_v29 }
 0x2f6   : > { %2500 = vmatmul.f32.gmra.mxu3 %v5854_v2  ;;  %2536 = vmatpush.msrb.mxu0 %v6321_v55  ;;  %v3011_v17 = vsub.f32 %v6599_v27, %v3010_v58 }
 0x2f7   : > { %2592 = vmatpush.msrb.mxu1 %v6354_v51  ;;  %2663 = vmatpush.msrb.mxu2 %v7952_v50  ;;  %v3017_v50 = vsub.f32 %v6615_v54, %v3016_v9 }
 0x2f8   : > { %2706 = vmatpush.msrb.mxu3 %v6331_v60  ;;  %2539 = vmatpush.msrb.mxu0 %v6334_v44  ;;  %v6555_v60 = vsub.f32 %v5163_v35, %v6542_v59  ;;  %v6572_v44 = vsub.f32 %v5162_v30, %v6557_v0  ;;  %v3012_v24 = vand.u32 4294901760, %v3011_v17 }
 0x2f9   : > { %2594 = vmatpush.msrb.mxu1 %v6370_v57  ;;  %2667 = vmatpush.msrb.mxu2 %v7953_v42  ;;  %v3022_v42 = vand.u32 4294901760, %v6633_v45  ;;  %v3018_v35 = vand.u32 4294901760, %v3017_v50 }
 0x2fa   : > { %2708 = vmatpush.msrb.mxu3 %v6343_v46  ;;  %2305 = vmatmul.f32.gmra.mxu0 %v6401_v53  ;;  %v5161_v46 = vld [vmem:[%s7830_s5 + $0x158] sm:$0xff]  ;;  %v2998_v23 = vand.u32 4294901760, %v6572_v44 }
 0x2fb   : > { %2776 = vmatpush.msra.mxu1 %v5915_v43  ;;  %2542 = vmatpush.msrb.mxu0 %v6346_v11  ;;  %v7958_v43 = vld [vmem:[#allocation13_spill] sm:$0xff]  ;;  %v3023_v30 = vsub.f32 %v6633_v45, %v3022_v42 }
 0x2fc   : > { %2598 = vmatmul.f32.vlgmr.msrb.gmra.mxu1 %v5852_v32  ;;  %2671 = vmatpush.msrb.mxu2 %v7954_v7  ;;  %v2999_v21 = vsub.f32 %v6572_v44, %v2998_v23  ;;  %v6652_v7 = vsub.f32 %v5157_v52, %v6635_v28  ;;  %v6698_v52 = vand.u32 4294901760, %v5153_v63 }
 0x2fd   : > { %2710 = vmatpush.msrb.mxu3 %v6354_v51  ;;  %2782 = vmatpush.msra.mxu1 %v5898_v38  ;;  %v7955_v38 = vld [vmem:[#allocation10_spill] sm:$0xff]  ;;  %v2992_v51 = vand.u32 4294901760, %v6555_v60 }
 0x2fe   : > { %2808 = vmatpush.msra.mxu2 %v5857_v37  ;;  %2545 = vmatpush.msrb.mxu0 %v6357_v13  ;;  %v3000_v8 = vand.u32 4294901760, %v2999_v21 }
 0x2ff   : > { %2673 = vmatmul.f32.vlgmr.msrb.gmra.mxu2 %v5846_v36  ;;  %2712 = vmatpush.msrb.mxu3 %v6370_v57  ;;  %v2993_v25 = vsub.f32 %v6555_v60, %v2992_v51 }
 0x300   : > { %2900 = vmatpush.msrb.mxu1 %v5854_v2  ;;  %2811 = vmatpush.msra.mxu2 %v5849_v26 }
 0x301   : > { %2838 = vmatpush.msra.mxu3 %v5854_v2  ;;  %2548 = vmatpush.msrb.mxu0 %v6373_v12  ;;  %v6574_v12 = vand.u32 4294901760, %v5161_v46  ;;  %v2994_v16 = vand.u32 4294901760, %v2993_v25  ;;  %v3024_v25 = vand.u32 4294901760, %v3023_v30 }
 0x302   : > { %2714 = vmatmul.f32.vlgmr.msrb.gmra.mxu3 %v5846_v36  ;;  %2902 = vmatpush.msrb.mxu1 %v5846_v36 }
 0x303   : > { %2840 = vmatpush.msra.mxu3 %v5846_v36  ;;  %2551 = vmatpush.msrb.mxu0 %v6381_v19  ;;  %v6587_v61 = vsub.f32 %v5161_v46, %v6574_v12  ;;  %v7893_v46 = vand.u32 4294901760, %v6652_v7 }
 0x304   : > { %2604 = vmatmul.f32.gmra.mxu1 %v5866_v14  ;;  %2554 = vmatmul.f32.vlgmr.msrb.gmra.mxu0 %v5849_v26  ;;  %v7956_v26 = vld [vmem:[#allocation12_spill] sm:$0xff] }
 0x305   : > { %2737 = vmatpush.msra.mxu0 %v5854_v2  ;;  %v3004_v53 = vand.u32 4294901760, %v6587_v61 }
 0x307   : > { %2739 = vmatpush.msra.mxu0 %v5846_v36  ;;  %2677 = vmatmul.f32.gmra.mxu2 %v5854_v2  ;;  %v7957_v36 = vld [vmem:[#allocation11_spill] sm:$0xff]  ;;  %v3005_v49 = vsub.f32 %v6587_v61, %v3004_v53 }
 0x309   : > { %2871 = vmatpush.msrb.mxu0 %v5866_v14  ;;  %v5164_v14 = vld [vmem:[%s7830_s5 + $0x170] sm:$0xff]  ;;  %v3006_v22 = vand.u32 4294901760, %v3005_v49 }
 0x30a   : > { %2718 = vmatmul.f32.gmra.mxu3 %v5854_v2  ;;  %v5165_v2 = vld [vmem:[%s7830_s5 + $0x178] sm:$0xff]  ;;  %v6531_v13 = vand.u32 4294901760, %v5164_v14 }
 0x30b   : > { %2875 = vmatpush.msrb.mxu0 %v5852_v32  ;;  %v7959_v32 = vld [vmem:[#allocation14_spill] sm:$0xff] }
 0x30c   : > { %2784 = vmatmul.f32.vlgmr.msra.gmra.mxu1 %v5635_v18  ;;  %2559 = vmatmul.f32.gmra.mxu0 %v5857_v37  ;;  %v6521_v37 = vand.u32 4294901760, %v5165_v2  ;;  %v6540_v56 = vsub.f32 %v5164_v14, %v6531_v13  ;;  %v5155_v14 = vld [vmem:[%s7830_s5 + $0x128] sm:$0xff] }
 0x30e   : > { %v6529_v57 = vsub.f32 %v5165_v2, %v6521_v37  ;;  %2930 = vmatpush.msrb.mxu2 %v6521_v37  ;;  %3143 = vmatpush.msra.mxu1 %v6521_v37  ;;  %v2986_v11 = vand.u32 4294901760, %v6540_v56  ;;  %v6654_v2 = vand.u32 4294901760, %v5156_v34 }
 0x30f   : > { %2814 = vmatmul.f32.vlgmr.msra.gmra.mxu2 %v5642_v47 }
 0x310   : > { %v2980_v39 = vand.u32 4294901760, %v6529_v57  ;;  %2932 = vmatpush.msrb.mxu2 %v6531_v13  ;;  %3145 = vmatpush.msra.mxu1 %v6531_v13  ;;  %v2987_v55 = vsub.f32 %v6540_v56, %v2986_v11 }
 0x312   : > { %2844 = vmatmul.f32.vlgmr.msra.gmra.mxu3 %v5649_v15  ;;  %v2981_v1 = vsub.f32 %v6529_v57, %v2980_v39  ;;  %2934 = vmatpush.msrb.mxu2 %v6542_v59  ;;  %v2988_v62 = vand.u32 4294901760, %v2987_v55  ;;  %v5154_v55 = vld [vmem:[%s7830_s5 + $0x120] sm:$0xff] }
 0x313   : > { %3147 = vmatpush.msra.mxu1 %v6542_v59 }
 0x314   : > { %2788 = vmatmul.f32.gmra.mxu1 %v7955_v38  ;;  %2745 = vmatmul.f32.vlgmr.msra.gmra.mxu0 %v7956_v26  ;;  %v2982_v29 = vand.u32 4294901760, %v2981_v1  ;;  %v6665_v1 = vand.u32 4294901760, %v5155_v14 }
 0x315   : > { %3085 = vmatpush.msra.mxu0 %v6529_v57  ;;  %2936 = vmatpush.msrb.mxu2 %v6557_v0 }
 0x316   : > { %3149 = vmatpush.msra.mxu1 %v6557_v0  ;;  %2983 = vmatpush.msrb.mxu3 %v2982_v29  ;;  %v6671_v29 = vsub.f32 %v5156_v34, %v6654_v2  ;;  %v6680_v5 = vsub.f32 %v5155_v14, %v6665_v1  ;;  %v5152_v34 = vld [vmem:[%s7830_s5 + $0x110] sm:$0xff] }
 0x317   : > { %2819 = vmatmul.f32.gmra.mxu2 %v7957_v36  ;;  %3088 = vmatpush.msra.mxu0 %v6540_v56  ;;  %v6717_v14 = vand.u32 4294901760, %v5152_v34 }
 0x318   : > { %2938 = vmatpush.msrb.mxu2 %v6574_v12  ;;  %2989 = vmatpush.msrb.mxu3 %v2988_v62  ;;  %v7891_v21 = vand.u32 4294901760, %v6671_v29 }
 0x319   : > { %3091 = vmatpush.msra.mxu0 %v6555_v60  ;;  %3151 = vmatpush.msra.mxu1 %v6574_v12 }
 0x31a   : > { %2850 = vmatmul.f32.gmra.mxu3 %v7958_v43  ;;  %2940 = vmatpush.msrb.mxu2 %v6583_v33 }
 0x31b   : > { %3094 = vmatpush.msra.mxu0 %v6572_v44  ;;  %2995 = vmatpush.msrb.mxu3 %v2994_v16  ;;  %v3029_v16 = vsub.f32 %v6652_v7, %v7893_v46 }
 0x31c   : > { %2904 = vmatmul.f32.vlgmr.msrb.gmra.mxu1 %v5635_v18  ;;  %2753 = vmatmul.f32.gmra.mxu0 %v7959_v32 }
 0x31d   : > { %3097 = vmatpush.msra.mxu0 %v6587_v61  ;;  %3153 = vmatpush.msra.mxu1 %v6583_v33 }
 0x31e   : > { %2942 = vmatpush.msrb.mxu2 %v6601_v20  ;;  %3001 = vmatpush.msrb.mxu3 %v3000_v8  ;;  %v7889_v8 = vand.u32 4294901760, %v6680_v5 }
 0x31f   : > { %3100 = vmatpush.msra.mxu0 %v6599_v27  ;;  %3155 = vmatpush.msra.mxu1 %v6601_v20 }
 0x320   : > { %2944 = vmatpush.msrb.mxu2 %v6617_v48  ;;  %3007 = vmatpush.msrb.mxu3 %v3006_v22  ;;  %v3035_v22 = vsub.f32 %v6671_v29, %v7891_v21 }
 0x321   : > { %3103 = vmatpush.msra.mxu0 %v6615_v54  ;;  %3157 = vmatpush.msra.mxu1 %v6617_v48 }
 0x322   : > { %2946 = vmatpush.msrb.mxu2 %v6635_v28  ;;  %3013 = vmatpush.msrb.mxu3 %v3012_v24  ;;  %v3041_v24 = vsub.f32 %v6680_v5, %v7889_v8  ;;  %v3036_v30 = vand.u32 4294901760, %v3035_v22  ;;  %v6734_v22 = vsub.f32 %v5152_v34, %v6717_v14 }
 0x323   : > { %3106 = vmatpush.msra.mxu0 %v6633_v45  ;;  %3159 = vmatpush.msra.mxu1 %v6635_v28 }
 0x324   : > { %2908 = vmatmul.f32.gmra.mxu1 %v7955_v38  ;;  %2877 = vmatmul.f32.vlgmr.msrb.gmra.mxu0 %v5635_v18 }
 0x325   : > { %2948 = vmatpush.msrb.mxu2 %v6654_v2  ;;  %3109 = vmatpush.msra.mxu0 %v6652_v7 }
 0x326   : > { %3161 = vmatpush.msra.mxu1 %v6654_v2  ;;  %3019 = vmatpush.msrb.mxu3 %v3018_v35 }
 0x327   : > { %2950 = vmatpush.msrb.mxu2 %v6665_v1  ;;  %3112 = vmatpush.msra.mxu0 %v6671_v29 }
 0x328   : > { %3163 = vmatpush.msra.mxu1 %v6665_v1  ;;  %3025 = vmatpush.msrb.mxu3 %v3024_v25  ;;  %v3042_v25 = vand.u32 4294901760, %v3041_v24 }
 0x329   : > { %3115 = vmatpush.msra.mxu0 %v6680_v5 }
 0x32c   : > { %2881 = vmatmul.f32.gmra.mxu0 %v7955_v38 }
 0x351   : > { %v6526_v19 = vpop.f32.mrf.mxu1 }
 0x359   : > { %v2016_v40 = vpop.f32.mrf.mxu0  ;;  %v2183_v10 = vpop.f32.mrf.mxu2 }
 0x35a   : > { %v6594_v6 = vpop.f32.mrf.mxu1  ;;  %v2126_v3 = vadd.f32 %v6526_v19, %v2016_v40 }
 0x35b   : > { %v6596_v4 = vpop.f32.mrf.mxu3 }
 0x35c   : > { %v2184_v40 = vadd.f32 %v2183_v10, %v2126_v3  ;;  %v6682_v10 = vand.u32 4294901760, %v5154_v55  ;;  %v3030_v3 = vand.u32 4294901760, %v3029_v16 }
 0x35e   : > { %v6696_v49 = vsub.f32 %v5154_v55, %v6682_v10  ;;  %v2228_v17 = vadd.f32 %v6596_v4, %v2184_v40  ;;  %2952 = vmatpush.msrb.mxu2 %v6682_v10  ;;  %v6715_v4 = vsub.f32 %v5153_v63, %v6698_v52  ;;  %3165 = vmatpush.msra.mxu1 %v6682_v10  ;;  %v5151_v40 = vld [vmem:[%s7830_s5 + $0x108] sm:$0xff] }
 0x35f   : > { %3031 = vmatpush.msrb.mxu3 %v3030_v3  ;;  %v6736_v8 = vand.u32 4294901760, %v5151_v40 }
 0x360   : > { %v7890_v50 = vand.u32 4294901760, %v6696_v49  ;;  %2954 = vmatpush.msrb.mxu2 %v6698_v52  ;;  %v7892_v63 = vand.u32 4294901760, %v6715_v4  ;;  %3118 = vmatpush.msra.mxu0 %v6696_v49  ;;  %v7963_v54 = vand.u32 4294901760, %v6696_v49 }
 0x361   : > { %3167 = vmatpush.msra.mxu1 %v6698_v52  ;;  %3037 = vmatpush.msrb.mxu3 %v3036_v30  ;;  %v6751_v34 = vsub.f32 %v5151_v40, %v6736_v8 }
 0x362   : > { %v6660_v19 = vpop.f32.mrf.mxu2  ;;  %v3047_v16 = vsub.f32 %v6696_v49, %v7890_v50  ;;  %2956 = vmatpush.msrb.mxu2 %v6717_v14  ;;  %v3053_v21 = vsub.f32 %v6715_v4, %v7892_v63  ;;  %3121 = vmatpush.msra.mxu0 %v6715_v4 }
 0x363   : > { %v6639_v31 = vpop.f32.mrf.mxu0  ;;  %3169 = vmatpush.msra.mxu1 %v6717_v14  ;;  %3043 = vmatpush.msrb.mxu3 %v3042_v25  ;;  %v3064_v46 = vand.u32 4294901760, %v6751_v34 }
 0x364   : > { %v2343_v41 = vpop.f32.mrf.mxu1  ;;  %v2130_v3 = vadd.f32 %v6594_v6, %v6639_v31  ;;  %v3048_v50 = vand.u32 4294901760, %v3047_v16  ;;  %v3058_v31 = vand.u32 4294901760, %v6734_v22  ;;  %2958 = vmatpush.msrb.mxu2 %v6736_v8  ;;  %v3054_v16 = vand.u32 4294901760, %v3053_v21  ;;  %3124 = vmatpush.msra.mxu0 %v6734_v22 }
 0x365   : > { %v6677_v62 = vpop.f32.mrf.mxu3  ;;  %3171 = vmatpush.msra.mxu1 %v6736_v8 }
 0x366   : > { %v2189_v25 = vadd.f32 %v6660_v19, %v2130_v3  ;;  %3049 = vmatpush.msrb.mxu3 %v3048_v50  ;;  %v3059_v40 = vsub.f32 %v6734_v22, %v3058_v31  ;;  %3127 = vmatpush.msra.mxu0 %v6751_v34  ;;  %v3065_v19 = vsub.f32 %v6751_v34, %v3064_v46 }
 0x368   : > { %3055 = vmatpush.msrb.mxu3 %v3054_v16  ;;  %v2234_v57 = vadd.f32 %v6677_v62, %v2189_v25 }
 0x36d   : > { %v2302_v35 = vpop.f32.mrf.mxu0 }
 0x36e   : > { %v2303_v55 = vadd.f32 %v2302_v35, %v2228_v17  ;;  %v5150_v17 = vld [vmem:[%s7830_s5 + $0x100] sm:$0xff]  ;;  %v2388_v35 = vpop.f32.mrf.mxu2 }
 0x36f   : > { %v6745_v6 = vand.u32 4294901760, %v5150_v17 }
 0x370   : > { %v2344_v24 = vadd.f32 %v2343_v41, %v2303_v55  ;;  %v2347_v41 = vpop.f32.mrf.mxu1  ;;  %v2497_v55 = vpop.f32.mrf.mxu3 }
 0x371   : > { %v6755_v63 = vsub.f32 %v5150_v17, %v6745_v6  ;;  %2960 = vmatpush.msrb.mxu2 %v6745_v6  ;;  %v3060_v17 = vand.u32 4294901760, %v3059_v40  ;;  %3173 = vmatpush.msra.mxu1 %v6745_v6 }
 0x372   : > { %v2389_v30 = vadd.f32 %v2388_v35, %v2344_v24 }
 0x373   : > { %v3070_v21 = vand.u32 4294901760, %v6755_v63  ;;  %3190 = vmatpush.msra.mxu2 %v2980_v39  ;;  %3130 = vmatpush.msra.mxu0 %v6755_v63  ;;  %v3066_v39 = vand.u32 4294901760, %v3065_v19 }
 0x374   : > { %v2498_v24 = vadd.f32 %v2497_v55, %v2389_v30  ;;  %3061 = vmatpush.msrb.mxu3 %v3060_v17  ;;  %v3322_v17 = vld [vmem:[%s7832_s7 + $0x68] sm:$0xff] }
 0x375   : > { %v3071_v50 = vsub.f32 %v6755_v63, %v3070_v21  ;;  %3194 = vmatpush.msra.mxu2 %v2986_v11 }
 0x376   : > { %3067 = vmatpush.msrb.mxu3 %v3066_v39  ;;  %v2396_v55 = vpop.f32.mrf.mxu2 }
 0x377   : > { %v2306_v3 = vpop.f32.mrf.mxu0  ;;  %v3072_v35 = vand.u32 4294901760, %v3071_v50  ;;  %3198 = vmatpush.msra.mxu2 %v2992_v51 }
 0x378   : > { %v2307_v30 = vadd.f32 %v2306_v3, %v2234_v57  ;;  %v6845_v3 = vand.u32 4294901760, %v3322_v17 }
 0x379   : > { %3202 = vmatpush.msra.mxu2 %v2998_v23  ;;  %3073 = vmatpush.msrb.mxu3 %v3072_v35  ;;  %v2599_v56 = vpop.f32.mrf.mxu1  ;;  %v2501_v11 = vpop.f32.mrf.mxu3  ;;  %v3321_v35 = vld [vmem:[%s7832_s7 + $0x60] sm:$0xff] }
 0x37a   : > { %v2348_v16 = vadd.f32 %v2347_v41, %v2307_v30  ;;  %v3320_v30 = vld [vmem:[%s7832_s7 + $0x58] sm:$0xff] }
 0x37b   : > { %3261 = vmatpush.msra.mxu3 %v6521_v37  ;;  %3206 = vmatpush.msra.mxu2 %v3004_v53 }
 0x37c   : > { %v2397_v62 = vadd.f32 %v2396_v55, %v2348_v16  ;;  %v3319_v55 = vld [vmem:[%s7832_s7 + $0x50] sm:$0xff] }
 0x37d   : > { %3263 = vmatpush.msra.mxu3 %v6531_v13  ;;  %3210 = vmatpush.msra.mxu2 %v3010_v58  ;;  %v7960_v13 = vand.u32 4294901760, %v6652_v7 }
 0x37e   : > { %v2502_v60 = vadd.f32 %v2501_v11, %v2397_v62  ;;  %v6856_v11 = vand.u32 4294901760, %v3321_v35  ;;  %v6858_v62 = vand.u32 4294901760, %v3320_v30 }
 0x37f   : > { %3265 = vmatpush.msra.mxu3 %v6542_v59  ;;  %3214 = vmatpush.msra.mxu2 %v3016_v9  ;;  %v7961_v59 = vand.u32 4294901760, %v6671_v29 }
 0x381   : > { %v2555_v51 = vpop.f32.mrf.mxu0  ;;  %3267 = vmatpush.msra.mxu3 %v6557_v0  ;;  %3218 = vmatpush.msra.mxu2 %v3022_v42  ;;  %v2605_v61 = vpop.f32.mrf.mxu1  ;;  %v7962_v0 = vand.u32 4294901760, %v6680_v5 }
 0x382   : > { %v2556_v37 = vadd.f32 %v2555_v51, %v2498_v24  ;;  %v2674_v44 = vpop.f32.mrf.mxu2 }
 0x383   : > { %3269 = vmatpush.msra.mxu3 %v6574_v12  ;;  %3222 = vmatpush.msra.mxu2 %v7960_v13 }
 0x384   : > { %v2600_v23 = vadd.f32 %v2599_v56, %v2556_v37  ;;  %v6867_v37 = vsub.f32 %v3322_v17, %v6845_v3 }
 0x385   : > { %v2715_v27 = vpop.f32.mrf.mxu3  ;;  %3271 = vmatpush.msra.mxu3 %v6583_v33  ;;  %3226 = vmatpush.msra.mxu2 %v7961_v59  ;;  %v7964_v33 = vand.u32 4294901760, %v6715_v4 }
 0x386   : > { %v2675_v53 = vadd.f32 %v2674_v44, %v2600_v23  ;;  %v6871_v44 = vand.u32 4294901760, %v3319_v55 }
 0x387   : > { %3273 = vmatpush.msra.mxu3 %v6601_v20  ;;  %3230 = vmatpush.msra.mxu2 %v7962_v0  ;;  %v3392_v0 = vand.u32 4294901760, %v6867_v37 }
 0x388   : > { %v6805_v58 = vadd.f32 %v2715_v27, %v2675_v53  ;;  %v6877_v27 = vsub.f32 %v3320_v30, %v6858_v62 }
 0x389   : > { %v2560_v12 = vpop.f32.mrf.mxu0  ;;  %3275 = vmatpush.msra.mxu3 %v6617_v48  ;;  %3234 = vmatpush.msra.mxu2 %v7963_v54  ;;  %v2785_v20 = vpop.f32.mrf.mxu1  ;;  %v3318_v54 = vld [vmem:[%s7832_s7 + $0x48] sm:$0xff] }
 0x38a   : > { %v2561_v9 = vadd.f32 %v2560_v12, %v2502_v60  ;;  %v2678_v42 = vpop.f32.mrf.mxu2  ;;  %v6885_v12 = vsub.f32 %v3319_v55, %v6871_v44 }
 0x38b   : > { %3277 = vmatpush.msra.mxu3 %v6635_v28  ;;  %3238 = vmatpush.msra.mxu2 %v7964_v33 }
 0x38c   : > { %v2606_v45 = vadd.f32 %v2605_v61, %v2561_v9  ;;  %v6874_v61 = vsub.f32 %v3321_v35, %v6856_v11 }
 0x38d   : > { %3279 = vmatpush.msra.mxu3 %v6654_v2  ;;  %3242 = vmatpush.msra.mxu2 %v3058_v31  ;;  %v2719_v29 = vpop.f32.mrf.mxu3 }
 0x38e   : > { %v2679_v7 = vadd.f32 %v2678_v42, %v2606_v45  ;;  %v3398_v45 = vand.u32 4294901760, %v6874_v61  ;;  %v3404_v42 = vand.u32 4294901760, %v6877_v27 }
 0x38f   : > { %3281 = vmatpush.msra.mxu3 %v6665_v1  ;;  %3246 = vmatpush.msra.mxu2 %v3064_v46 }
 0x390   : > { %v6819_v48 = vadd.f32 %v2719_v29, %v2679_v7  ;;  %v3393_v29 = vsub.f32 %v6867_v37, %v3392_v0 }
 0x391   : > { %v2746_v28 = vpop.f32.mrf.mxu0  ;;  %3283 = vmatpush.msra.mxu3 %v6682_v10  ;;  %3250 = vmatpush.msra.mxu2 %v3070_v21  ;;  %v2789_v5 = vpop.f32.mrf.mxu1  ;;  %v3323_v21 = vld [vmem:[%s7832_s7 + $0x70] sm:$0xff] }
 0x392   : > { %v2815_v2 = vpop.f32.mrf.mxu2  ;;  %v2786_v1 = vadd.f32 %v2785_v20, %v2746_v28  ;;  %v6843_v39 = vand.u32 4294901760, %v3323_v21 }
 0x393   : > { %3285 = vmatpush.msra.mxu3 %v6698_v52 }
 0x394   : > { %v2816_v4 = vadd.f32 %v2815_v2, %v2786_v1  ;;  %v6864_v51 = vsub.f32 %v3323_v21, %v6843_v39  ;;  %v3410_v2 = vand.u32 4294901760, %v6885_v12  ;;  %v3317_v1 = vld [vmem:[%s7832_s7 + $0x40] sm:$0xff] }
 0x395   : > { %3287 = vmatpush.msra.mxu3 %v6717_v14  ;;  %v2845_v46 = vpop.f32.mrf.mxu3 }
 0x396   : > { %v2846_v31 = vadd.f32 %v2845_v46, %v2816_v4  ;;  %v3386_v53 = vand.u32 4294901760, %v6864_v51  ;;  %v3315_v46 = vld [vmem:[%s7832_s7 + $0x30] sm:$0xff] }
 0x397   : > { %3289 = vmatpush.msra.mxu3 %v6736_v8 }
 0x398   : > { %v3387_v7 = vsub.f32 %v6864_v51, %v3386_v53 }
 0x399   : > { %v2754_v49 = vpop.f32.mrf.mxu0  ;;  %3291 = vmatpush.msra.mxu3 %v6745_v6  ;;  %v2905_v22 = vpop.f32.mrf.mxu1  ;;  %v3324_v6 = vld [vmem:[%s7832_s7 + $0x78] sm:$0xff] }
 0x39a   : > { %v2790_v10 = vadd.f32 %v2789_v5, %v2754_v49  ;;  %v2820_v34 = vpop.f32.mrf.mxu2  ;;  %v6841_v57 = vand.u32 4294901760, %v3324_v6  ;;  %v6908_v5 = vand.u32 4294901760, %v3318_v54  ;;  %v3316_v49 = vld [vmem:[%s7832_s7 + $0x38] sm:$0xff] }
 0x39c   : > { %v2821_v25 = vadd.f32 %v2820_v34, %v2790_v10  ;;  %v6861_v60 = vsub.f32 %v3324_v6, %v6841_v57  ;;  %3330 = vmatpush.msrb.mxu0 %v6841_v57  ;;  %v3314_v10 = vld [vmem:[%s7832_s7 + $0x28] sm:$0xff]  ;;  %v3411_v6 = vsub.f32 %v6885_v12, %v3410_v2 }
 0x39d   : > { %v2851_v40 = vpop.f32.mrf.mxu3  ;;  %v6945_v17 = vand.u32 4294901760, %v3314_v10 }
 0x39e   : > { %v2852_v24 = vadd.f32 %v2851_v40, %v2821_v25  ;;  %v3380_v59 = vand.u32 4294901760, %v6861_v60  ;;  %3332 = vmatpush.msrb.mxu0 %v6843_v39  ;;  %v3394_v25 = vand.u32 4294901760, %v3393_v29  ;;  %v6936_v40 = vand.u32 4294901760, %v3316_v49 }
 0x3a0   : > { %v3381_v20 = vsub.f32 %v6861_v60, %v3380_v59  ;;  %3334 = vmatpush.msrb.mxu0 %v6845_v3  ;;  %v6952_v35 = vsub.f32 %v3316_v49, %v6936_v40 }
 0x3a1   : > { %v2878_v63 = vpop.f32.mrf.mxu0  ;;  %v2909_v50 = vpop.f32.mrf.mxu1 }
 0x3a2   : > { %v2879_v41 = vadd.f32 %v2878_v63, %v2846_v31  ;;  %v3382_v4 = vand.u32 4294901760, %v3381_v20  ;;  %v3399_v31 = vsub.f32 %v6874_v61, %v3398_v45  ;;  %v3405_v63 = vsub.f32 %v6877_v27, %v3404_v42  ;;  %3336 = vmatpush.msrb.mxu0 %v6856_v11 }
 0x3a4   : > { %v2906_v52 = vadd.f32 %v2905_v22, %v2879_v41  ;;  %v3388_v22 = vand.u32 4294901760, %v3387_v7  ;;  %v6931_v41 = vsub.f32 %v3318_v54, %v6908_v5  ;;  %3383 = vmatpush.msrb.mxu1 %v3382_v4  ;;  %v6966_v54 = vsub.f32 %v3314_v10, %v6945_v17  ;;  %3338 = vmatpush.msrb.mxu0 %v6858_v62 }
 0x3a6   : > { %v6828_v14 = vand.u32 4294901760, %v2906_v52  ;;  %v3416_v21 = vand.u32 4294901760, %v6931_v41  ;;  %3389 = vmatpush.msrb.mxu1 %v3388_v22  ;;  %3340 = vmatpush.msrb.mxu0 %v6871_v44 }
 0x3a8   : > { %v2962_v8 = vsub.f32 %v2906_v52, %v6828_v14  ;;  %3075 = vmatmul.f32.vlgmr.msrb.gmra.mxu3 %v6828_v14  ;;  %v6934_v52 = vand.u32 4294901760, %v3317_v1  ;;  %3395 = vmatpush.msrb.mxu1 %v3394_v25 }
 0x3a9   : > { %v2882_v19 = vpop.f32.mrf.mxu0  ;;  %3543 = vmatpush.msrb.mxu3 %v6841_v57  ;;  %3342 = vmatpush.msrb.mxu0 %v6908_v5 }
 0x3aa   : > { %v2963_v16 = vand.u32 4294901760, %v2962_v8  ;;  %v2883_v56 = vadd.f32 %v2882_v19, %v2852_v24  ;;  %3133 = vmatmul.f32.vlgmr.msra.gmra.mxu0 %v2962_v8  ;;  %v6938_v24 = vand.u32 4294901760, %v3315_v46  ;;  %v3400_v19 = vand.u32 4294901760, %v3399_v31 }
 0x3ab   : > { %3545 = vmatpush.msrb.mxu3 %v6843_v39  ;;  %3344 = vmatpush.msrb.mxu0 %v6934_v52 }
 0x3ac   : > { %v2964_v13 = vsub.f32 %v2962_v8, %v2963_v16  ;;  %v2910_v23 = vadd.f32 %v2909_v50, %v2883_v56  ;;  %3177 = vmatmul.f32.vlgmr.msra.gmra.mxu1 %v2963_v16  ;;  %v6949_v50 = vsub.f32 %v3317_v1, %v6934_v52  ;;  %v6955_v30 = vsub.f32 %v3315_v46, %v6938_v24 }
 0x3ad   : > { %3547 = vmatpush.msrb.mxu3 %v6845_v3  ;;  %v3406_v16 = vand.u32 4294901760, %v3405_v63  ;;  %v3417_v56 = vsub.f32 %v6931_v41, %v3416_v21  ;;  %3401 = vmatpush.msrb.mxu1 %v3400_v19  ;;  %v3440_v1 = vand.u32 4294901760, %v6966_v54  ;;  %v3312_v63 = vld [vmem:[%s7832_s7 + $0x18] sm:$0xff] }
 0x3ae   : > { %v2965_v9 = vand.u32 4294901760, %v2964_v13  ;;  %v6890_v33 = vand.u32 4294901760, %v2910_v23  ;;  %v3422_v13 = vand.u32 4294901760, %v6949_v50  ;;  %v3434_v7 = vand.u32 4294901760, %v6955_v30  ;;  %3346 = vmatpush.msrb.mxu0 %v6936_v40 }
 0x3af   : > { %3549 = vmatpush.msrb.mxu3 %v6856_v11  ;;  %3407 = vmatpush.msrb.mxu1 %v3406_v16  ;;  %v3418_v29 = vand.u32 4294901760, %v3417_v56  ;;  %v3441_v22 = vsub.f32 %v6966_v54, %v3440_v1  ;;  %v3310_v16 = vld [vmem:[%s7832_s7 + $0x8] sm:$0xff] }
 0x3b0   : > { %v2970_v28 = vsub.f32 %v2910_v23, %v6890_v33  ;;  %2966 = vmatmul.f32.vlgmr.msrb.gmra.mxu2 %v2965_v9  ;;  %3079 = vmatmul.f32.gmra.mxu3 %v6890_v33  ;;  %v3428_v23 = vand.u32 4294901760, %v6952_v35  ;;  %v3412_v9 = vand.u32 4294901760, %v3411_v6  ;;  %v3423_v20 = vsub.f32 %v6949_v50, %v3422_v13 }
 0x3b1   : > { %3485 = vmatpush.msrb.mxu2 %v6861_v60  ;;  %3551 = vmatpush.msrb.mxu3 %v6858_v62  ;;  %v3435_v46 = vsub.f32 %v6955_v30, %v3434_v7  ;;  %v3442_v10 = vand.u32 4294901760, %v3441_v22 }
 0x3b2   : > { %3138 = vmatmul.f32.gmra.mxu0 %v2970_v28  ;;  %v2971_v34 = vand.u32 4294901760, %v2970_v28  ;;  %3413 = vmatpush.msrb.mxu1 %v3412_v9  ;;  %v3424_v49 = vand.u32 4294901760, %v3423_v20 }
 0x3b3   : > { %3488 = vmatpush.msrb.mxu2 %v6864_v51  ;;  %3553 = vmatpush.msrb.mxu3 %v6871_v44  ;;  %v3436_v31 = vand.u32 4294901760, %v3435_v46 }
 0x3b4   : > { %3183 = vmatmul.f32.gmra.mxu1 %v2971_v34  ;;  %v2972_v8 = vsub.f32 %v2970_v28, %v2971_v34  ;;  %v3429_v28 = vsub.f32 %v6952_v35, %v3428_v23  ;;  %3348 = vmatpush.msrb.mxu0 %v6938_v24 }
 0x3b5   : > { %3491 = vmatpush.msrb.mxu2 %v6867_v37  ;;  %3555 = vmatpush.msrb.mxu3 %v6908_v5 }
 0x3b6   : > { %v2973_v55 = vand.u32 4294901760, %v2972_v8  ;;  %3419 = vmatpush.msrb.mxu1 %v3418_v29  ;;  %v3430_v4 = vand.u32 4294901760, %v3429_v28  ;;  %3350 = vmatpush.msrb.mxu0 %v6945_v17  ;;  %v7016_v8 = vand.u32 4294901760, %v3312_v63  ;;  %v7043_v29 = vand.u32 4294901760, %v3310_v16  ;;  %v3309_v28 = vld [vmem:[%s7832_s7] sm:$0xff] }
 0x3b7   : > { %3494 = vmatpush.msrb.mxu2 %v6874_v61  ;;  %3557 = vmatpush.msrb.mxu3 %v6934_v52  ;;  %v3712_v61 = vld [vmem:[%s7833_s8 + $0x58] sm:$0xff] }
 0x3b8   : > { %2974 = vmatmul.f32.gmra.mxu2 %v2973_v55  ;;  %3293 = vmatmul.f32.vlgmr.msra.gmra.mxu3 %v6828_v14  ;;  %v7025_v19 = vsub.f32 %v3312_v63, %v7016_v8  ;;  %v7055_v22 = vsub.f32 %v3310_v16, %v7043_v29 }
 0x3b9   : > { %3497 = vmatpush.msrb.mxu2 %v6877_v27  ;;  %3559 = vmatpush.msrb.mxu3 %v6936_v40  ;;  %v3711_v27 = vld [vmem:[%s7833_s8 + $0x50] sm:$0xff] }
 0x3ba   : > { %3425 = vmatpush.msrb.mxu1 %v3424_v49  ;;  %v3452_v9 = vand.u32 4294901760, %v7025_v19  ;;  %v7894_v63 = vand.u32 4294901760, %v7055_v22 }
 0x3bb   : > { %3500 = vmatpush.msrb.mxu2 %v6885_v12  ;;  %3561 = vmatpush.msrb.mxu3 %v6938_v24  ;;  %v3710_v12 = vld [vmem:[%s7833_s8 + $0x48] sm:$0xff] }
 0x3bc   : > { %3431 = vmatpush.msrb.mxu1 %v3430_v4  ;;  %v3453_v46 = vsub.f32 %v7025_v19, %v3452_v9 }
 0x3bd   : > { %3503 = vmatpush.msrb.mxu2 %v6931_v41  ;;  %3563 = vmatpush.msrb.mxu3 %v6945_v17  ;;  %v3709_v41 = vld [vmem:[%s7833_s8 + $0x40] sm:$0xff] }
 0x3be   : > { %3437 = vmatpush.msrb.mxu1 %v3436_v31  ;;  %v7059_v31 = vand.u32 4294901760, %v3309_v28 }
 0x3bf   : > { %3506 = vmatpush.msrb.mxu2 %v6949_v50  ;;  %v3708_v50 = vld [vmem:[%s7833_s8 + $0x38] sm:$0xff] }
 0x3c0   : > { %3252 = vmatmul.f32.vlgmr.msra.gmra.mxu2 %v6828_v14  ;;  %3297 = vmatmul.f32.gmra.mxu3 %v6890_v33  ;;  %v3313_v14 = vld [vmem:[%s7832_s7 + $0x20] sm:$0xff] }
 0x3c1   : > { %3509 = vmatpush.msrb.mxu2 %v6952_v35  ;;  %3443 = vmatpush.msrb.mxu1 %v3442_v10  ;;  %v7008_v34 = vand.u32 4294901760, %v3313_v14  ;;  %v3454_v10 = vand.u32 4294901760, %v3453_v46  ;;  %v3707_v35 = vld [vmem:[%s7833_s8 + $0x30] sm:$0xff] }
 0x3c3   : > { %3512 = vmatpush.msrb.mxu2 %v6955_v30  ;;  %v7014_v25 = vsub.f32 %v3313_v14, %v7008_v34  ;;  %3565 = vmatpush.msrb.mxu3 %v7008_v34  ;;  %v3705_v30 = vld [vmem:[%s7833_s8 + $0x20] sm:$0xff] }
 0x3c4   : > { %3352 = vmatpush.msrb.mxu0 %v7008_v34 }
 0x3c5   : > { %3515 = vmatpush.msrb.mxu2 %v6966_v54  ;;  %v3446_v6 = vand.u32 4294901760, %v7014_v25  ;;  %3567 = vmatpush.msrb.mxu3 %v7016_v8 }
 0x3c6   : > { %3354 = vmatpush.msrb.mxu0 %v7016_v8 }
 0x3c7   : > { %3518 = vmatpush.msrb.mxu2 %v7014_v25  ;;  %v3447_v56 = vsub.f32 %v7014_v25, %v3446_v6  ;;  %v3703_v25 = vld [vmem:[%s7833_s8 + $0x10] sm:$0xff] }
 0x3c8   : > { %3256 = vmatmul.f32.gmra.mxu2 %v6890_v33  ;;  %v3311_v33 = vld [vmem:[%s7832_s7 + $0x10] sm:$0xff] }
 0x3c9   : > { %v7028_v55 = vand.u32 4294901760, %v3311_v33  ;;  %3521 = vmatpush.msrb.mxu2 %v7025_v19  ;;  %v3448_v49 = vand.u32 4294901760, %v3447_v56  ;;  %v3465_v56 = vsub.f32 %v7055_v22, %v7894_v63 }
 0x3cb   : > { %v7040_v20 = vsub.f32 %v3311_v33, %v7028_v55  ;;  %3569 = vmatpush.msrb.mxu3 %v7028_v55  ;;  %3356 = vmatpush.msrb.mxu0 %v7028_v55  ;;  %v7068_v33 = vsub.f32 %v3309_v28, %v7059_v31 }
 0x3cc   : > { %3449 = vmatpush.msrb.mxu1 %v3448_v49  ;;  %v3716_v49 = vld [vmem:[%s7833_s8 + $0x78] sm:$0xff] }
 0x3cd   : > { %v3458_v4 = vand.u32 4294901760, %v7040_v20  ;;  %3524 = vmatpush.msrb.mxu2 %v7040_v20  ;;  %3571 = vmatpush.msrb.mxu3 %v7043_v29  ;;  %v3470_v28 = vand.u32 4294901760, %v7068_v33  ;;  %v7082_v46 = vand.u32 4294901760, %v3716_v49 }
 0x3ce   : > { %3358 = vmatpush.msrb.mxu0 %v7043_v29  ;;  %3455 = vmatpush.msrb.mxu1 %v3454_v10  ;;  %v3466_v10 = vand.u32 4294901760, %v3465_v56 }
 0x3cf   : > { %v3459_v14 = vsub.f32 %v7040_v20, %v3458_v4  ;;  %3527 = vmatpush.msrb.mxu2 %v7055_v22  ;;  %3573 = vmatpush.msrb.mxu3 %v7059_v31  ;;  %v3471_v60 = vsub.f32 %v7068_v33, %v3470_v28  ;;  %v7965_v20 = vand.u32 4294901760, %v7055_v22 }
 0x3d0   : > { %3360 = vmatpush.msrb.mxu0 %v7059_v31 }
 0x3d1   : > { %v3460_v16 = vand.u32 4294901760, %v3459_v14  ;;  %3530 = vmatpush.msrb.mxu2 %v7068_v33  ;;  %v3715_v14 = vld [vmem:[%s7833_s8 + $0x70] sm:$0xff]  ;;  %v3472_v51 = vand.u32 4294901760, %v3471_v60 }
 0x3d2   : > { %3590 = vmatpush.msra.mxu0 %v3380_v59  ;;  %v7094_v59 = vsub.f32 %v3716_v49, %v7082_v46  ;;  %v7096_v63 = vand.u32 4294901760, %v3715_v14 }
 0x3d3   : > { %3461 = vmatpush.msrb.mxu1 %v3460_v16  ;;  %3722 = vmatpush.msra.mxu2 %v7082_v46  ;;  %v3714_v16 = vld [vmem:[%s7833_s8 + $0x68] sm:$0xff] }
 0x3d4   : > { %3594 = vmatpush.msra.mxu0 %v3386_v53  ;;  %v7895_v53 = vand.u32 4294901760, %v7094_v59  ;;  %v7105_v56 = vand.u32 4294901760, %v3714_v16  ;;  %v7108_v49 = vsub.f32 %v3715_v14, %v7096_v63 }
 0x3d5   : > { %3467 = vmatpush.msrb.mxu1 %v3466_v10  ;;  %3724 = vmatpush.msra.mxu2 %v7096_v63  ;;  %v3713_v10 = vld [vmem:[%s7833_s8 + $0x60] sm:$0xff] }
 0x3d6   : > { %3598 = vmatpush.msra.mxu0 %v3392_v0  ;;  %v3773_v37 = vsub.f32 %v7094_v59, %v7895_v53  ;;  %v7896_v0 = vand.u32 4294901760, %v7108_v49  ;;  %v7120_v60 = vand.u32 4294901760, %v3713_v10  ;;  %v7123_v14 = vsub.f32 %v3714_v16, %v7105_v56 }
 0x3d7   : > { %3473 = vmatpush.msrb.mxu1 %v3472_v51  ;;  %3726 = vmatpush.msra.mxu2 %v7105_v56  ;;  %v7136_v16 = vand.u32 4294901760, %v3712_v61 }
 0x3d8   : > { %3602 = vmatpush.msra.mxu0 %v3398_v45  ;;  %v3774_v45 = vand.u32 4294901760, %v3773_v37  ;;  %v3779_v51 = vsub.f32 %v7108_v49, %v7896_v0  ;;  %v3784_v53 = vand.u32 4294901760, %v7123_v14  ;;  %v7151_v0 = vand.u32 4294901760, %v3711_v27 }
 0x3d9   : > { %3661 = vmatpush.msra.mxu1 %v6841_v57  ;;  %3728 = vmatpush.msra.mxu2 %v7120_v60  ;;  %v7140_v57 = vsub.f32 %v3713_v10, %v7120_v60 }
 0x3da   : > { %3606 = vmatpush.msra.mxu0 %v3404_v42  ;;  %3775 = vmatpush.msra.mxu3 %v3774_v45  ;;  %v3780_v42 = vand.u32 4294901760, %v3779_v51  ;;  %v3785_v37 = vsub.f32 %v7123_v14, %v3784_v53  ;;  %v7165_v51 = vand.u32 4294901760, %v3710_v12 }
 0x3db   : > { %3663 = vmatpush.msra.mxu1 %v6843_v39  ;;  %3730 = vmatpush.msra.mxu2 %v7136_v16  ;;  %v7154_v39 = vsub.f32 %v3712_v61, %v7136_v16  ;;  %v7909_v10 = vand.u32 4294901760, %v7140_v57  ;;  %v7168_v61 = vsub.f32 %v3711_v27, %v7151_v0  ;;  %v7184_v27 = vand.u32 4294901760, %v3709_v41 }
 0x3dc   : > { %3610 = vmatpush.msra.mxu0 %v3410_v2  ;;  %3781 = vmatpush.msra.mxu3 %v3780_v42  ;;  %v3786_v2 = vand.u32 4294901760, %v3785_v37  ;;  %v7187_v42 = vsub.f32 %v3710_v12, %v7165_v51 }
 0x3dd   : > { %3665 = vmatpush.msra.mxu1 %v6845_v3  ;;  %3732 = vmatpush.msra.mxu2 %v7151_v0  ;;  %v7897_v45 = vand.u32 4294901760, %v7154_v39  ;;  %v3791_v3 = vsub.f32 %v7140_v57, %v7909_v10 }
 0x3de   : > { %3614 = vmatpush.msra.mxu0 %v3416_v21  ;;  %3787 = vmatpush.msra.mxu3 %v3786_v2  ;;  %v7899_v12 = vand.u32 4294901760, %v7187_v42 }
 0x3df   : > { %3667 = vmatpush.msra.mxu1 %v6856_v11  ;;  %v3797_v21 = vsub.f32 %v7154_v39, %v7897_v45  ;;  %3734 = vmatpush.msra.mxu2 %v7165_v51  ;;  %v7898_v11 = vand.u32 4294901760, %v7168_v61  ;;  %v3792_v37 = vand.u32 4294901760, %v3791_v3  ;;  %v7200_v45 = vand.u32 4294901760, %v3708_v50 }
 0x3e0   : > { %3618 = vmatpush.msra.mxu0 %v3422_v13  ;;  %v3809_v3 = vsub.f32 %v7187_v42, %v7899_v12 }
 0x3e1   : > { %3669 = vmatpush.msra.mxu1 %v6858_v62  ;;  %v3798_v13 = vand.u32 4294901760, %v3797_v21  ;;  %v3803_v2 = vsub.f32 %v7168_v61, %v7898_v11  ;;  %3736 = vmatpush.msra.mxu2 %v7184_v27  ;;  %v7204_v62 = vsub.f32 %v3709_v41, %v7184_v27  ;;  %v7213_v21 = vand.u32 4294901760, %v3707_v35  ;;  %v3706_v41 = vld [vmem:[%s7833_s8 + $0x28] sm:$0xff] }
 0x3e2   : > { %3622 = vmatpush.msra.mxu0 %v3428_v23  ;;  %3793 = vmatpush.msra.mxu3 %v3792_v37  ;;  %v7216_v11 = vsub.f32 %v3708_v50, %v7200_v45  ;;  %v3810_v37 = vand.u32 4294901760, %v3809_v3  ;;  %v7227_v12 = vand.u32 4294901760, %v3706_v41 }
 0x3e3   : > { %3671 = vmatpush.msra.mxu1 %v6871_v44  ;;  %v3804_v23 = vand.u32 4294901760, %v3803_v2  ;;  %3738 = vmatpush.msra.mxu2 %v7200_v45  ;;  %v7907_v44 = vand.u32 4294901760, %v7204_v62  ;;  %v7230_v50 = vsub.f32 %v3707_v35, %v7213_v21  ;;  %v3704_v35 = vld [vmem:[%s7833_s8 + $0x18] sm:$0xff] }
 0x3e4   : > { %3626 = vmatpush.msra.mxu0 %v3434_v7  ;;  %3799 = vmatpush.msra.mxu3 %v3798_v13  ;;  %v7900_v2 = vand.u32 4294901760, %v7216_v11 }
 0x3e5   : > { %3673 = vmatpush.msra.mxu1 %v6908_v5  ;;  %3740 = vmatpush.msra.mxu2 %v7213_v21  ;;  %v3815_v5 = vsub.f32 %v7204_v62, %v7907_v44  ;;  %v7906_v54 = vand.u32 4294901760, %v7230_v50 }
 0x3e6   : > { %3630 = vmatpush.msra.mxu0 %v3440_v1  ;;  %3805 = vmatpush.msra.mxu3 %v3804_v23  ;;  %v3821_v7 = vsub.f32 %v7216_v11, %v7900_v2  ;;  %v7246_v1 = vand.u32 4294901760, %v3705_v30  ;;  %v7262_v2 = vand.u32 4294901760, %v3704_v35 }
 0x3e7   : > { %3675 = vmatpush.msra.mxu1 %v6934_v52  ;;  %3742 = vmatpush.msra.mxu2 %v7227_v12  ;;  %v7249_v52 = vsub.f32 %v3706_v41, %v7227_v12  ;;  %v3816_v13 = vand.u32 4294901760, %v3815_v5  ;;  %v3827_v3 = vsub.f32 %v7230_v50, %v7906_v54  ;;  %v7277_v5 = vand.u32 4294901760, %v3703_v25 }
 0x3e8   : > { %3634 = vmatpush.msra.mxu0 %v3446_v6  ;;  %3811 = vmatpush.msra.mxu3 %v3810_v37  ;;  %v3822_v23 = vand.u32 4294901760, %v3821_v7  ;;  %v7280_v19 = vsub.f32 %v3704_v35, %v7262_v2 }
 0x3e9   : > { %3677 = vmatpush.msra.mxu1 %v6936_v40  ;;  %3744 = vmatpush.msra.mxu2 %v7246_v1  ;;  %v7905_v41 = vand.u32 4294901760, %v7249_v52  ;;  %v7268_v40 = vsub.f32 %v3705_v30, %v7246_v1  ;;  %v3828_v6 = vand.u32 4294901760, %v3827_v3  ;;  %v7294_v35 = vsub.f32 %v3703_v25, %v7277_v5 }
 0x3ea   : > { %3638 = vmatpush.msra.mxu0 %v3452_v9  ;;  %3817 = vmatpush.msra.mxu3 %v3816_v13  ;;  %v3702_v9 = vld [vmem:[%s7833_s8 + $0x8] sm:$0xff]  ;;  %v7901_v7 = vand.u32 4294901760, %v7280_v19 }
 0x3eb   : > { %3679 = vmatpush.msra.mxu1 %v6938_v24  ;;  %v3833_v37 = vsub.f32 %v7249_v52, %v7905_v41  ;;  %3746 = vmatpush.msra.mxu2 %v7262_v2  ;;  %v7904_v24 = vand.u32 4294901760, %v7268_v40  ;;  %v7291_v13 = vand.u32 4294901760, %v3702_v9  ;;  %v7903_v22 = vand.u32 4294901760, %v7294_v35 }
 0x3ec   : > { %3642 = vmatpush.msra.mxu0 %v3458_v4  ;;  %3823 = vmatpush.msra.mxu3 %v3822_v23  ;;  %v3701_v4 = vld [vmem:[%s7833_s8] sm:$0xff]  ;;  %v3845_v23 = vsub.f32 %v7280_v19, %v7901_v7 }
 0x3ed   : > { %3681 = vmatpush.msra.mxu1 %v6945_v17  ;;  %v3834_v30 = vand.u32 4294901760, %v3833_v37  ;;  %3748 = vmatpush.msra.mxu2 %v7277_v5  ;;  %v3839_v17 = vsub.f32 %v7268_v40, %v7904_v24  ;;  %v7310_v3 = vand.u32 4294901760, %v3701_v4  ;;  %v3851_v37 = vsub.f32 %v7294_v35, %v7903_v22 }
 0x3ee   : > { %3646 = vmatpush.msra.mxu0 %v7965_v20  ;;  %3829 = vmatpush.msra.mxu3 %v3828_v6  ;;  %v3846_v6 = vand.u32 4294901760, %v3845_v23 }
 0x3ef   : > { %3683 = vmatpush.msra.mxu1 %v7008_v34  ;;  %3750 = vmatpush.msra.mxu2 %v7291_v13  ;;  %v7313_v34 = vsub.f32 %v3702_v9, %v7291_v13  ;;  %v3840_v25 = vand.u32 4294901760, %v3839_v17  ;;  %v7324_v7 = vsub.f32 %v3701_v4, %v7310_v3  ;;  %v3852_v33 = vand.u32 4294901760, %v3851_v37 }
 0x3f0   : > { %3650 = vmatpush.msra.mxu0 %v3470_v28  ;;  %3835 = vmatpush.msra.mxu3 %v3834_v30 }
 0x3f1   : > { %3685 = vmatpush.msra.mxu1 %v7016_v8  ;;  %3752 = vmatpush.msra.mxu2 %v7310_v3  ;;  %v7902_v20 = vand.u32 4294901760, %v7313_v34  ;;  %v7908_v28 = vand.u32 4294901760, %v7324_v7 }
 0x3f2   : > { %3841 = vmatpush.msra.mxu3 %v3840_v25 }
 0x3f3   : > { %3687 = vmatpush.msra.mxu1 %v7028_v55  ;;  %v3857_v8 = vsub.f32 %v7313_v34, %v7902_v20  ;;  %v3863_v17 = vsub.f32 %v7324_v7, %v7908_v28 }
 0x3f4   : > { %3847 = vmatpush.msra.mxu3 %v3846_v6 }
 0x3f5   : > { %3689 = vmatpush.msra.mxu1 %v7043_v29  ;;  %v3858_v30 = vand.u32 4294901760, %v3857_v8  ;;  %v3864_v55 = vand.u32 4294901760, %v3863_v17 }
 0x3f6   : > { %3853 = vmatpush.msra.mxu3 %v3852_v33 }
 0x3f7   : > { %3691 = vmatpush.msra.mxu1 %v7059_v31  ;;  %v5180_v31 = vld [vmem:[%s7831_s6] ss:$0 sm:$0xff] }
 0x3f8   : > { %3859 = vmatpush.msra.mxu3 %v3858_v30 }
 0x3fa   : > { %3865 = vmatpush.msra.mxu3 %v3864_v55 }
 0x427   : > { %v3134_v37 = vpop.f32.mrf.mxu0 }
 0x429   : > { %v3178_v29 = vpop.f32.mrf.mxu1 }
 0x42b   : > { %v3076_v9 = vpop.f32.mrf.mxu3 }
 0x42f   : > { %v3139_v44 = vpop.f32.mrf.mxu0 }
 0x431   : > { %v3184_v30 = vpop.f32.mrf.mxu1 }
 0x433   : > { %v2967_v4 = vpop.f32.mrf.mxu2  ;;  %v3080_v23 = vpop.f32.mrf.mxu3 }
 0x434   : > { %v3077_v25 = vadd.f32 %v3076_v9, %v2967_v4 }
 0x436   : > { %v3135_v22 = vadd.f32 %v3134_v37, %v3077_v25 }
 0x438   : > { %v3179_v24 = vadd.f32 %v3178_v29, %v3135_v22 }
 0x43b   : > { %v2975_v20 = vpop.f32.mrf.mxu2  ;;  %v3294_v8 = vpop.f32.mrf.mxu3 }
 0x43c   : > { %v3081_v6 = vadd.f32 %v3080_v23, %v2975_v20 }
 0x43e   : > { %v3140_v28 = vadd.f32 %v3139_v44, %v3081_v6 }
 0x440   : > { %v3185_v17 = vadd.f32 %v3184_v30, %v3140_v28 }
 0x443   : > { %v3253_v41 = vpop.f32.mrf.mxu2  ;;  %v3298_v4 = vpop.f32.mrf.mxu3 }
 0x444   : > { %v3254_v54 = vadd.f32 %v3253_v41, %v3179_v24  ;;  %v7966_v41 = vand.u32 4294901760, %v7094_v59 }
 0x446   : > { %v3295_v10 = vadd.f32 %v3294_v8, %v3254_v54 }
 0x448   : > { %v3301_v33 = vadd.f32 %v3295_v10, %v6805_v58 }
 0x44a   : > { %v7340_v9 = vadd.f32 %v5180_v31, %v3301_v33 }
 0x44b   : > { %v3257_v55 = vpop.f32.mrf.mxu2 }
 0x44c   : > { %v7343_v20 = vand.u32 4294901760, %v7340_v9  ;;  %v3258_v22 = vadd.f32 %v3257_v55, %v3185_v17 }
 0x44e   : > { %v7347_v44 = vsub.f32 %v7340_v9, %v7343_v20  ;;  %v3299_v54 = vadd.f32 %v3298_v4, %v3258_v22  ;;  %3475 = vmatmul.f32.vlgmr.msrb.gmra.mxu1 %v7343_v20 }
 0x44f   : > { %3935 = vmatpush.msrb.mxu1 %v7082_v46 }
 0x450   : > { %v3302_v58 = vadd.f32 %v3299_v54, %v6819_v48  ;;  %3533 = vmatmul.f32.vlgmr.msrb.gmra.mxu2 %v7347_v44  ;;  %v7354_v10 = vand.u32 4294901760, %v7347_v44  ;;  %v7967_v48 = vand.u32 4294901760, %v7108_v49 }
 0x451   : > { %3937 = vmatpush.msrb.mxu1 %v7096_v63  ;;  %3982 = vmatpush.msrb.mxu2 %v7966_v41 }
 0x452   : > { %v7359_v24 = vadd.f32 %v5180_v31, %v3302_v58  ;;  %3577 = vmatmul.f32.vlgmr.msrb.gmra.mxu3 %v7354_v10  ;;  %v3364_v28 = vsub.f32 %v7347_v44, %v7354_v10 }
 0x453   : > { %3939 = vmatpush.msrb.mxu1 %v7105_v56  ;;  %3986 = vmatpush.msrb.mxu2 %v7967_v48 }
 0x454   : > { %v7368_v23 = vand.u32 4294901760, %v7359_v24  ;;  %4053 = vmatpush.msrb.mxu3 %v7082_v46  ;;  %v3365_v25 = vand.u32 4294901760, %v3364_v28  ;;  %v7968_v46 = vand.u32 4294901760, %v7140_v57 }
 0x455   : > { %3941 = vmatpush.msrb.mxu1 %v7120_v60  ;;  %3990 = vmatpush.msrb.mxu2 %v3784_v53 }
 0x456   : > { %4055 = vmatpush.msrb.mxu3 %v7096_v63  ;;  %3366 = vmatmul.f32.vlgmr.msrb.gmra.mxu0 %v3365_v25  ;;  %v7377_v37 = vsub.f32 %v7359_v24, %v7368_v23 }
 0x457   : > { %3479 = vmatmul.f32.gmra.mxu1 %v7368_v23  ;;  %3877 = vmatpush.msrb.mxu0 %v7094_v59  ;;  %v7969_v59 = vand.u32 4294901760, %v7154_v39 }
 0x458   : > { %3943 = vmatpush.msrb.mxu1 %v7136_v16  ;;  %3994 = vmatpush.msrb.mxu2 %v7968_v46  ;;  %v7385_v29 = vand.u32 4294901760, %v7377_v37 }
 0x459   : > { %4057 = vmatpush.msrb.mxu3 %v7105_v56  ;;  %3538 = vmatmul.f32.gmra.mxu2 %v7377_v37  ;;  %v7970_v56 = vand.u32 4294901760, %v7168_v61 }
 0x45a   : > { %3880 = vmatpush.msrb.mxu0 %v7108_v49  ;;  %3945 = vmatpush.msrb.mxu1 %v7151_v0  ;;  %v3372_v63 = vsub.f32 %v7377_v37, %v7385_v29  ;;  %v7971_v49 = vand.u32 4294901760, %v7187_v42 }
 0x45b   : > { %3998 = vmatpush.msrb.mxu2 %v7969_v59  ;;  %4059 = vmatpush.msrb.mxu3 %v7120_v60  ;;  %v7972_v60 = vand.u32 4294901760, %v7204_v62 }
 0x45c   : > { %3583 = vmatmul.f32.gmra.mxu3 %v7385_v29  ;;  %3883 = vmatpush.msrb.mxu0 %v7123_v14  ;;  %v3373_v53 = vand.u32 4294901760, %v3372_v63  ;;  %v7973_v14 = vand.u32 4294901760, %v7216_v11 }
 0x45d   : > { %3947 = vmatpush.msrb.mxu1 %v7165_v51  ;;  %4002 = vmatpush.msrb.mxu2 %v7970_v56  ;;  %v5191_v56 = vmov 0  }
 0x45e   : > { %4061 = vmatpush.msrb.mxu3 %v7136_v16  ;;  %3886 = vmatpush.msrb.mxu0 %v7140_v57  ;;  %v7975_v16 = vand.u32 4294901760, %v7249_v52  ;;  %v7976_v57 = vand.u32 4294901760, %v7268_v40 }
 0x45f   : > { %3949 = vmatpush.msrb.mxu1 %v7184_v27  ;;  %4006 = vmatpush.msrb.mxu2 %v7971_v49 }
 0x460   : > { %4063 = vmatpush.msrb.mxu3 %v7151_v0  ;;  %3374 = vmatmul.f32.gmra.mxu0 %v3373_v53  ;;  %v7974_v0 = vand.u32 4294901760, %v7230_v50 }
 0x461   : > { %3693 = vmatmul.f32.vlgmr.msra.gmra.mxu1 %v7343_v20  ;;  %3889 = vmatpush.msrb.mxu0 %v7154_v39  ;;  %v7977_v39 = vand.u32 4294901760, %v7280_v19 }
 0x462   : > { %3951 = vmatpush.msrb.mxu1 %v7200_v45  ;;  %4010 = vmatpush.msrb.mxu2 %v7972_v60 }
 0x463   : > { %4065 = vmatpush.msrb.mxu3 %v7165_v51  ;;  %3758 = vmatmul.f32.vlgmr.msra.gmra.mxu2 %v3365_v25  ;;  %v7979_v51 = vand.u32 4294901760, %v7313_v34 }
 0x464   : > { %3892 = vmatpush.msrb.mxu0 %v7168_v61  ;;  %3953 = vmatpush.msrb.mxu1 %v7213_v21  ;;  %v7980_v61 = vand.u32 4294901760, %v7324_v7 }
 0x465   : > { %4014 = vmatpush.msrb.mxu2 %v7973_v14  ;;  %4067 = vmatpush.msrb.mxu3 %v7184_v27 }
 0x466   : > { %3867 = vmatmul.f32.vlgmr.msra.gmra.mxu3 %v7343_v20  ;;  %3895 = vmatpush.msrb.mxu0 %v7187_v42 }
 0x467   : > { %3955 = vmatpush.msrb.mxu1 %v7227_v12  ;;  %4018 = vmatpush.msrb.mxu2 %v7974_v0 }
 0x468   : > { %4069 = vmatpush.msrb.mxu3 %v7200_v45  ;;  %3898 = vmatpush.msrb.mxu0 %v7204_v62  ;;  %v7978_v45 = vand.u32 4294901760, %v7294_v35 }
 0x469   : > { %3957 = vmatpush.msrb.mxu1 %v7246_v1  ;;  %4022 = vmatpush.msrb.mxu2 %v7975_v16  ;;  %v4097_v16 = vld [vmem:[%s7836_s11] sm:$0xff] }
 0x46a   : > { %4071 = vmatpush.msrb.mxu3 %v7213_v21  ;;  %3652 = vmatmul.f32.vlgmr.msra.gmra.mxu0 %v7343_v20 }
 0x46b   : > { %3697 = vmatmul.f32.gmra.mxu1 %v7368_v23  ;;  %3901 = vmatpush.msrb.mxu0 %v7216_v11 }
 0x46c   : > { %3959 = vmatpush.msrb.mxu1 %v7262_v2  ;;  %4026 = vmatpush.msrb.mxu2 %v7976_v57 }
 0x46d   : > { %4073 = vmatpush.msrb.mxu3 %v7227_v12  ;;  %3766 = vmatmul.f32.gmra.mxu2 %v3373_v53 }
 0x46e   : > { %3904 = vmatpush.msrb.mxu0 %v7230_v50  ;;  %3961 = vmatpush.msrb.mxu1 %v7277_v5 }
 0x46f   : > { %4030 = vmatpush.msrb.mxu2 %v7977_v39  ;;  %4075 = vmatpush.msrb.mxu3 %v7246_v1 }
 0x470   : > { %3871 = vmatmul.f32.gmra.mxu3 %v7368_v23  ;;  %3907 = vmatpush.msrb.mxu0 %v7249_v52 }
 0x471   : > { %3963 = vmatpush.msrb.mxu1 %v7291_v13  ;;  %4034 = vmatpush.msrb.mxu2 %v7978_v45 }
 0x472   : > { %4077 = vmatpush.msrb.mxu3 %v7262_v2  ;;  %3910 = vmatpush.msrb.mxu0 %v7268_v40 }
 0x473   : > { %3965 = vmatpush.msrb.mxu1 %v7310_v3  ;;  %4038 = vmatpush.msrb.mxu2 %v7979_v51 }
 0x474   : > { %4079 = vmatpush.msrb.mxu3 %v7277_v5  ;;  %3656 = vmatmul.f32.gmra.mxu0 %v7368_v23 }
 0x475   : > { %3969 = vmatmul.f32.vlgmr.msrb.gmra.mxu1 %v7354_v10  ;;  %3913 = vmatpush.msrb.mxu0 %v7280_v19  ;;  %v5181_v19 = vld [vmem:[%s7834_s9] ss:$0 sm:$0xff] }
 0x476   : > { %4042 = vmatpush.msrb.mxu2 %v7980_v61  ;;  %4081 = vmatpush.msrb.mxu3 %v7291_v13 }
 0x477   : > { %4044 = vmatmul.f32.vlgmr.msrb.gmra.mxu2 %v7343_v20  ;;  %3916 = vmatpush.msrb.mxu0 %v7294_v35  ;;  %v5182_v35 = vld [vmem:[%s7835_s10] ss:$0 sm:$0xff] }
 0x478   : > { %4083 = vmatpush.msrb.mxu3 %v7310_v3  ;;  %5177 = vset.pattern.permute.xlu0 %v5191_v56 }
 0x479   : > { %4085 = vmatmul.f32.vlgmr.msrb.gmra.mxu3 %v7343_v20  ;;  %3919 = vmatpush.msrb.mxu0 %v7313_v34 }
 0x47a   : > { %5178 = vset.pattern.permute.xlu1 %v5191_v56  ;;  %4101 = vperm.xlu0 %5177, %v4097_v16  }
 0x47b   : > { %3922 = vmatpush.msrb.mxu0 %v7324_v7 }
 0x47c   : > { %3925 = vmatmul.f32.vlgmr.msrb.gmra.mxu0 %v7347_v44 }
 0x47d   : > { %3975 = vmatmul.f32.gmra.mxu1 %v7385_v29 }
 0x47f   : > { %4048 = vmatmul.f32.gmra.mxu2 %v7368_v23 }
 0x481   : > { %4089 = vmatmul.f32.gmra.mxu3 %v7368_v23 }
 0x484   : > { %3930 = vmatmul.f32.gmra.mxu0 %v7377_v37 }
 0x4cb   : > { %v3476_v11 = vpop.f32.mrf.mxu1 }
 0x4d3   : > { %v3367_v27 = vpop.f32.mrf.mxu0  ;;  %v3534_v42 = vpop.f32.mrf.mxu2 }
 0x4d4   : > { %v3480_v62 = vpop.f32.mrf.mxu1  ;;  %v3368_v7 = vadd.f32 %v5181_v19, %v3367_v27 }
 0x4d5   : > { %v3578_v12 = vpop.f32.mrf.mxu3 }
 0x4d6   : > { %v3477_v6 = vadd.f32 %v3476_v11, %v3368_v7  ;;  %v7983_v7 = vld [vmem:[#allocation9_spill] sm:$0xff] }
 0x4d8   : > { %v3535_v33 = vadd.f32 %v3534_v42, %v3477_v6  ;;  %v7987_v6 = vld [vmem:[#allocation5_spill] sm:$0xff] }
 0x4da   : > { %v3579_v22 = vadd.f32 %v3578_v12, %v3535_v33  ;;  %v4098_v12 = vld [vmem:[%s7836_s11 + $0x8] sm:$0xff] }
 0x4db   : > { %4106 = vperm.xlu1 %5178, %v4098_v12  }
 0x4dc   : > { %v3539_v2 = vpop.f32.mrf.mxu2 }
 0x4dd   : > { %v3375_v21 = vpop.f32.mrf.mxu0 }
 0x4de   : > { %v3694_v1 = vpop.f32.mrf.mxu1  ;;  %v3376_v30 = vadd.f32 %v5181_v19, %v3375_v21  ;;  %v7982_v19 = vld [vmem:[#allocation2_spill] sm:$0xff] }
 0x4df   : > { %v3584_v50 = vpop.f32.mrf.mxu3 }
 0x4e0   : > { %v3481_v4 = vadd.f32 %v3480_v62, %v3376_v30  ;;  %v4518_v30 = vld [vmem:[%s7838_s13 + $0x60] sm:$0xff] }
 0x4e2   : > { %v3540_v48 = vadd.f32 %v3539_v2, %v3481_v4  ;;  %v4517_v4 = vld [vmem:[%s7838_s13 + $0x58] sm:$0xff] }
 0x4e4   : > { %v3585_v63 = vadd.f32 %v3584_v50, %v3540_v48 }
 0x4e6   : > { %v3759_v40 = vpop.f32.mrf.mxu2 }
 0x4e7   : > { %v3653_v52 = vpop.f32.mrf.mxu0  ;;  %v3760_v31 = vadd.f32 %v5182_v35, %v3759_v40 }
 0x4e8   : > { %v3698_v13 = vpop.f32.mrf.mxu1  ;;  %v3654_v58 = vadd.f32 %v3653_v52, %v3579_v22  ;;  %v7558_v22 = vand.u32 4294901760, %v4518_v30 }
 0x4e9   : > { %v3868_v5 = vpop.f32.mrf.mxu3 }
 0x4ea   : > { %v3869_v17 = vadd.f32 %v3868_v5, %v3760_v31  ;;  %v3695_v25 = vadd.f32 %v3694_v1, %v3654_v58  ;;  %v7981_v1 = vld [vmem:[#allocation7_spill] sm:$0xff]  ;;  %v7988_v31 = vld [vmem:[#allocation8_spill] sm:$0xff] }
 0x4f0   : > { %v3767_v34 = vpop.f32.mrf.mxu2 }
 0x4f1   : > { %v3657_v3 = vpop.f32.mrf.mxu0  ;;  %v3768_v10 = vadd.f32 %v5182_v35, %v3767_v34  ;;  %v7985_v35 = vld [vmem:[#allocation4_spill] sm:$0xff]  ;;  %v7986_v34 = vld [vmem:[#allocation6_spill] sm:$0xff] }
 0x4f2   : > { %v3970_v55 = vpop.f32.mrf.mxu1  ;;  %v3658_v60 = vadd.f32 %v3657_v3, %v3585_v63  ;;  %v4299_v3 = vld [vmem:[%s7837_s12] sm:$0xff] }
 0x4f3   : > { %v3872_v8 = vpop.f32.mrf.mxu3  ;;  %4303 = vperm.xlu0 %5177, %v4299_v3  }
 0x4f4   : > { %v3873_v37 = vadd.f32 %v3872_v8, %v3768_v10  ;;  %v3699_v51 = vadd.f32 %v3698_v13, %v3658_v60  ;;  %v7984_v13 = vld [vmem:[#allocation3_spill] sm:$0xff]  ;;  %v7571_v10 = vsub.f32 %v4518_v30, %v7558_v22  ;;  %v4514_v60 = vld [vmem:[%s7838_s13 + $0x40] sm:$0xff] }
 0x4f5   : > { %v4300_v8 = vld [vmem:[%s7837_s12 + $0x8] sm:$0xff] }
 0x4f6   : > { %4308 = vperm.xlu1 %5178, %v4300_v8  }
 0x4f9   : > { %v3926_v20 = vpop.f32.mrf.mxu0 }
 0x4fa   : > { %v3927_v44 = vadd.f32 %v3926_v20, %v3869_v17  ;;  %v4045_v54 = vpop.f32.mrf.mxu2  ;;  %v3976_v49 = vpop.f32.mrf.mxu1 }
 0x4fc   : > { %v3971_v41 = vadd.f32 %v3970_v55, %v3927_v44  ;;  %v4086_v28 = vpop.f32.mrf.mxu3 }
 0x4fe   : > { %v4046_v23 = vadd.f32 %v4045_v54, %v3971_v41  ;;  %v7575_v41 = vand.u32 4294901760, %v4517_v4 }
 0x500   : > { %v4087_v46 = vadd.f32 %v4086_v28, %v4046_v23  ;;  %v4516_v28 = vld [vmem:[%s7838_s13 + $0x50] sm:$0xff] }
 0x501   : > { %v3931_v29 = vpop.f32.mrf.mxu0 }
 0x502   : > { %v4093_v59 = vmax.f32 %v3695_v25, %v4087_v46  ;;  %v3932_v53 = vadd.f32 %v3931_v29, %v3873_v37  ;;  %v4049_v57 = vpop.f32.mrf.mxu2  ;;  %v4591_v25 = vand.u32 4294901760, %v7571_v10  ;;  %v7585_v37 = vand.u32 4294901760, %v4516_v28  ;;  %v4515_v29 = vld [vmem:[%s7838_s13 + $0x48] sm:$0xff] }
 0x503   : > { %v7589_v46 = vsub.f32 %v4517_v4, %v7575_v41  ;;  %v7602_v56 = vand.u32 4294901760, %v4515_v29 }
 0x504   : > { %v7476_v14 = vmax.f32 %v7340_v9, %v4093_v59  ;;  %v3977_v0 = vadd.f32 %v3976_v49, %v3932_v53  ;;  %v4090_v45 = vpop.f32.mrf.mxu3  ;;  %v4592_v59 = vsub.f32 %v7571_v10, %v4591_v25  ;;  %v7600_v53 = vsub.f32 %v4516_v28, %v7585_v37 }
 0x505   : > { %v4597_v49 = vand.u32 4294901760, %v7589_v46 }
 0x506   : > { %v4050_v39 = vadd.f32 %v4049_v57, %v3977_v0  ;;  %v4125_v61 = vand.u32 4294901760, %v7476_v14  ;;  %v4593_v0 = vand.u32 4294901760, %v4592_v59  ;;  %v4603_v16 = vand.u32 4294901760, %v7600_v53  ;;  %v4507_v59 = vld [vmem:[%s7838_s13 + $0x8] sm:$0xff] }
 0x507   : > { %v7612_v57 = vsub.f32 %v4515_v29, %v7602_v56 }
 0x508   : > { %v4091_v11 = vadd.f32 %v4090_v45, %v4050_v39  ;;  %v4165_v9 = vsub.f32 %v7476_v14, %v4125_v61  ;;  %v7614_v39 = vand.u32 4294901760, %v4514_v60  ;;  %v4598_v45 = vsub.f32 %v7589_v46, %v4597_v49 }
 0x50a   : > { %v4094_v27 = vmax.f32 %v3699_v51, %v4091_v11  ;;  %v4166_v2 = vand.u32 4294901760, %v4165_v9  ;;  %v4513_v51 = vld [vmem:[%s7838_s13 + $0x38] sm:$0xff]  ;;  %v4609_v11 = vand.u32 4294901760, %v7612_v57  ;;  %v4599_v12 = vand.u32 4294901760, %v4598_v45 }
 0x50c   : > { %v7483_v42 = vmax.f32 %v7359_v24, %v4094_v27  ;;  %v4167_v52 = vsub.f32 %v4165_v9, %v4166_v2  ;;  %v7630_v27 = vsub.f32 %v4514_v60, %v7614_v39 }
 0x50e   : > { %v4123_v62 = vand.u32 4294901760, %v7483_v42  ;;  %v4168_v5 = vand.u32 4294901760, %v4167_v52  ;;  %v4511_v52 = vld [vmem:[%s7838_s13 + $0x28] sm:$0xff] }
 0x510   : > { %4124 = vmatpush.msra.mxu0 %v4123_v62  ;;  %4287 = vmatpush.msra.mxu3 %v4123_v62  ;;  %v4159_v21 = vsub.f32 %v7483_v42, %v4123_v62 }
 0x512   : > { %4126 = vmatpush.msra.mxu0 %v4125_v61  ;;  %4289 = vmatpush.msra.mxu3 %v4125_v61  ;;  %v4160_v50 = vand.u32 4294901760, %v4159_v21 }
 0x513   : > { %4132 = vmatmul.f32.vlgmr.msra.gmra.mxu0 %v7981_v1  ;;  %4291 = vmatmul.f32.vlgmr.msra.gmra.mxu3 %v7982_v19 }
 0x514   : > { %4427 = vmatpush.msrb.mxu3 %v4123_v62  ;;  %4195 = vmatpush.msrb.mxu0 %v4159_v21  ;;  %v4161_v24 = vsub.f32 %v4159_v21, %v4160_v50 }
 0x515   : > { %4258 = vmatpush.msra.mxu2 %v4160_v50 }
 0x516   : > { %4429 = vmatpush.msrb.mxu3 %v4125_v61  ;;  %4198 = vmatpush.msrb.mxu0 %v4165_v9  ;;  %v4162_v40 = vand.u32 4294901760, %v4161_v24 }
 0x517   : > { %4262 = vmatpush.msra.mxu2 %v4166_v2 }
 0x518   : > { %4326 = vmatpush.msra.mxu0 %v4123_v62  ;;  %4163 = vmatpush.msra.mxu1 %v4162_v40 }
 0x519   : > { %4397 = vmatpush.msrb.mxu2 %v4159_v21 }
 0x51a   : > { %4264 = vmatmul.f32.vlgmr.msra.gmra.mxu2 %v7982_v19  ;;  %4328 = vmatpush.msra.mxu0 %v4125_v61 }
 0x51b   : > { %4400 = vmatpush.msrb.mxu2 %v4165_v9  ;;  %4169 = vmatpush.msra.mxu1 %v4168_v5  ;;  %v7632_v9 = vand.u32 4294901760, %v4513_v51 }
 0x51c   : > { %4140 = vmatmul.f32.gmra.mxu0 %v7983_v7  ;;  %4171 = vmatmul.f32.vlgmr.msra.gmra.mxu1 %v7982_v19  ;;  %v7658_v7 = vand.u32 4294901760, %v4511_v52 }
 0x51d   : > { %4225 = vmatpush.msrb.mxu1 %v4123_v62  ;;  %4295 = vmatmul.f32.gmra.mxu3 %v7984_v13  ;;  %v7645_v1 = vsub.f32 %v4513_v51, %v7632_v9 }
 0x51e   : > { %v7675_v8 = vsub.f32 %v4511_v52, %v7658_v7 }
 0x51f   : > { %4227 = vmatpush.msrb.mxu1 %v4125_v61  ;;  %v4621_v19 = vand.u32 4294901760, %v7645_v1 }
 0x520   : > { %v4633_v30 = vand.u32 4294901760, %v7675_v8 }
 0x521   : > { %4365 = vmatpush.msra.mxu1 %v4162_v40 }
 0x522   : > { %4268 = vmatmul.f32.gmra.mxu2 %v7984_v13  ;;  %v4634_v28 = vsub.f32 %v7675_v8, %v4633_v30 }
 0x523   : > { %4371 = vmatpush.msra.mxu1 %v4168_v5 }
 0x524   : > { %4175 = vmatmul.f32.gmra.mxu1 %v7984_v13  ;;  %4201 = vmatmul.f32.vlgmr.msrb.gmra.mxu0 %v7985_v35  ;;  %v4510_v35 = vld [vmem:[%s7838_s13 + $0x20] sm:$0xff]  ;;  %v4635_v60 = vand.u32 4294901760, %v4634_v28 }
 0x525   : > { %4460 = vmatpush.msrb.mxu0 %v4160_v50  ;;  %4433 = vmatmul.f32.vlgmr.msrb.gmra.mxu3 %v5649_v15  ;;  %v4615_v50 = vand.u32 4294901760, %v7630_v27 }
 0x527   : > { %4464 = vmatpush.msrb.mxu0 %v4166_v2  ;;  %v4610_v2 = vsub.f32 %v7612_v57, %v4609_v11  ;;  %v4616_v5 = vsub.f32 %v7630_v27, %v4615_v50 }
 0x529   : > { %v4611_v40 = vand.u32 4294901760, %v4610_v2 }
 0x52a   : > { %4403 = vmatmul.f32.vlgmr.msrb.gmra.mxu2 %v5642_v47  ;;  %v4521_v47 = vld [vmem:[%s7838_s13 + $0x78] sm:$0xff] }
 0x52b   : > { %v7524_v15 = vand.u32 4294901760, %v4521_v47 }
 0x52c   : > { %4206 = vmatmul.f32.gmra.mxu0 %v7986_v34  ;;  %4231 = vmatmul.f32.vlgmr.msrb.gmra.mxu1 %v7987_v6  ;;  %v4617_v34 = vand.u32 4294901760, %v4616_v5  ;;  %v4622_v6 = vsub.f32 %v7645_v1, %v4621_v19 }
 0x52d   : > { %4489 = vmatpush.msrb.mxu1 %v4123_v62  ;;  %4439 = vmatmul.f32.gmra.mxu3 %v7958_v43  ;;  %v4512_v62 = vld [vmem:[%s7838_s13 + $0x30] sm:$0xff] }
 0x52e   : > { %4523 = vmatpush.msra.mxu2 %v7524_v15  ;;  %v7648_v24 = vand.u32 4294901760, %v4512_v62 }
 0x52f   : > { %4491 = vmatpush.msrb.mxu1 %v4125_v61  ;;  %v4604_v61 = vsub.f32 %v7600_v53, %v4603_v16 }
 0x530   : > { %v7663_v13 = vsub.f32 %v4512_v62, %v7648_v24 }
 0x531   : > { %v4605_v21 = vand.u32 4294901760, %v4604_v61  ;;  %v7725_v61 = vand.u32 4294901760, %v4507_v59 }
 0x532   : > { %4408 = vmatmul.f32.gmra.mxu2 %v7957_v36  ;;  %v7530_v36 = vsub.f32 %v4521_v47, %v7524_v15  ;;  %v4627_v47 = vand.u32 4294901760, %v7663_v13 }
 0x534   : > { %4237 = vmatmul.f32.gmra.mxu1 %v7988_v31  ;;  %4334 = vmatmul.f32.vlgmr.msra.gmra.mxu0 %v7956_v26  ;;  %v4520_v26 = vld [vmem:[%s7838_s13 + $0x70] sm:$0xff]  ;;  %v7677_v31 = vand.u32 4294901760, %v4510_v35 }
 0x535   : > { %v7532_v43 = vand.u32 4294901760, %v4520_v26  ;;  %4678 = vmatpush.msra.mxu0 %v7530_v36 }
 0x537   : > { %4525 = vmatpush.msra.mxu2 %v7532_v43 }
 0x53c   : > { %4342 = vmatmul.f32.gmra.mxu0 %v7959_v32  ;;  %4373 = vmatmul.f32.vlgmr.msra.gmra.mxu1 %v5635_v18  ;;  %v7541_v32 = vsub.f32 %v4520_v26, %v7532_v43  ;;  %v4509_v26 = vld [vmem:[%s7838_s13 + $0x18] sm:$0xff] }
 0x53d   : > { %4736 = vmatpush.msra.mxu1 %v7524_v15  ;;  %v7690_v4 = vand.u32 4294901760, %v4509_v26 }
 0x53e   : > { %v4579_v55 = vand.u32 4294901760, %v7541_v32  ;;  %4681 = vmatpush.msra.mxu0 %v7541_v32 }
 0x53f   : > { %4738 = vmatpush.msra.mxu1 %v7532_v43 }
 0x540   : > { %v4580_v54 = vsub.f32 %v7541_v32, %v4579_v55 }
 0x542   : > { %v4581_v48 = vand.u32 4294901760, %v4580_v54  ;;  %v4508_v54 = vld [vmem:[%s7838_s13 + $0x10] sm:$0xff] }
 0x543   : > { %v7708_v29 = vand.u32 4294901760, %v4508_v54 }
 0x544   : > { %4377 = vmatmul.f32.gmra.mxu1 %v7955_v38  ;;  %4466 = vmatmul.f32.vlgmr.msrb.gmra.mxu0 %v5635_v18 }
 0x545   : > { %v7721_v51 = vsub.f32 %v4508_v54, %v7708_v29 }
 0x54c   : > { %4470 = vmatmul.f32.gmra.mxu0 %v7955_v38  ;;  %4493 = vmatmul.f32.vlgmr.msrb.gmra.mxu1 %v5635_v18  ;;  %v4519_v18 = vld [vmem:[%s7838_s13 + $0x68] sm:$0xff] }
 0x54d   : > { %v7543_v33 = vand.u32 4294901760, %v4519_v18 }
 0x54f   : > { %v7556_v20 = vsub.f32 %v4519_v18, %v7543_v33  ;;  %4527 = vmatpush.msra.mxu2 %v7543_v33  ;;  %4740 = vmatpush.msra.mxu1 %v7543_v33  ;;  %v4623_v18 = vand.u32 4294901760, %v4622_v6 }
 0x551   : > { %v4585_v58 = vand.u32 4294901760, %v7556_v20  ;;  %4529 = vmatpush.msra.mxu2 %v7558_v22  ;;  %4684 = vmatpush.msra.mxu0 %v7556_v20 }
 0x552   : > { %4742 = vmatpush.msra.mxu1 %v7558_v22 }
 0x553   : > { %v4586_v23 = vsub.f32 %v7556_v20, %v4585_v58  ;;  %4687 = vmatpush.msra.mxu0 %v7571_v10  ;;  %4531 = vmatpush.msra.mxu2 %v7575_v41 }
 0x554   : > { %4497 = vmatmul.f32.gmra.mxu1 %v7955_v38  ;;  %v4573_v38 = vand.u32 4294901760, %v7530_v36 }
 0x555   : > { %4744 = vmatpush.msra.mxu1 %v7575_v41  ;;  %v4587_v63 = vand.u32 4294901760, %v4586_v23  ;;  %4533 = vmatpush.msra.mxu2 %v7585_v37  ;;  %v7706_v23 = vsub.f32 %v4509_v26, %v7690_v4 }
 0x556   : > { %v4574_v17 = vsub.f32 %v7530_v36, %v4573_v38  ;;  %4690 = vmatpush.msra.mxu0 %v7589_v46 }
 0x557   : > { %4746 = vmatpush.msra.mxu1 %v7585_v37  ;;  %4535 = vmatpush.msra.mxu2 %v7602_v56  ;;  %v4645_v45 = vand.u32 4294901760, %v7706_v23 }
 0x558   : > { %v4575_v44 = vand.u32 4294901760, %v4574_v17  ;;  %4693 = vmatpush.msra.mxu0 %v7600_v53  ;;  %v7688_v17 = vsub.f32 %v4510_v35, %v7677_v31  ;;  %v7744_v35 = vsub.f32 %v4507_v59, %v7725_v61 }
 0x559   : > { %4748 = vmatpush.msra.mxu1 %v7602_v56  ;;  %4537 = vmatpush.msra.mxu2 %v7614_v39  ;;  %v4646_v52 = vsub.f32 %v7706_v23, %v4645_v45 }
 0x55a   : > { %4576 = vmatpush.msra.mxu3 %v4575_v44  ;;  %4696 = vmatpush.msra.mxu0 %v7612_v57  ;;  %v4628_v44 = vsub.f32 %v7663_v13, %v4627_v47 }
 0x55b   : > { %4750 = vmatpush.msra.mxu1 %v7614_v39  ;;  %4539 = vmatpush.msra.mxu2 %v7632_v9 }
 0x55c   : > { %4582 = vmatpush.msra.mxu3 %v4581_v48  ;;  %4699 = vmatpush.msra.mxu0 %v7630_v27  ;;  %v4639_v48 = vand.u32 4294901760, %v7688_v17 }
 0x55d   : > { %4752 = vmatpush.msra.mxu1 %v7632_v9  ;;  %4541 = vmatpush.msra.mxu2 %v7648_v24 }
 0x55e   : > { %4588 = vmatpush.msra.mxu3 %v4587_v63  ;;  %4702 = vmatpush.msra.mxu0 %v7645_v1  ;;  %v4629_v63 = vand.u32 4294901760, %v4628_v44 }
 0x55f   : > { %4754 = vmatpush.msra.mxu1 %v7648_v24  ;;  %4543 = vmatpush.msra.mxu2 %v7658_v7 }
 0x560   : > { %4594 = vmatpush.msra.mxu3 %v4593_v0  ;;  %4705 = vmatpush.msra.mxu0 %v7663_v13  ;;  %v4640_v0 = vsub.f32 %v7688_v17, %v4639_v48 }
 0x561   : > { %4756 = vmatpush.msra.mxu1 %v7658_v7  ;;  %4545 = vmatpush.msra.mxu2 %v7677_v31 }
 0x562   : > { %4600 = vmatpush.msra.mxu3 %v4599_v12  ;;  %4708 = vmatpush.msra.mxu0 %v7675_v8  ;;  %v4506_v12 = vld [vmem:[%s7838_s13] sm:$0xff]  ;;  %v4641_v2 = vand.u32 4294901760, %v4640_v0 }
 0x563   : > { %4758 = vmatpush.msra.mxu1 %v7677_v31  ;;  %4547 = vmatpush.msra.mxu2 %v7690_v4  ;;  %v7739_v5 = vand.u32 4294901760, %v4506_v12 }
 0x564   : > { %4606 = vmatpush.msra.mxu3 %v4605_v21  ;;  %4711 = vmatpush.msra.mxu0 %v7688_v17 }
 0x565   : > { %4760 = vmatpush.msra.mxu1 %v7690_v4  ;;  %4549 = vmatpush.msra.mxu2 %v7708_v29  ;;  %v7751_v26 = vsub.f32 %v4506_v12, %v7739_v5 }
 0x566   : > { %4612 = vmatpush.msra.mxu3 %v4611_v40  ;;  %v4651_v40 = vand.u32 4294901760, %v7721_v51  ;;  %4714 = vmatpush.msra.mxu0 %v7706_v23 }
 0x567   : > { %4762 = vmatpush.msra.mxu1 %v7708_v29  ;;  %4551 = vmatpush.msra.mxu2 %v7725_v61  ;;  %v4663_v54 = vand.u32 4294901760, %v7751_v26 }
 0x568   : > { %4618 = vmatpush.msra.mxu3 %v4617_v34  ;;  %v4647_v34 = vand.u32 4294901760, %v4646_v52  ;;  %v4652_v6 = vsub.f32 %v7721_v51, %v4651_v40  ;;  %4717 = vmatpush.msra.mxu0 %v7721_v51 }
 0x569   : > { %4764 = vmatpush.msra.mxu1 %v7725_v61  ;;  %4553 = vmatpush.msra.mxu2 %v7739_v5 }
 0x56a   : > { %4624 = vmatpush.msra.mxu3 %v4623_v18  ;;  %v4657_v18 = vand.u32 4294901760, %v7744_v35  ;;  %v4653_v44 = vand.u32 4294901760, %v4652_v6  ;;  %4720 = vmatpush.msra.mxu0 %v7744_v35 }
 0x56b   : > { %4783 = vmatpush.msrb.mxu2 %v4573_v38  ;;  %4766 = vmatpush.msra.mxu1 %v7739_v5 }
 0x56c   : > { %4630 = vmatpush.msra.mxu3 %v4629_v63  ;;  %v4658_v28 = vsub.f32 %v7744_v35, %v4657_v18  ;;  %v4664_v63 = vsub.f32 %v7751_v26, %v4663_v54  ;;  %4723 = vmatpush.msra.mxu0 %v7751_v26 }
 0x56d   : > { %4787 = vmatpush.msrb.mxu2 %v4579_v55 }
 0x56e   : > { %4636 = vmatpush.msra.mxu3 %v4635_v60  ;;  %v4659_v59 = vand.u32 4294901760, %v4658_v28  ;;  %v4665_v36 = vand.u32 4294901760, %v4664_v63 }
 0x56f   : > { %4791 = vmatpush.msrb.mxu2 %v4585_v58  ;;  %v4107_v58 = vpop.permute.xlu1 %4106 }
 0x570   : > { %4642 = vmatpush.msra.mxu3 %v4641_v2 }
 0x571   : > { %4795 = vmatpush.msrb.mxu2 %v4591_v25 }
 0x572   : > { %4648 = vmatpush.msra.mxu3 %v4647_v34 }
 0x573   : > { %4799 = vmatpush.msrb.mxu2 %v4597_v49 }
 0x574   : > { %4654 = vmatpush.msra.mxu3 %v4653_v44 }
 0x575   : > { %4803 = vmatpush.msrb.mxu2 %v4603_v16 }
 0x576   : > { %4660 = vmatpush.msra.mxu3 %v4659_v59 }
 0x577   : > { %4807 = vmatpush.msrb.mxu2 %v4609_v11  ;;  %v4309_v57 = vpop.permute.xlu1 %4308 }
 0x578   : > { %4666 = vmatpush.msra.mxu3 %v4665_v36 }
 0x579   : > { %4811 = vmatpush.msrb.mxu2 %v4615_v50 }
 0x57a   : > { %4854 = vmatpush.msrb.mxu3 %v7524_v15 }
 0x57b   : > { %4815 = vmatpush.msrb.mxu2 %v4621_v19 }
 0x57c   : > { %4856 = vmatpush.msrb.mxu3 %v7532_v43  ;;  %v4102_v43 = vpop.permute.xlu0 %4101 }
 0x57d   : > { %4819 = vmatpush.msrb.mxu2 %v4627_v47 }
 0x57e   : > { %4858 = vmatpush.msrb.mxu3 %v7543_v33 }
 0x57f   : > { %4823 = vmatpush.msrb.mxu2 %v4633_v30 }
 0x580   : > { %4860 = vmatpush.msrb.mxu3 %v7558_v22 }
 0x581   : > { %4827 = vmatpush.msrb.mxu2 %v4639_v48 }
 0x582   : > { %4862 = vmatpush.msrb.mxu3 %v7575_v41 }
 0x583   : > { %4831 = vmatpush.msrb.mxu2 %v4645_v45 }
 0x584   : > { %4864 = vmatpush.msrb.mxu3 %v7585_v37  ;;  %v4304_v41 = vpop.permute.xlu0 %4303 }
 0x585   : > { %4835 = vmatpush.msrb.mxu2 %v4651_v40 }
 0x586   : > { %4866 = vmatpush.msrb.mxu3 %v7602_v56 }
 0x587   : > { %4839 = vmatpush.msrb.mxu2 %v4657_v18 }
 0x588   : > { %4868 = vmatpush.msrb.mxu3 %v7614_v39 }
 0x589   : > { %4843 = vmatpush.msrb.mxu2 %v4663_v54 }
 0x58a   : > { %4870 = vmatpush.msrb.mxu3 %v7632_v9 }
 0x58c   : > { %4872 = vmatpush.msrb.mxu3 %v7648_v24 }
 0x58e   : > { %4874 = vmatpush.msrb.mxu3 %v7658_v7 }
 0x590   : > { %v7669_v3 = vpop.f32.mrf.mxu0  ;;  %4876 = vmatpush.msrb.mxu3 %v7677_v31 }
 0x591   : > { %v4134_v46 = vadd.f32 %v7669_v3, %v4102_v43 }
 0x592   : > { %4878 = vmatpush.msrb.mxu3 %v7690_v4 }
 0x594   : > { %4880 = vmatpush.msrb.mxu3 %v7708_v29 }
 0x596   : > { %v4292_v15 = vpop.f32.mrf.mxu3  ;;  %4882 = vmatpush.msrb.mxu3 %v7725_v61 }
 0x598   : > { %4884 = vmatpush.msrb.mxu3 %v7739_v5 }
 0x599   : > { %v7731_v62 = vpop.f32.mrf.mxu0  ;;  %v7733_v21 = vpop.f32.mrf.mxu1 }
 0x59a   : > { %v4173_v49 = vadd.f32 %v7733_v21, %v4134_v46  ;;  %v4142_v9 = vadd.f32 %v7731_v62, %v4107_v58 }
 0x59d   : > { %v4265_v38 = vpop.f32.mrf.mxu2 }
 0x5a0   : > { %v4296_v10 = vpop.f32.mrf.mxu3 }
 0x5a1   : > { %v4176_v60 = vpop.f32.mrf.mxu1  ;;  %v4202_v0 = vpop.f32.mrf.mxu0 }
 0x5a2   : > { %v4203_v39 = vadd.f32 %v4202_v0, %v4173_v49  ;;  %v4177_v7 = vadd.f32 %v4176_v60, %v4142_v9 }
 0x5a5   : > { %v4269_v22 = vpop.f32.mrf.mxu2 }
 0x5a8   : > { %v4434_v11 = vpop.f32.mrf.mxu3 }
 0x5a9   : > { %v4207_v32 = vpop.f32.mrf.mxu0  ;;  %v4232_v55 = vpop.f32.mrf.mxu1 }
 0x5aa   : > { %v4233_v50 = vadd.f32 %v4232_v55, %v4203_v39  ;;  %v4208_v47 = vadd.f32 %v4207_v32, %v4177_v7 }
 0x5ac   : > { %v4266_v13 = vadd.f32 %v4265_v38, %v4233_v50 }
 0x5ad   : > { %v4404_v56 = vpop.f32.mrf.mxu2 }
 0x5ae   : > { %v4293_v4 = vadd.f32 %v4292_v15, %v4266_v13  ;;  %v4505_v15 = vld [vmem:[%s7839_s14] sm:$0xff] }
 0x5b0   : > { %v4440_v45 = vpop.f32.mrf.mxu3 }
 0x5b1   : > { %v4238_v33 = vpop.f32.mrf.mxu1  ;;  %v4335_v20 = vpop.f32.mrf.mxu0 }
 0x5b2   : > { %v4336_v53 = vadd.f32 %v4335_v20, %v4304_v41  ;;  %v4239_v48 = vadd.f32 %v4238_v33, %v4208_v47  ;;  %v4895_v20 = vsel %vm512_vm0, %v4505_v15, 0 }
 0x5b4   : > { %v4270_v12 = vadd.f32 %v4269_v22, %v4239_v48 }
 0x5b5   : > { %v4409_v31 = vpop.f32.mrf.mxu2 }
 0x5b6   : > { %v4297_v5 = vadd.f32 %v4296_v10, %v4270_v12  ;;  %v4915_v10 = vand.u32 4294901760, %v4895_v20 }
 0x5b8   : > { %v4916_v49 = vsub.f32 %v4895_v20, %v4915_v10 }
 0x5b9   : > { %v4343_v25 = vpop.f32.mrf.mxu0  ;;  %v4374_v37 = vpop.f32.mrf.mxu1 }
 0x5ba   : > { %v4375_v16 = vadd.f32 %v4374_v37, %v4336_v53  ;;  %v4344_v24 = vadd.f32 %v4343_v25, %v4309_v57 }
 0x5bc   : > { %v4405_v1 = vadd.f32 %v4404_v56, %v4375_v16 }
 0x5be   : > { %v4435_v3 = vadd.f32 %v4434_v11, %v4405_v1  ;;  %v4917_v11 = vand.u32 4294901760, %v4916_v49 }
 0x5c1   : > { %v4378_v27 = vpop.f32.mrf.mxu1  ;;  %v4467_v19 = vpop.f32.mrf.mxu0 }
 0x5c2   : > { %v4379_v8 = vadd.f32 %v4378_v27, %v4344_v24  ;;  %v4468_v30 = vadd.f32 %v4467_v19, %v4435_v3  ;;  %v4918_v19 = vsub.f32 %v4916_v49, %v4917_v11 }
 0x5c4   : > { %v4410_v23 = vadd.f32 %v4409_v31, %v4379_v8  ;;  %v4919_v3 = vand.u32 4294901760, %v4918_v19 }
 0x5c6   : > { %v4441_v62 = vadd.f32 %v4440_v45, %v4410_v23 }
 0x5c9   : > { %v4494_v17 = vpop.f32.mrf.mxu1  ;;  %v4471_v61 = vpop.f32.mrf.mxu0 }
 0x5ca   : > { %v4495_v29 = vadd.f32 %v4494_v17, %v4468_v30  ;;  %v4472_v2 = vadd.f32 %v4471_v61, %v4441_v62 }
 0x5cc   : > { %v4501_v51 = vmax.f32 %v4293_v4, %v4495_v29 }
 0x5ce   : > { %v4503_v21 = vmax.f32 %v7476_v14, %v4501_v51 }
 0x5d0   : > { %v4554_v52 = vand.u32 4294901760, %v4503_v21 }
 0x5d1   : > { %v4498_v40 = vpop.f32.mrf.mxu1 }
 0x5d2   : > { %v4555_v35 = vsub.f32 %v4503_v21, %v4554_v52  ;;  %v4499_v34 = vadd.f32 %v4498_v40, %v4472_v2  ;;  %4668 = vmatmul.f32.vlgmr.msra.gmra.mxu3 %v4554_v52 }
 0x5d4   : > { %v4556_v6 = vand.u32 4294901760, %v4555_v35  ;;  %v4502_v26 = vmax.f32 %v4297_v5, %v4499_v34  ;;  %4726 = vmatmul.f32.vlgmr.msra.gmra.mxu0 %v4555_v35 }
 0x5d6   : > { %v4557_v18 = vsub.f32 %v4555_v35, %v4556_v6  ;;  %v4504_v44 = vmax.f32 %v7483_v42, %v4502_v26  ;;  %4770 = vmatmul.f32.vlgmr.msra.gmra.mxu1 %v4556_v6 }
 0x5d8   : > { %v4558_v54 = vand.u32 4294901760, %v4557_v18  ;;  %v4562_v28 = vand.u32 4294901760, %v4504_v44 }
 0x5da   : > { %4559 = vmatmul.f32.vlgmr.msra.gmra.mxu2 %v4558_v54  ;;  %4672 = vmatmul.f32.gmra.mxu3 %v4562_v28  ;;  %v4563_v63 = vsub.f32 %v4504_v44, %v4562_v28 }
 0x5dc   : > { %4731 = vmatmul.f32.gmra.mxu0 %v4563_v63  ;;  %v4564_v14 = vand.u32 4294901760, %v4563_v63 }
 0x5de   : > { %4776 = vmatmul.f32.gmra.mxu1 %v4564_v14  ;;  %v4565_v59 = vsub.f32 %v4563_v63, %v4564_v14 }
 0x5e0   : > { %v4566_v60 = vand.u32 4294901760, %v4565_v59 }
 0x5e2   : > { %4567 = vmatmul.f32.gmra.mxu2 %v4566_v60  ;;  %4886 = vmatmul.f32.vlgmr.msrb.gmra.mxu3 %v4554_v52 }
 0x5ea   : > { %4845 = vmatmul.f32.vlgmr.msrb.gmra.mxu2 %v4554_v52  ;;  %4890 = vmatmul.f32.gmra.mxu3 %v4562_v28 }
 0x5f2   : > { %4849 = vmatmul.f32.gmra.mxu2 %v4562_v28 }
 0x651   : > { %v4727_v32 = vpop.f32.mrf.mxu0 }
 0x653   : > { %v4771_v33 = vpop.f32.mrf.mxu1 }
 0x655   : > { %v4669_v0 = vpop.f32.mrf.mxu3 }
 0x659   : > { %v4732_v46 = vpop.f32.mrf.mxu0 }
 0x65b   : > { %v4777_v16 = vpop.f32.mrf.mxu1 }
 0x65d   : > { %v4560_v36 = vpop.f32.mrf.mxu2  ;;  %v4673_v38 = vpop.f32.mrf.mxu3 }
 0x65e   : > { %v4670_v42 = vadd.f32 %v4669_v0, %v4560_v36 }
 0x660   : > { %v4728_v43 = vadd.f32 %v4727_v32, %v4670_v42 }
 0x662   : > { %v4772_v58 = vadd.f32 %v4771_v33, %v4728_v43 }
 0x665   : > { %v4568_v55 = vpop.f32.mrf.mxu2  ;;  %v4887_v41 = vpop.f32.mrf.mxu3 }
 0x666   : > { %v4674_v22 = vadd.f32 %v4673_v38, %v4568_v55 }
 0x668   : > { %v4733_v53 = vadd.f32 %v4732_v46, %v4674_v22 }
 0x66a   : > { %v4778_v39 = vadd.f32 %v4777_v16, %v4733_v53 }
 0x66d   : > { %v4846_v25 = vpop.f32.mrf.mxu2  ;;  %v4891_v50 = vpop.f32.mrf.mxu3 }
 0x66e   : > { %v4847_v37 = vadd.f32 %v4846_v25, %v4772_v58 }
 0x670   : > { %v4888_v56 = vadd.f32 %v4887_v41, %v4847_v37 }
 0x672   : > { %v4913_v57 = vand.u32 4294901760, %v4888_v56 }
 0x674   : > { %v4945_v24 = vsub.f32 %v4888_v56, %v4913_v57 }
 0x675   : > { %v4850_v27 = vpop.f32.mrf.mxu2 }
 0x676   : > { %v4851_v9 = vadd.f32 %v4850_v27, %v4778_v39  ;;  %v4946_v8 = vand.u32 4294901760, %v4945_v24 }
 0x678   : > { %v4892_v1 = vadd.f32 %v4891_v50, %v4851_v9  ;;  %v4947_v30 = vsub.f32 %v4945_v24, %v4946_v8 }
 0x67a   : > { %v4911_v7 = vand.u32 4294901760, %v4892_v1  ;;  %v4948_v4 = vand.u32 4294901760, %v4947_v30 }
 0x67c   : > { %v4939_v13 = vsub.f32 %v4892_v1, %v4911_v7  ;;  %4912 = vmatpush.msrb.mxu0 %v4911_v7 }
 0x67e   : > { %4914 = vmatpush.msrb.mxu0 %v4913_v57  ;;  %v4940_v31 = vand.u32 4294901760, %v4939_v13 }
 0x67f   : > { %4920 = vmatmul.f32.vlgmr.msrb.gmra.mxu0 %v4919_v3 }
 0x680   : > { %4971 = vmatpush.msra.mxu0 %v4939_v13  ;;  %v4941_v47 = vsub.f32 %v4939_v13, %v4940_v31 }
 0x682   : > { %4974 = vmatpush.msra.mxu0 %v4945_v24  ;;  %v4942_v17 = vand.u32 4294901760, %v4941_v47 }
 0x684   : > { %5023 = vmatpush.msrb.mxu0 %v4940_v31  ;;  %4943 = vmatpush.msrb.mxu1 %v4942_v17 }
 0x686   : > { %5027 = vmatpush.msrb.mxu0 %v4946_v8  ;;  %4949 = vmatpush.msrb.mxu1 %v4948_v4 }
 0x687   : > { %4951 = vmatmul.f32.vlgmr.msrb.gmra.mxu1 %v4915_v10  ;;  %4977 = vmatmul.f32.vlgmr.msra.gmra.mxu0 %v4916_v49 }
 0x688   : > { %4996 = vmatpush.msra.mxu1 %v4911_v7 }
 0x68a   : > { %4998 = vmatpush.msra.mxu1 %v4913_v57 }
 0x68c   : > { %5048 = vmatpush.msrb.mxu1 %v4911_v7 }
 0x68e   : > { %5050 = vmatpush.msrb.mxu1 %v4913_v57 }
 0x68f   : > { %5002 = vmatmul.f32.vlgmr.msra.gmra.mxu1 %v4917_v11  ;;  %5029 = vmatmul.f32.vlgmr.msrb.gmra.mxu0 %v4915_v10 }
 0x697   : > { %5052 = vmatmul.f32.vlgmr.msrb.gmra.mxu1 %v4915_v10 }
 0x6fc   : > { %v4921_v48 = vpop.f32.mrf.mxu0 }
 0x704   : > { %v4952_v23 = vpop.f32.mrf.mxu1  ;;  %v4978_v29 = vpop.f32.mrf.mxu0 }
 0x705   : > { %v4953_v45 = vadd.f32 %v4952_v23, %v4921_v48 }
 0x707   : > { %v4979_v61 = vadd.f32 %v4978_v29, %v4953_v45 }
 0x70c   : > { %v5003_v51 = vpop.f32.mrf.mxu1  ;;  %v5030_v62 = vpop.f32.mrf.mxu0 }
 0x70d   : > { %v5004_v12 = vadd.f32 %v5003_v51, %v4979_v61 }
 0x70f   : > { %v5031_v21 = vadd.f32 %v5030_v62, %v5004_v12 }
 0x714   : > { %v5053_v2 = vpop.f32.mrf.mxu1 }
 0x715   : > { %v5054_v52 = vadd.f32 %v5053_v2, %v5031_v21 }
 0x717   : > { %5056 = vst.msk [vmem:[%s494_s21] sm:$0xff] %vm717_vm1, %v5054_v52 }
 0x718 PF: > { %s25_s18 = sadd.s32 1, %s5189_s18  }
 0x719   : > { %p22_p5 = scmp.ge.s32.totalorder %s25_s18, 4  }
 0x71b   :  { %24 = sbr.rel (!%p22_p5) target bundleno = 1 (0x1), region = 114 }

</bundles_post_ra>
